<compile_context>
chip_gen: v7x
topology: tpu7x:2x2x1
jax: 0.10.0
libtpu: 0.0.40
codegen_flags: <defaults>
</compile_context>

<pallas_src>
import jax
import jax.numpy as jnp
from jax.experimental import pallas as pl
from jax.experimental.pallas import tpu as pltpu

OUT_CH = 204      # PyTorch module's output channels
OUT_PAD = 256     # lane-padded channel count used inside the kernels
_K_TILE = 512     # K (reduction) tile for the branch matmuls


# ---------------------------------------------------------------------------
# helpers
# ---------------------------------------------------------------------------
def _round_up(x, m):
    return ((x + m - 1) // m) * m


def _pick_tile_hw(hw):
    """Spatial tile (rows per batch item) used by the fused concat+conv kernel."""
    if hw <= 512:
        return _round_up(hw, 8)
    for t in (512, 256):
        if hw % t == 0:
            return t
    return 256


def _pick_tile_m(mp, tile_hw):
    """Row tile for the per-branch matmul kernels (can span batch items)."""
    for t in (1024, 512):
        if t >= tile_hw and mp % t == 0:
            return t
    return tile_hw


def _pad_k(k):
    return k if k <= _K_TILE else _round_up(k, _K_TILE)


def _pad_axis(a, axis, new_size):
    if a.shape[axis] == new_size:
        return a
    pad = [(0, 0)] * a.ndim
    pad[axis] = (0, new_size - a.shape[axis])
    return jnp.pad(a, pad)


# ---------------------------------------------------------------------------
# Pallas kernels
# ---------------------------------------------------------------------------
def _matmul_shift_relu_kernel(x_ref, w_ref, shift_ref, o_ref, acc_ref):
    """relu(x @ w + shift), K tiled over grid axis 1 with an f32 accumulator."""
    @pl.when(pl.program_id(1) == 0)
    def _():
        acc_ref[...] = jnp.zeros_like(acc_ref)

    acc_ref[...] += jnp.dot(x_ref[...], w_ref[...],
                            preferred_element_type=jnp.float32)

    @pl.when(pl.program_id(1) == pl.num_programs(1) - 1)
    def _():
        o_ref[...] = jnp.maximum(acc_ref[...] + shift_ref[...], 0.0
                                 ).astype(o_ref.dtype)


def matmul_shift_relu(x2d, w, shift, tile_m):
    """Fused (M,K)@(K,256) conv + folded-BN shift + ReLU, bf16 in / bf16 out."""
    M, K = x2d.shape
    Kp, O = w.shape
    x2d = _pad_axis(x2d, 1, Kp)                      # zero-pad K to match weight
    tile_k = Kp if Kp <= _K_TILE else _K_TILE
    grid = (M // tile_m, Kp // tile_k)
    return pl.pallas_call(
        _matmul_shift_relu_kernel,
        out_shape=jax.ShapeDtypeStruct((M, O), jnp.bfloat16),
        grid_spec=pltpu.PrefetchScalarGridSpec(
            num_scalar_prefetch=0,
            grid=grid,
            in_specs=[
                pl.BlockSpec((tile_m, tile_k), lambda i, k: (i, k)),
                pl.BlockSpec((tile_k, O), lambda i, k: (k, 0)),
                pl.BlockSpec((1, O), lambda i, k: (0, 0)),
            ],
            out_specs=pl.BlockSpec((tile_m, O), lambda i, k: (i, 0)),
            scratch_shapes=[pltpu.VMEM((tile_m, O), jnp.float32)],
        ),
        compiler_params=pltpu.CompilerParams(
            dimension_semantics=("parallel", "arbitrary")),
    )(x2d, w, shift)


def _concat_conv_kernel(y1_ref, y2_ref, y3_ref, y4_ref, wc_ref, shift_ref, o_ref):
    """Fused torch.cat(dim=1) + 1x1 conv + bn1 + ReLU:
       out = relu(sum_b y_b @ Wc_b + shift_eff[batch])."""
    acc = jnp.dot(y1_ref[0], wc_ref[0], preferred_element_type=jnp.float32)
    acc = acc + jnp.dot(y2_ref[0], wc_ref[1], preferred_element_type=jnp.float32)
    acc = acc + jnp.dot(y3_ref[0], wc_ref[2], preferred_element_type=jnp.float32)
    acc = acc + jnp.dot(y4_ref[0], wc_ref[3], preferred_element_type=jnp.float32)
    o_ref[0] = jnp.maximum(acc + shift_ref[0], 0.0)


def fused_concat_conv(y_list, wc_stack, shift_eff, n, hw_pad, tile_hw):
    O = wc_stack.shape[-1]
    y3d = [y.reshape(n, hw_pad, O) for y in y_list]
    grid = (n, hw_pad // tile_hw)
    y_spec = pl.BlockSpec((1, tile_hw, O), lambda b, s: (b, s, 0))
    return pl.pallas_call(
        _concat_conv_kernel,
        out_shape=jax.ShapeDtypeStruct((n, hw_pad, O), jnp.float32),
        grid_spec=pltpu.PrefetchScalarGridSpec(
            num_scalar_prefetch=0,
            grid=grid,
            in_specs=[y_spec, y_spec, y_spec, y_spec,
                      pl.BlockSpec((4, O, O), lambda b, s: (0, 0, 0)),
                      pl.BlockSpec((1, 1, O), lambda b, s: (b, 0, 0))],
            out_specs=pl.BlockSpec((1, tile_hw, O), lambda b, s: (b, s, 0)),
        ),
        compiler_params=pltpu.CompilerParams(
            dimension_semantics=("parallel", "parallel")),
    )(*y3d, wc_stack, shift_eff)


def global_avg_pool(x3, hw_valid, tile_hw):
    """Per-batch channel mean of x3 (N, HW_pad, C) bf16 -> (N, C) f32.
    Tiled reduction over the spatial axis; output block stays resident."""
    N, HWp, C = x3.shape
    inv = 1.0 / float(hw_valid)

    def kernel(x_ref, o_ref):
        @pl.when(pl.program_id(0) == 0)
        def _():
            o_ref[...] = jnp.zeros_like(o_ref)

        o_ref[...] += jnp.sum(x_ref[...].astype(jnp.float32), axis=1)

        @pl.when(pl.program_id(0) == pl.num_programs(0) - 1)
        def _():
            o_ref[...] = o_ref[...] * inv

    return pl.pallas_call(
        kernel,
        out_shape=jax.ShapeDtypeStruct((N, C), jnp.float32),
        grid_spec=pltpu.PrefetchScalarGridSpec(
            num_scalar_prefetch=0,
            grid=(HWp // tile_hw,),
            in_specs=[pl.BlockSpec((N, tile_hw, C), lambda s: (0, s, 0))],
            out_specs=pl.BlockSpec((N, C), lambda s: (0, 0)),
        ),
        compiler_params=pltpu.CompilerParams(
            dimension_semantics=("arbitrary",)),
    )(x3)


# ---------------------------------------------------------------------------
# Glue: im2col for dilated 3x3 convs, weight/BN folding + padding, init
# ---------------------------------------------------------------------------
def im2col_3x3(x_nhwc, dilation):
    """Dilated 3x3 patches, 'same' padding=dilation. Returns (N,H,W,9*C),
    tap order (ky, kx, c) — matches conv_w_to_mat below."""
    # TODO(synk): compute the 9 dilated taps inside the matmul kernel (halo
    # BlockSpec / shifted row loads) instead of materializing 9*C in HBM.
    N, H, W, C = x_nhwc.shape
    d = dilation
    xp = jnp.pad(x_nhwc, ((0, 0), (d, d), (d, d), (0, 0)))
    taps = []
    for ky in range(3):
        for kx in range(3):
            taps.append(xp[:, ky * d: ky * d + H, kx * d: kx * d + W, :])
    return jnp.concatenate(taps, axis=-1)


def conv_w_to_mat(w_oihw):
    """PyTorch conv weight (O, C, kh, kw) -> (kh*kw*C, O), (ky,kx,c) order."""
    O, C, kh, kw = w_oihw.shape
    return jnp.transpose(w_oihw, (2, 3, 1, 0)).reshape(kh * kw * C, O)


def bn_fold(gamma, beta, mean, var, eps=1e-5):
    scale = gamma / jnp.sqrt(var + eps)
    shift = beta - mean * scale
    return scale, shift


def init_params(key, in_channels):
    """Random params in PyTorch layout (conv OIHW weights + BN stats)."""
    def conv_w(k, o, c, kh, kw):
        return 0.1 * jax.random.normal(k, (o, c, kh, kw), jnp.float32)

    def bn(k, ch):
        kg, kb, km, kv = jax.random.split(k, 4)
        return (1.0 + 0.1 * jax.random.normal(kg, (ch,), jnp.float32),
                0.1 * jax.random.normal(kb, (ch,), jnp.float32),
                0.1 * jax.random.normal(km, (ch,), jnp.float32),
                jnp.abs(jax.random.normal(kv, (ch,), jnp.float32)) + 0.5)

    ks = jax.random.split(key, 12)
    raw = {
        "aspp1_w": conv_w(ks[0], OUT_CH, in_channels, 1, 1),
        "aspp1_bn": bn(ks[1], OUT_CH),
        "pool_w": conv_w(ks[8], OUT_CH, in_channels, 1, 1),
        "pool_bn": bn(ks[9], OUT_CH),
        "conv1_w": conv_w(ks[10], OUT_CH, 5 * OUT_CH, 1, 1),
        "bn1": bn(ks[11], OUT_CH),
    }
    for idx, i in enumerate((2, 3, 4)):
        raw[f"aspp{i}_w"] = conv_w(ks[2 + 2 * idx], OUT_CH, in_channels, 3, 3)
        raw[f"aspp{i}_bn"] = bn(ks[3 + 2 * idx], OUT_CH)
    return raw


def prepare_params(raw):
    """Fold BN into the weights (w' = w*scale), pad channels 204->256, pad K to
    the K-tile, cast matmul operands to bf16. Shift vectors stay f32."""
    p = {}
    # branches 1..4 (conv + BN + ReLU)
    for i in (1, 2, 3, 4):
        w = conv_w_to_mat(raw[f"aspp{i}_w"])                      # (K, 204)
        scale, shift = bn_fold(*raw[f"aspp{i}_bn"])
        K = w.shape[0]
        Kp = _pad_k(K)
        wf = jnp.zeros((Kp, OUT_PAD), jnp.float32)
        wf = wf.at[:K, :OUT_CH].set(w * scale[None, :])
        p[f"w{i}"] = wf.astype(jnp.bfloat16)
        p[f"b{i}"] = jnp.zeros((1, OUT_PAD), jnp.float32).at[0, :OUT_CH].set(shift)

    # avg-pool branch 1x1 conv + BN (tiny: done in f32 jnp on the pooled vector)
    w5 = conv_w_to_mat(raw["pool_w"])                             # (C, 204)
    s5, b5 = bn_fold(*raw["pool_bn"])
    C = w5.shape[0]
    p["w5_f32"] = jnp.zeros((C, OUT_PAD), jnp.float32).at[:, :OUT_CH].set(
        w5 * s5[None, :])
    p["b5"] = jnp.zeros((1, OUT_PAD), jnp.float32).at[0, :OUT_CH].set(b5)

    # final 1x1 conv + bn1, split into 5 per-branch (256, 256) slices so the
    # channel concat can be fused away (ordering matches torch.cat(dim=1)).
    wc = conv_w_to_mat(raw["conv1_w"])                            # (1020, 204)
    sc, bc = bn_fold(*raw["bn1"])
    wc = wc * sc[None, :]
    slices = []
    for b in range(5):
        blk = jnp.zeros((OUT_PAD, OUT_PAD), jnp.float32)
        blk = blk.at[:OUT_CH, :OUT_CH].set(wc[b * OUT_CH:(b + 1) * OUT_CH, :])
        slices.append(blk)
    p["wc_stack"] = jnp.stack(slices[:4]).astype(jnp.bfloat16)    # (4, 256, 256)
    p["wc5_f32"] = slices[4]                                      # (256, 256) f32
    p["bc"] = jnp.zeros((1, OUT_PAD), jnp.float32).at[0, :OUT_CH].set(bc)
    return p


# ---------------------------------------------------------------------------
# ASPP forward
# ---------------------------------------------------------------------------
def aspp_forward(x_nchw, params, output_stride=16):
    assert output_stride in (8, 16)
    dilations = [1, 6, 12, 18] if output_stride == 16 else [1, 12, 24, 36]
    N, C, H, W = x_nchw.shape
    HW = H * W
    tile_hw = _pick_tile_hw(HW)
    HWp = _round_up(HW, tile_hw)
    Mp = N * HWp
    tile_m = _pick_tile_m(Mp, tile_hw)

    x = jnp.transpose(x_nchw, (0, 2, 3, 1)).astype(jnp.bfloat16)   # NHWC bf16
    x3 = _pad_axis(x.reshape(N, HW, C), 1, HWp)                    # (N, HWp, C)
    x2d = x3.reshape(Mp, C)

    # branch 1: 1x1 conv + BN + ReLU
    ys = [matmul_shift_relu(x2d, params["w1"], params["b1"], tile_m)]
    # branches 2..4: dilated 3x3 conv + BN + ReLU (im2col -> K-tiled fused matmul)
    for i, d in zip((2, 3, 4), dilations[1:]):
        patches = im2col_3x3(x, d).reshape(N, HW, 9 * C)
        patches = _pad_axis(patches, 1, HWp).reshape(Mp, 9 * C)
        ys.append(matmul_shift_relu(patches, params[f"w{i}"], params[f"b{i}"],
                                    tile_m))

    # branch 5: global avg pool -> 1x1 conv + BN + ReLU. The bilinear upsample of
    # a 1x1 map (align_corners=True) is a per-batch broadcast, so its final-conv
    # contribution y5 @ Wc5 is constant per batch and folded into the shift of
    # the fused concat+conv kernel — no (M, 204) broadcast tensor in HBM.
    pool_mean = global_avg_pool(x3, HW, tile_hw)                   # (N, C) f32
    y5 = jnp.maximum(pool_mean @ params["w5_f32"] + params["b5"], 0.0)
    shift_eff = (params["bc"] + y5 @ params["wc5_f32"]).reshape(N, 1, OUT_PAD)

    # fused concat + conv1 + bn1 + ReLU
    out = fused_concat_conv(ys, params["wc_stack"], shift_eff, N, HWp, tile_hw)
    out = out[:, :HW, :OUT_CH].reshape(N, H, W, OUT_CH)
    # dropout(0.5): identity in eval mode
    return jnp.transpose(out, (0, 3, 1, 2))                        # back to NCHW


if __name__ == "__main__":
    key = jax.random.PRNGKey(0)
    k_x, k_p = jax.random.split(key)

    N, C_in, H, W = 2, 4, 16, 16
    x = jax.random.normal(k_x, (N, C_in, H, W), jnp.float32)
    params = prepare_params(init_params(k_p, C_in))

    fwd = jax.jit(aspp_forward, static_argnames=("output_stride",))
    out = jax.block_until_ready(fwd(x, params, output_stride=16))

    assert out.shape == (N, OUT_CH, H, W), out.shape
    assert bool(jnp.all(jnp.isfinite(out)))
    assert bool(jnp.all(out >= 0.0))  # ReLU output
    print("KERNEL_OK")
</pallas_src>

<mosaic_0001>
module attributes {stable_mosaic.version = 11 : i64} {
  func.func @_matmul_shift_relu_kernel(%arg0: i32, %arg1: i32, %arg2: memref<512x36xbf16, #tpu.memory_space<vmem>>, %arg3: memref<36x256xbf16, #tpu.memory_space<vmem>>, %arg4: memref<1x256xf32, #tpu.memory_space<vmem>>, %arg5: memref<512x256xbf16, #tpu.memory_space<vmem>>, %arg6: memref<512x256xf32, #tpu.memory_space<vmem>>) attributes {dimension_semantics = [#tpu.dimension_semantics<parallel>, #tpu.dimension_semantics<arbitrary>], iteration_bounds = array<i64: 1, 1>, scalar_prefetch = 0 : i64, scratch_operands = 1 : i64, tpu.core_type = #tpu.core_type<tc>, window_params = [{transform_indices = @transform_0, window_bounds = array<i64: 512, 36>}, {transform_indices = @transform_1, window_bounds = array<i64: 36, 256>}, {pipeline_mode = #tpu.pipeline_mode<synchronous>, transform_indices = @transform_2, window_bounds = array<i64: 1, 256>}, {transform_indices = @transform_3, window_bounds = array<i64: 512, 256>}]} {
    %c0_i32 = arith.constant 0 : i32
    %0 = arith.cmpi eq, %arg1, %c0_i32 : i32
    %1 = arith.extui %0 : i1 to i32
    %c0_i32_0 = arith.constant 0 : i32
    %2 = arith.cmpi ne, %1, %c0_i32_0 : i32
    scf.if %2 {
      %cst_10 = arith.constant 0.000000e+00 : f32
      %12 = vector.broadcast %cst_10 : f32 to vector<512x256xf32>
      %c0_11 = arith.constant 0 : index
      %c0_12 = arith.constant 0 : index
      %13 = vector.load %arg6[%c0_11, %c0_12] : memref<512x256xf32, #tpu.memory_space<vmem>>, vector<512x256xf32>
      tpu.vector_store %arg6[%c0_11, %c0_12], %12 {strides = array<i32>} : memref<512x256xf32, #tpu.memory_space<vmem>>, vector<512x256xf32>,
    } else {
    }
    %c0 = arith.constant 0 : index
    %c0_1 = arith.constant 0 : index
    %3 = vector.load %arg6[%c0, %c0_1] : memref<512x256xf32, #tpu.memory_space<vmem>>, vector<512x256xf32>
    %c0_2 = arith.constant 0 : index
    %c0_3 = arith.constant 0 : index
    %4 = vector.load %arg2[%c0_2, %c0_3] : memref<512x36xbf16, #tpu.memory_space<vmem>>, vector<512x36xbf16>
    %c0_4 = arith.constant 0 : index
    %c0_5 = arith.constant 0 : index
    %5 = vector.load %arg3[%c0_4, %c0_5] : memref<36x256xbf16, #tpu.memory_space<vmem>>, vector<36x256xbf16>
    %cst = arith.constant dense<0.000000e+00> : vector<512x256xf32>
    %6 = tpu.matmul %4, %5, %cst {dimension_numbers = #tpu.dot_dimension_numbers<[1], [0], [0], [1], [0, 0, 1, 1], [], []>} : vector<512x36xbf16>, vector<36x256xbf16>, vector<512x256xf32> -> vector<512x256xf32>
    %7 = arith.addf %3, %6 : vector<512x256xf32>
    %c0_6 = arith.constant 0 : index
    %c0_7 = arith.constant 0 : index
    %8 = vector.load %arg6[%c0_6, %c0_7] : memref<512x256xf32, #tpu.memory_space<vmem>>, vector<512x256xf32>
    tpu.vector_store %arg6[%c0_6, %c0_7], %7 {strides = array<i32>} : memref<512x256xf32, #tpu.memory_space<vmem>>, vector<512x256xf32>,
    %c0_i32_8 = arith.constant 0 : i32
    %9 = arith.cmpi eq, %arg1, %c0_i32_8 : i32
    %10 = arith.extui %9 : i1 to i32
    %c0_i32_9 = arith.constant 0 : i32
    %11 = arith.cmpi ne, %10, %c0_i32_9 : i32
    scf.if %11 {
      %c0_10 = arith.constant 0 : index
      %c0_11 = arith.constant 0 : index
      %12 = vector.load %arg6[%c0_10, %c0_11] : memref<512x256xf32, #tpu.memory_space<vmem>>, vector<512x256xf32>
      %c0_12 = arith.constant 0 : index
      %c0_13 = arith.constant 0 : index
      %13 = vector.load %arg4[%c0_12, %c0_13] : memref<1x256xf32, #tpu.memory_space<vmem>>, vector<1x256xf32>
      %14 = vector.broadcast %13 : vector<1x256xf32> to vector<512x256xf32>
      %15 = arith.addf %12, %14 : vector<512x256xf32>
      %cst_14 = arith.constant 0.000000e+00 : f32
      %16 = vector.broadcast %cst_14 : f32 to vector<512x256xf32>
      %17 = arith.maximumf %15, %16 : vector<512x256xf32>
      %18 = arith.truncf %17 : vector<512x256xf32> to vector<512x256xbf16>
      %c0_15 = arith.constant 0 : index
      %c0_16 = arith.constant 0 : index
      %19 = vector.load %arg5[%c0_15, %c0_16] : memref<512x256xbf16, #tpu.memory_space<vmem>>, vector<512x256xbf16>
      tpu.vector_store %arg5[%c0_15, %c0_16], %18 {strides = array<i32>} : memref<512x256xbf16, #tpu.memory_space<vmem>>, vector<512x256xbf16>,
    } else {
    }
    return
  }
  func.func @transform_0(%arg0: i32, %arg1: i32) -> (i32, i32) {
    %c0_i32 = arith.constant 0 : i32
    return %arg0, %arg1 : i32, i32
  }
  func.func @transform_1(%arg0: i32, %arg1: i32) -> (i32, i32) {
    %c0_i32 = arith.constant 0 : i32
    %c0_i32_0 = arith.constant 0 : i32
    return %arg1, %c0_i32 : i32, i32
  }
  func.func @transform_2(%arg0: i32, %arg1: i32) -> (i32, i32) {
    %c0_i32 = arith.constant 0 : i32
    %c0_i32_0 = arith.constant 0 : i32
    %c0_i32_1 = arith.constant 0 : i32
    return %c0_i32, %c0_i32_0 : i32, i32
  }
  func.func @transform_3(%arg0: i32, %arg1: i32) -> (i32, i32) {
    %c0_i32 = arith.constant 0 : i32
    %c0_i32_0 = arith.constant 0 : i32
    return %arg0, %c0_i32 : i32, i32
  }
}

module attributes {stable_mosaic.version = 11 : i64} {
  func.func @_matmul_shift_relu_kernel(%arg0: i32, %arg1: i32, %arg2: memref<512x4xbf16, #tpu.memory_space<vmem>>, %arg3: memref<4x256xbf16, #tpu.memory_space<vmem>>, %arg4: memref<1x256xf32, #tpu.memory_space<vmem>>, %arg5: memref<512x256xbf16, #tpu.memory_space<vmem>>, %arg6: memref<512x256xf32, #tpu.memory_space<vmem>>) attributes {dimension_semantics = [#tpu.dimension_semantics<parallel>, #tpu.dimension_semantics<arbitrary>], iteration_bounds = array<i64: 1, 1>, scalar_prefetch = 0 : i64, scratch_operands = 1 : i64, tpu.core_type = #tpu.core_type<tc>, window_params = [{transform_indices = @transform_0, window_bounds = array<i64: 512, 4>}, {transform_indices = @transform_1, window_bounds = array<i64: 4, 256>}, {pipeline_mode = #tpu.pipeline_mode<synchronous>, transform_indices = @transform_2, window_bounds = array<i64: 1, 256>}, {transform_indices = @transform_3, window_bounds = array<i64: 512, 256>}]} {
    %c0_i32 = arith.constant 0 : i32
    %0 = arith.cmpi eq, %arg1, %c0_i32 : i32
    %1 = arith.extui %0 : i1 to i32
    %c0_i32_0 = arith.constant 0 : i32
    %2 = arith.cmpi ne, %1, %c0_i32_0 : i32
    scf.if %2 {
      %cst_10 = arith.constant 0.000000e+00 : f32
      %12 = vector.broadcast %cst_10 : f32 to vector<512x256xf32>
      %c0_11 = arith.constant 0 : index
      %c0_12 = arith.constant 0 : index
      %13 = vector.load %arg6[%c0_11, %c0_12] : memref<512x256xf32, #tpu.memory_space<vmem>>, vector<512x256xf32>
      tpu.vector_store %arg6[%c0_11, %c0_12], %12 {strides = array<i32>} : memref<512x256xf32, #tpu.memory_space<vmem>>, vector<512x256xf32>,
    } else {
    }
    %c0 = arith.constant 0 : index
    %c0_1 = arith.constant 0 : index
    %3 = vector.load %arg6[%c0, %c0_1] : memref<512x256xf32, #tpu.memory_space<vmem>>, vector<512x256xf32>
    %c0_2 = arith.constant 0 : index
    %c0_3 = arith.constant 0 : index
    %4 = vector.load %arg2[%c0_2, %c0_3] : memref<512x4xbf16, #tpu.memory_space<vmem>>, vector<512x4xbf16>
    %c0_4 = arith.constant 0 : index
    %c0_5 = arith.constant 0 : index
    %5 = vector.load %arg3[%c0_4, %c0_5] : memref<4x256xbf16, #tpu.memory_space<vmem>>, vector<4x256xbf16>
    %cst = arith.constant dense<0.000000e+00> : vector<512x256xf32>
    %6 = tpu.matmul %4, %5, %cst {dimension_numbers = #tpu.dot_dimension_numbers<[1], [0], [0], [1], [0, 0, 1, 1], [], []>} : vector<512x4xbf16>, vector<4x256xbf16>, vector<512x256xf32> -> vector<512x256xf32>
    %7 = arith.addf %3, %6 : vector<512x256xf32>
    %c0_6 = arith.constant 0 : index
    %c0_7 = arith.constant 0 : index
    %8 = vector.load %arg6[%c0_6, %c0_7] : memref<512x256xf32, #tpu.memory_space<vmem>>, vector<512x256xf32>
    tpu.vector_store %arg6[%c0_6, %c0_7], %7 {strides = array<i32>} : memref<512x256xf32, #tpu.memory_space<vmem>>, vector<512x256xf32>,
    %c0_i32_8 = arith.constant 0 : i32
    %9 = arith.cmpi eq, %arg1, %c0_i32_8 : i32
    %10 = arith.extui %9 : i1 to i32
    %c0_i32_9 = arith.constant 0 : i32
    %11 = arith.cmpi ne, %10, %c0_i32_9 : i32
    scf.if %11 {
      %c0_10 = arith.constant 0 : index
      %c0_11 = arith.constant 0 : index
      %12 = vector.load %arg6[%c0_10, %c0_11] : memref<512x256xf32, #tpu.memory_space<vmem>>, vector<512x256xf32>
      %c0_12 = arith.constant 0 : index
      %c0_13 = arith.constant 0 : index
      %13 = vector.load %arg4[%c0_12, %c0_13] : memref<1x256xf32, #tpu.memory_space<vmem>>, vector<1x256xf32>
      %14 = vector.broadcast %13 : vector<1x256xf32> to vector<512x256xf32>
      %15 = arith.addf %12, %14 : vector<512x256xf32>
      %cst_14 = arith.constant 0.000000e+00 : f32
      %16 = vector.broadcast %cst_14 : f32 to vector<512x256xf32>
      %17 = arith.maximumf %15, %16 : vector<512x256xf32>
      %18 = arith.truncf %17 : vector<512x256xf32> to vector<512x256xbf16>
      %c0_15 = arith.constant 0 : index
      %c0_16 = arith.constant 0 : index
      %19 = vector.load %arg5[%c0_15, %c0_16] : memref<512x256xbf16, #tpu.memory_space<vmem>>, vector<512x256xbf16>
      tpu.vector_store %arg5[%c0_15, %c0_16], %18 {strides = array<i32>} : memref<512x256xbf16, #tpu.memory_space<vmem>>, vector<512x256xbf16>,
    } else {
    }
    return
  }
  func.func @transform_0(%arg0: i32, %arg1: i32) -> (i32, i32) {
    %c0_i32 = arith.constant 0 : i32
    return %arg0, %arg1 : i32, i32
  }
  func.func @transform_1(%arg0: i32, %arg1: i32) -> (i32, i32) {
    %c0_i32 = arith.constant 0 : i32
    %c0_i32_0 = arith.constant 0 : i32
    return %arg1, %c0_i32 : i32, i32
  }
  func.func @transform_2(%arg0: i32, %arg1: i32) -> (i32, i32) {
    %c0_i32 = arith.constant 0 : i32
    %c0_i32_0 = arith.constant 0 : i32
    %c0_i32_1 = arith.constant 0 : i32
    return %c0_i32, %c0_i32_0 : i32, i32
  }
  func.func @transform_3(%arg0: i32, %arg1: i32) -> (i32, i32) {
    %c0_i32 = arith.constant 0 : i32
    %c0_i32_0 = arith.constant 0 : i32
    return %arg0, %c0_i32 : i32, i32
  }
}

module attributes {stable_mosaic.version = 11 : i64} {
  func.func @kernel(%arg0: i32, %arg1: memref<2x256x4xbf16, #tpu.memory_space<vmem>>, %arg2: memref<2x4xf32, #tpu.memory_space<vmem>>) attributes {dimension_semantics = [#tpu.dimension_semantics<arbitrary>], iteration_bounds = array<i64: 1>, scalar_prefetch = 0 : i64, scratch_operands = 0 : i64, tpu.core_type = #tpu.core_type<tc>, window_params = [{transform_indices = @transform_0, window_bounds = array<i64: 2, 256, 4>}, {pipeline_mode = #tpu.pipeline_mode<synchronous>, transform_indices = @transform_1, window_bounds = array<i64: 2, 4>}]} {
    %c0_i32 = arith.constant 0 : i32
    %0 = arith.cmpi eq, %arg0, %c0_i32 : i32
    %1 = arith.extui %0 : i1 to i32
    %c0_i32_0 = arith.constant 0 : i32
    %2 = arith.cmpi ne, %1, %c0_i32_0 : i32
    scf.if %2 {
      %cst_9 = arith.constant 0.000000e+00 : f32
      %12 = vector.broadcast %cst_9 : f32 to vector<2x4xf32>
      %c0_10 = arith.constant 0 : index
      %c0_11 = arith.constant 0 : index
      %13 = vector.load %arg2[%c0_10, %c0_11] : memref<2x4xf32, #tpu.memory_space<vmem>>, vector<2x4xf32>
      tpu.vector_store %arg2[%c0_10, %c0_11], %12 {strides = array<i32>} : memref<2x4xf32, #tpu.memory_space<vmem>>, vector<2x4xf32>,
    } else {
    }
    %c0 = arith.constant 0 : index
    %c0_1 = arith.constant 0 : index
    %3 = vector.load %arg2[%c0, %c0_1] : memref<2x4xf32, #tpu.memory_space<vmem>>, vector<2x4xf32>
    %c0_2 = arith.constant 0 : index
    %c0_3 = arith.constant 0 : index
    %c0_4 = arith.constant 0 : index
    %4 = vector.load %arg1[%c0_2, %c0_3, %c0_4] : memref<2x256x4xbf16, #tpu.memory_space<vmem>>, vector<2x256x4xbf16>
    %5 = arith.extf %4 : vector<2x256x4xbf16> to vector<2x256x4xf32>
    %cst = arith.constant dense<0.000000e+00> : vector<2x4xf32>
    %6 = vector.multi_reduction <add>, %5, %cst [1] : vector<2x256x4xf32> to vector<2x4xf32>
    %7 = arith.addf %3, %6 : vector<2x4xf32>
    %c0_5 = arith.constant 0 : index
    %c0_6 = arith.constant 0 : index
    %8 = vector.load %arg2[%c0_5, %c0_6] : memref<2x4xf32, #tpu.memory_space<vmem>>, vector<2x4xf32>
    tpu.vector_store %arg2[%c0_5, %c0_6], %7 {strides = array<i32>} : memref<2x4xf32, #tpu.memory_space<vmem>>, vector<2x4xf32>,
    %c0_i32_7 = arith.constant 0 : i32
    %9 = arith.cmpi eq, %arg0, %c0_i32_7 : i32
    %10 = arith.extui %9 : i1 to i32
    %c0_i32_8 = arith.constant 0 : i32
    %11 = arith.cmpi ne, %10, %c0_i32_8 : i32
    scf.if %11 {
      %c0_9 = arith.constant 0 : index
      %c0_10 = arith.constant 0 : index
      %12 = vector.load %arg2[%c0_9, %c0_10] : memref<2x4xf32, #tpu.memory_space<vmem>>, vector<2x4xf32>
      %cst_11 = arith.constant 3.906250e-03 : f32
      %13 = vector.broadcast %cst_11 : f32 to vector<2x4xf32>
      %14 = arith.mulf %12, %13 : vector<2x4xf32>
      %c0_12 = arith.constant 0 : index
      %c0_13 = arith.constant 0 : index
      %15 = vector.load %arg2[%c0_12, %c0_13] : memref<2x4xf32, #tpu.memory_space<vmem>>, vector<2x4xf32>
      tpu.vector_store %arg2[%c0_12, %c0_13], %14 {strides = array<i32>} : memref<2x4xf32, #tpu.memory_space<vmem>>, vector<2x4xf32>,
    } else {
    }
    return
  }
  func.func @transform_0(%arg0: i32) -> (i32, i32, i32) {
    %c0_i32 = arith.constant 0 : i32
    %c0_i32_0 = arith.constant 0 : i32
    %c0_i32_1 = arith.constant 0 : i32
    return %c0_i32, %arg0, %c0_i32_0 : i32, i32, i32
  }
  func.func @transform_1(%arg0: i32) -> (i32, i32) {
    %c0_i32 = arith.constant 0 : i32
    %c0_i32_0 = arith.constant 0 : i32
    %c0_i32_1 = arith.constant 0 : i32
    return %c0_i32, %c0_i32_0 : i32, i32
  }
}

module attributes {stable_mosaic.version = 11 : i64} {
  func.func @_concat_conv_kernel(%arg0: i32, %arg1: i32, %arg2: memref<1x256x256xbf16, #tpu.memory_space<vmem>>, %arg3: memref<1x256x256xbf16, #tpu.memory_space<vmem>>, %arg4: memref<1x256x256xbf16, #tpu.memory_space<vmem>>, %arg5: memref<1x256x256xbf16, #tpu.memory_space<vmem>>, %arg6: memref<4x256x256xbf16, #tpu.memory_space<vmem>>, %arg7: memref<1x1x256xf32, #tpu.memory_space<vmem>>, %arg8: memref<1x256x256xf32, #tpu.memory_space<vmem>>) attributes {dimension_semantics = [#tpu.dimension_semantics<parallel>, #tpu.dimension_semantics<parallel>], iteration_bounds = array<i64: 2, 1>, scalar_prefetch = 0 : i64, scratch_operands = 0 : i64, tpu.core_type = #tpu.core_type<tc>, window_params = [{transform_indices = @transform_0, window_bounds = array<i64: 1, 256, 256>}, {transform_indices = @transform_1, window_bounds = array<i64: 1, 256, 256>}, {transform_indices = @transform_2, window_bounds = array<i64: 1, 256, 256>}, {transform_indices = @transform_3, window_bounds = array<i64: 1, 256, 256>}, {pipeline_mode = #tpu.pipeline_mode<synchronous>, transform_indices = @transform_4, window_bounds = array<i64: 4, 256, 256>}, {transform_indices = @transform_5, window_bounds = array<i64: 1, 1, 256>}, {transform_indices = @transform_6, window_bounds = array<i64: 1, 256, 256>}]} {
    %c0 = arith.constant 0 : index
    %c0_0 = arith.constant 0 : index
    %c0_1 = arith.constant 0 : index
    %0 = vector.load %arg2[%c0, %c0_0, %c0_1] : memref<1x256x256xbf16, #tpu.memory_space<vmem>>, vector<1x256x256xbf16>
    %1 = vector.shape_cast %0 : vector<1x256x256xbf16> to vector<256x256xbf16>
    %c0_2 = arith.constant 0 : index
    %c0_3 = arith.constant 0 : index
    %c0_4 = arith.constant 0 : index
    %2 = vector.load %arg6[%c0_2, %c0_3, %c0_4] : memref<4x256x256xbf16, #tpu.memory_space<vmem>>, vector<1x256x256xbf16>
    %3 = vector.shape_cast %2 : vector<1x256x256xbf16> to vector<256x256xbf16>
    %cst = arith.constant dense<0.000000e+00> : vector<256x256xf32>
    %4 = tpu.matmul %1, %3, %cst {dimension_numbers = #tpu.dot_dimension_numbers<[1], [0], [0], [1], [0, 0, 1, 1], [], []>} : vector<256x256xbf16>, vector<256x256xbf16>, vector<256x256xf32> -> vector<256x256xf32>
    %c0_5 = arith.constant 0 : index
    %c0_6 = arith.constant 0 : index
    %c0_7 = arith.constant 0 : index
    %5 = vector.load %arg3[%c0_5, %c0_6, %c0_7] : memref<1x256x256xbf16, #tpu.memory_space<vmem>>, vector<1x256x256xbf16>
    %6 = vector.shape_cast %5 : vector<1x256x256xbf16> to vector<256x256xbf16>
    %c1 = arith.constant 1 : index
    %c0_8 = arith.constant 0 : index
    %c0_9 = arith.constant 0 : index
    %7 = vector.load %arg6[%c1, %c0_8, %c0_9] : memref<4x256x256xbf16, #tpu.memory_space<vmem>>, vector<1x256x256xbf16>
    %8 = vector.shape_cast %7 : vector<1x256x256xbf16> to vector<256x256xbf16>
    %cst_10 = arith.constant dense<0.000000e+00> : vector<256x256xf32>
    %9 = tpu.matmul %6, %8, %cst_10 {dimension_numbers = #tpu.dot_dimension_numbers<[1], [0], [0], [1], [0, 0, 1, 1], [], []>} : vector<256x256xbf16>, vector<256x256xbf16>, vector<256x256xf32> -> vector<256x256xf32>
    %10 = arith.addf %4, %9 : vector<256x256xf32>
    %c0_11 = arith.constant 0 : index
    %c0_12 = arith.constant 0 : index
    %c0_13 = arith.constant 0 : index
    %11 = vector.load %arg4[%c0_11, %c0_12, %c0_13] : memref<1x256x256xbf16, #tpu.memory_space<vmem>>, vector<1x256x256xbf16>
    %12 = vector.shape_cast %11 : vector<1x256x256xbf16> to vector<256x256xbf16>
    %c2 = arith.constant 2 : index
    %c0_14 = arith.constant 0 : index
    %c0_15 = arith.constant 0 : index
    %13 = vector.load %arg6[%c2, %c0_14, %c0_15] : memref<4x256x256xbf16, #tpu.memory_space<vmem>>, vector<1x256x256xbf16>
    %14 = vector.shape_cast %13 : vector<1x256x256xbf16> to vector<256x256xbf16>
    %cst_16 = arith.constant dense<0.000000e+00> : vector<256x256xf32>
    %15 = tpu.matmul %12, %14, %cst_16 {dimension_numbers = #tpu.dot_dimension_numbers<[1], [0], [0], [1], [0, 0, 1, 1], [], []>} : vector<256x256xbf16>, vector<256x256xbf16>, vector<256x256xf32> -> vector<256x256xf32>
    %16 = arith.addf %10, %15 : vector<256x256xf32>
    %c0_17 = arith.constant 0 : index
    %c0_18 = arith.constant 0 : index
    %c0_19 = arith.constant 0 : index
    %17 = vector.load %arg5[%c0_17, %c0_18, %c0_19] : memref<1x256x256xbf16, #tpu.memory_space<vmem>>, vector<1x256x256xbf16>
    %18 = vector.shape_cast %17 : vector<1x256x256xbf16> to vector<256x256xbf16>
    %c3 = arith.constant 3 : index
    %c0_20 = arith.constant 0 : index
    %c0_21 = arith.constant 0 : index
    %19 = vector.load %arg6[%c3, %c0_20, %c0_21] : memref<4x256x256xbf16, #tpu.memory_space<vmem>>, vector<1x256x256xbf16>
    %20 = vector.shape_cast %19 : vector<1x256x256xbf16> to vector<256x256xbf16>
    %cst_22 = arith.constant dense<0.000000e+00> : vector<256x256xf32>
    %21 = tpu.matmul %18, %20, %cst_22 {dimension_numbers = #tpu.dot_dimension_numbers<[1], [0], [0], [1], [0, 0, 1, 1], [], []>} : vector<256x256xbf16>, vector<256x256xbf16>, vector<256x256xf32> -> vector<256x256xf32>
    %22 = arith.addf %16, %21 : vector<256x256xf32>
    %c0_23 = arith.constant 0 : index
    %c0_24 = arith.constant 0 : index
    %c0_25 = arith.constant 0 : index
    %23 = vector.load %arg7[%c0_23, %c0_24, %c0_25] : memref<1x1x256xf32, #tpu.memory_space<vmem>>, vector<1x1x256xf32>
    %24 = vector.shape_cast %23 : vector<1x1x256xf32> to vector<1x256xf32>
    %25 = vector.broadcast %24 : vector<1x256xf32> to vector<256x256xf32>
    %26 = arith.addf %22, %25 : vector<256x256xf32>
    %cst_26 = arith.constant 0.000000e+00 : f32
    %27 = vector.broadcast %cst_26 : f32 to vector<256x256xf32>
    %28 = arith.maximumf %26, %27 : vector<256x256xf32>
    %c0_27 = arith.constant 0 : index
    %c0_28 = arith.constant 0 : index
    %c0_29 = arith.constant 0 : index
    %29 = vector.load %arg8[%c0_27, %c0_28, %c0_29] : memref<1x256x256xf32, #tpu.memory_space<vmem>>, vector<1x256x256xf32>
    %30 = vector.shape_cast %29 : vector<1x256x256xf32> to vector<256x256xf32>
    %31 = vector.shape_cast %28 : vector<256x256xf32> to vector<1x256x256xf32>
    tpu.vector_store %arg8[%c0_27, %c0_28, %c0_29], %31 {strides = array<i32>} : memref<1x256x256xf32, #tpu.memory_space<vmem>>, vector<1x256x256xf32>,
    return
  }
  func.func @transform_0(%arg0: i32, %arg1: i32) -> (i32, i32, i32) {
    %c0_i32 = arith.constant 0 : i32
    %c0_i32_0 = arith.constant 0 : i32
    return %arg0, %arg1, %c0_i32 : i32, i32, i32
  }
  func.func @transform_1(%arg0: i32, %arg1: i32) -> (i32, i32, i32) {
    %c0_i32 = arith.constant 0 : i32
    %c0_i32_0 = arith.constant 0 : i32
    return %arg0, %arg1, %c0_i32 : i32, i32, i32
  }
  func.func @transform_2(%arg0: i32, %arg1: i32) -> (i32, i32, i32) {
    %c0_i32 = arith.constant 0 : i32
    %c0_i32_0 = arith.constant 0 : i32
    return %arg0, %arg1, %c0_i32 : i32, i32, i32
  }
  func.func @transform_3(%arg0: i32, %arg1: i32) -> (i32, i32, i32) {
    %c0_i32 = arith.constant 0 : i32
    %c0_i32_0 = arith.constant 0 : i32
    return %arg0, %arg1, %c0_i32 : i32, i32, i32
  }
  func.func @transform_4(%arg0: i32, %arg1: i32) -> (i32, i32, i32) {
    %c0_i32 = arith.constant 0 : i32
    %c0_i32_0 = arith.constant 0 : i32
    %c0_i32_1 = arith.constant 0 : i32
    %c0_i32_2 = arith.constant 0 : i32
    return %c0_i32, %c0_i32_0, %c0_i32_1 : i32, i32, i32
  }
  func.func @transform_5(%arg0: i32, %arg1: i32) -> (i32, i32, i32) {
    %c0_i32 = arith.constant 0 : i32
    %c0_i32_0 = arith.constant 0 : i32
    %c0_i32_1 = arith.constant 0 : i32
    return %arg0, %c0_i32, %c0_i32_0 : i32, i32, i32
  }
  func.func @transform_6(%arg0: i32, %arg1: i32) -> (i32, i32, i32) {
    %c0_i32 = arith.constant 0 : i32
    %c0_i32_0 = arith.constant 0 : i32
    return %arg0, %arg1, %c0_i32 : i32, i32, i32
  }
}

</mosaic_0001>

<bundles_post_ra>
// kernel: aspp_forward.10
= control target key start
LH: loop header
LB: loop body
LE: loop exit
PB: predicated region body
PF: predicated region fallthrough
CT: control target
= control target key end

     0   :  { %vm12_vm0 = vcmask 25600   ;;  %v460_v0 = vmov 0.0   ;;  %vm143_vm1 = vcmask 31744   ;;  %vm284_vm2 = vcmask 1041409   ;;  %s649_s1 = inlined_call_operand.vmem [shape: f32[2,4], index: 1, kind: output, shape index: {}]   ;;  %s650_s0 = inlined_call_operand.vmem [shape: bf16[2,256,4], index: 0, kind: input, shape index: {}]  }
   0x1   :  { %13 = vst.msk [vmem:[%s649_s1] sm:$0x3] %vm12_vm0, %v460_v0  ;;  %v301_v1 = vld [vmem:[%s650_s0] sm:$0xff]   ;;  %v428_v2 = vld [vmem:[%s650_s0 + $0x8] sm:$0xff]   ;;  %v429_v6 = vld [vmem:[%s650_s0 + $0x10] sm:$0xff]  }
   0x2   :  { %v302_v3 = vunpack.c.l.bf16 %v301_v1  ;;  %v303_v4 = vunpack.c.h.bf16 %v301_v1  ;;  %v306_v5 = vunpack.c.l.bf16 %v428_v2  ;;  %v307_v7 = vunpack.c.h.bf16 %v428_v2  ;;  %v430_v12 = vld [vmem:[%s650_s0 + $0x18] sm:$0xff]   ;;  %v443_v15 = vld [vmem:[%s650_s0 + $0x80] sm:$0xff]   ;;  %v444_v16 = vld [vmem:[%s650_s0 + $0x88] sm:$0xff]  }
   0x3   :  { %v310_v8 = vunpack.c.l.bf16 %v429_v6  ;;  %v311_v14 = vunpack.c.h.bf16 %v429_v6  ;;  %v314_v19 = vunpack.c.l.bf16 %v430_v12  ;;  %v431_v21 = vld [vmem:[%s650_s0 + $0x20] sm:$0xff]   ;;  %v366_v22 = vunpack.c.l.bf16 %v443_v15  ;;  %v445_v25 = vld [vmem:[%s650_s0 + $0x90] sm:$0xff]   ;;  %v432_v34 = vld [vmem:[%s650_s0 + $0x28] sm:$0xff]  }
   0x4   :  { %v144_v9 = vsel %vm143_vm1, %v302_v3, 0.0  ;;  %v145_v10 = vsel %vm143_vm1, %v303_v4, 0.0  ;;  %v147_v11 = vsel %vm143_vm1, %v306_v5, 0.0  ;;  %v149_v17 = vsel %vm143_vm1, %v307_v7, 0.0  ;;  %v446_v40 = vld [vmem:[%s650_s0 + $0x98] sm:$0xff]   ;;  %v433_v49 = vld [vmem:[%s650_s0 + $0x30] sm:$0xff]  }
   0x5   :  { %v146_v13 = vadd.f32 %v145_v10, %v144_v9  ;;  %v151_v20 = vsel %vm143_vm1, %v310_v8, 0.0  ;;  %v367_v23 = vunpack.c.h.bf16 %v443_v15  ;;  %v370_v24 = vunpack.c.l.bf16 %v444_v16  ;;  %v447_v54 = vld [vmem:[%s650_s0 + $0xa0] sm:$0xff]   ;;  %v434_v63 = vld [vmem:[%s650_s0 + $0x38] sm:$0xff]   ;;  %v448_v4 = vld [vmem:[%s650_s0 + $0xa8] sm:$0xff]  }
   0x6   :  { %v315_v27 = vunpack.c.h.bf16 %v430_v12  ;;  %v153_v28 = vsel %vm143_vm1, %v311_v14, 0.0  ;;  %v371_v29 = vunpack.c.h.bf16 %v444_v16  ;;  %v318_v31 = vunpack.c.l.bf16 %v431_v21 }
   0x7   :  { %v148_v18 = vadd.f32 %v147_v11, %v146_v13  ;;  %v374_v32 = vunpack.c.l.bf16 %v445_v25  ;;  %v155_v33 = vsel %vm143_vm1, %v314_v19, 0.0  ;;  %v213_v36 = vsel %vm143_vm1, %v366_v22, 0.0  ;;  %v435_v13 = vld [vmem:[%s650_s0 + $0x40] sm:$0xff]  }
   0x8   :  { %v214_v37 = vsel %vm143_vm1, %v367_v23, 0.0  ;;  %v216_v38 = vsel %vm143_vm1, %v370_v24, 0.0  ;;  %v319_v39 = vunpack.c.h.bf16 %v431_v21  ;;  %v157_v41 = vsel %vm143_vm1, %v315_v27, 0.0  ;;  %v436_v27 = vld [vmem:[%s650_s0 + $0x48] sm:$0xff]  }
   0x9   :  { %v150_v26 = vadd.f32 %v149_v17, %v148_v18  ;;  %v215_v42 = vadd.f32 %v214_v37, %v213_v36  ;;  %v375_v43 = vunpack.c.h.bf16 %v445_v25  ;;  %v218_v45 = vsel %vm143_vm1, %v371_v29, 0.0  ;;  %v449_v18 = vld [vmem:[%s650_s0 + $0xb0] sm:$0xff]  }
   0xa   :  { %v322_v46 = vunpack.c.l.bf16 %v432_v34  ;;  %v159_v47 = vsel %vm143_vm1, %v318_v31, 0.0  ;;  %v378_v50 = vunpack.c.l.bf16 %v446_v40  ;;  %v220_v52 = vsel %vm143_vm1, %v374_v32, 0.0  ;;  %v450_v32 = vld [vmem:[%s650_s0 + $0xb8] sm:$0xff]  }
   0xb   :  { %v152_v30 = vadd.f32 %v151_v20, %v150_v26  ;;  %v217_v48 = vadd.f32 %v216_v38, %v215_v42  ;;  %v323_v53 = vunpack.c.h.bf16 %v432_v34  ;;  %v161_v55 = vsel %vm143_vm1, %v319_v39, 0.0 }
   0xc   :  { %v379_v57 = vunpack.c.h.bf16 %v446_v40  ;;  %v222_v59 = vsel %vm143_vm1, %v375_v43, 0.0  ;;  %v326_v60 = vunpack.c.l.bf16 %v433_v49  ;;  %v163_v61 = vsel %vm143_vm1, %v322_v46, 0.0  ;;  %v451_v46 = vld [vmem:[%s650_s0 + $0xc0] sm:$0xff]  }
   0xd   :  { %v154_v35 = vadd.f32 %v153_v28, %v152_v30  ;;  %v219_v56 = vadd.f32 %v218_v45, %v217_v48  ;;  %v382_v0 = vunpack.c.l.bf16 %v447_v54  ;;  %v224_v2 = vsel %vm143_vm1, %v378_v50, 0.0 }
   0xe   :  { %v327_v3 = vunpack.c.h.bf16 %v433_v49  ;;  %v165_v5 = vsel %vm143_vm1, %v323_v53, 0.0  ;;  %v383_v7 = vunpack.c.h.bf16 %v447_v54  ;;  %v226_v9 = vsel %vm143_vm1, %v379_v57, 0.0 }
   0xf   :  { %v156_v44 = vadd.f32 %v155_v33, %v154_v35  ;;  %v221_v62 = vadd.f32 %v220_v52, %v219_v56  ;;  %v330_v10 = vunpack.c.l.bf16 %v434_v63  ;;  %v167_v11 = vsel %vm143_vm1, %v326_v60, 0.0  ;;  %v452_v60 = vld [vmem:[%s650_s0 + $0xc8] sm:$0xff]  }
  0x10   :  { %v386_v14 = vunpack.c.l.bf16 %v448_v4  ;;  %v228_v16 = vsel %vm143_vm1, %v382_v0, 0.0  ;;  %v331_v17 = vunpack.c.h.bf16 %v434_v63  ;;  %v169_v19 = vsel %vm143_vm1, %v327_v3, 0.0 }
  0x11   :  { %v158_v51 = vadd.f32 %v157_v41, %v156_v44  ;;  %v223_v6 = vadd.f32 %v222_v59, %v221_v62  ;;  %v387_v21 = vunpack.c.h.bf16 %v448_v4  ;;  %v230_v23 = vsel %vm143_vm1, %v383_v7, 0.0  ;;  %v437_v41 = vld [vmem:[%s650_s0 + $0x50] sm:$0xff]  }
  0x12   :  { %v334_v24 = vunpack.c.l.bf16 %v435_v13  ;;  %v171_v25 = vsel %vm143_vm1, %v330_v10, 0.0  ;;  %v390_v28 = vunpack.c.l.bf16 %v449_v18  ;;  %v232_v30 = vsel %vm143_vm1, %v386_v14, 0.0  ;;  %v453_v10 = vld [vmem:[%s650_s0 + $0xd0] sm:$0xff]  }
  0x13   :  { %v160_v58 = vadd.f32 %v159_v47, %v158_v51  ;;  %v225_v12 = vadd.f32 %v224_v2, %v223_v6  ;;  %v335_v31 = vunpack.c.h.bf16 %v435_v13  ;;  %v173_v33 = vsel %vm143_vm1, %v331_v17, 0.0 }
  0x14   :  { %v391_v35 = vunpack.c.h.bf16 %v449_v18  ;;  %v234_v37 = vsel %vm143_vm1, %v387_v21, 0.0  ;;  %v338_v38 = vunpack.c.l.bf16 %v436_v27  ;;  %v175_v39 = vsel %vm143_vm1, %v334_v24, 0.0  ;;  %v454_v24 = vld [vmem:[%s650_s0 + $0xd8] sm:$0xff]  }
  0x15   :  { %v162_v1 = vadd.f32 %v161_v55, %v160_v58  ;;  %v227_v20 = vadd.f32 %v226_v9, %v225_v12  ;;  %v394_v42 = vunpack.c.l.bf16 %v450_v32  ;;  %v236_v44 = vsel %vm143_vm1, %v390_v28, 0.0  ;;  %v438_v55 = vld [vmem:[%s650_s0 + $0x58] sm:$0xff]  }
  0x16   :  { %v339_v45 = vunpack.c.h.bf16 %v436_v27  ;;  %v177_v47 = vsel %vm143_vm1, %v335_v31, 0.0  ;;  %v395_v49 = vunpack.c.h.bf16 %v450_v32  ;;  %v238_v51 = vsel %vm143_vm1, %v391_v35, 0.0 }
  0x17   :  { %v164_v8 = vadd.f32 %v163_v61, %v162_v1  ;;  %v229_v26 = vadd.f32 %v228_v16, %v227_v20  ;;  %v342_v52 = vunpack.c.l.bf16 %v437_v41  ;;  %v179_v53 = vsel %vm143_vm1, %v338_v38, 0.0  ;;  %v455_v38 = vld [vmem:[%s650_s0 + $0xe0] sm:$0xff]  }
  0x18   :  { %v398_v56 = vunpack.c.l.bf16 %v451_v46  ;;  %v240_v58 = vsel %vm143_vm1, %v394_v42, 0.0  ;;  %v343_v59 = vunpack.c.h.bf16 %v437_v41  ;;  %v181_v61 = vsel %vm143_vm1, %v339_v45, 0.0 }
  0x19   :  { %v166_v15 = vadd.f32 %v165_v5, %v164_v8  ;;  %v231_v34 = vadd.f32 %v230_v23, %v229_v26  ;;  %v399_v63 = vunpack.c.h.bf16 %v451_v46  ;;  %v242_v1 = vsel %vm143_vm1, %v395_v49, 0.0  ;;  %v439_v5 = vld [vmem:[%s650_s0 + $0x60] sm:$0xff]  }
  0x1a   :  { %v346_v2 = vunpack.c.l.bf16 %v438_v55  ;;  %v183_v3 = vsel %vm143_vm1, %v342_v52, 0.0  ;;  %v402_v6 = vunpack.c.l.bf16 %v452_v60  ;;  %v244_v8 = vsel %vm143_vm1, %v398_v56, 0.0  ;;  %v456_v52 = vld [vmem:[%s650_s0 + $0xe8] sm:$0xff]  }
  0x1b   :  { %v168_v22 = vadd.f32 %v167_v11, %v166_v15  ;;  %v233_v40 = vadd.f32 %v232_v30, %v231_v34  ;;  %v347_v9 = vunpack.c.h.bf16 %v438_v55  ;;  %v185_v11 = vsel %vm143_vm1, %v343_v59, 0.0 }
  0x1c   :  { %v403_v13 = vunpack.c.h.bf16 %v452_v60  ;;  %v246_v15 = vsel %vm143_vm1, %v399_v63, 0.0  ;;  %v350_v16 = vunpack.c.l.bf16 %v439_v5  ;;  %v187_v17 = vsel %vm143_vm1, %v346_v2, 0.0 }
  0x1d   :  { %v170_v29 = vadd.f32 %v169_v19, %v168_v22  ;;  %v235_v48 = vadd.f32 %v234_v37, %v233_v40  ;;  %v440_v19 = vld [vmem:[%s650_s0 + $0x68] sm:$0xff]   ;;  %v406_v20 = vunpack.c.l.bf16 %v453_v10  ;;  %v248_v22 = vsel %vm143_vm1, %v402_v6, 0.0 }
  0x1e   :  { %v351_v23 = vunpack.c.h.bf16 %v439_v5  ;;  %v407_v27 = vunpack.c.h.bf16 %v453_v10  ;;  %v354_v30 = vunpack.c.l.bf16 %v440_v19  ;;  %v191_v31 = vsel %vm143_vm1, %v350_v16, 0.0 }
  0x1f   :  { %v172_v36 = vadd.f32 %v171_v25, %v170_v29  ;;  %v237_v54 = vadd.f32 %v236_v44, %v235_v48  ;;  %v189_v25 = vsel %vm143_vm1, %v347_v9, 0.0  ;;  %v250_v29 = vsel %vm143_vm1, %v403_v13, 0.0 }
  0x20   :  { %v410_v34 = vunpack.c.l.bf16 %v454_v24  ;;  %v355_v37 = vunpack.c.h.bf16 %v440_v19  ;;  %v411_v41 = vunpack.c.h.bf16 %v454_v24  ;;  %v195_v45 = vsel %vm143_vm1, %v354_v30, 0.0 }
  0x21   :  { %v174_v43 = vadd.f32 %v173_v33, %v172_v36  ;;  %v239_v62 = vadd.f32 %v238_v51, %v237_v54  ;;  %v441_v33 = vld [vmem:[%s650_s0 + $0x70] sm:$0xff]   ;;  %v252_v36 = vsel %vm143_vm1, %v406_v20, 0.0  ;;  %v414_v48 = vunpack.c.l.bf16 %v455_v38 }
  0x22   :  { %v358_v44 = vunpack.c.l.bf16 %v441_v33  ;;  %v359_v51 = vunpack.c.h.bf16 %v441_v33  ;;  %v415_v55 = vunpack.c.h.bf16 %v455_v38 }
  0x23   :  { %v176_v50 = vadd.f32 %v175_v39, %v174_v43  ;;  %v241_v4 = vadd.f32 %v240_v58, %v239_v62  ;;  %v193_v39 = vsel %vm143_vm1, %v351_v23, 0.0  ;;  %v254_v43 = vsel %vm143_vm1, %v407_v27, 0.0 }
  0x24   :  { %v199_v59 = vsel %vm143_vm1, %v358_v44, 0.0  ;;  %v260_v63 = vsel %vm143_vm1, %v414_v48, 0.0  ;;  %v201_v2 = vsel %vm143_vm1, %v359_v51, 0.0  ;;  %v262_v6 = vsel %vm143_vm1, %v415_v55, 0.0 }
  0x25   :  { %v178_v57 = vadd.f32 %v177_v47, %v176_v50  ;;  %v243_v12 = vadd.f32 %v242_v1, %v241_v4  ;;  %v442_v47 = vld [vmem:[%s650_s0 + $0x78] sm:$0xff]   ;;  %v256_v50 = vsel %vm143_vm1, %v410_v34, 0.0  ;;  %v457_v1 = vld [vmem:[%s650_s0 + $0xf0] sm:$0xff]   ;;  %v419_v4 = vunpack.c.h.bf16 %v456_v52 }
  0x26   :  { %v362_v58 = vunpack.c.l.bf16 %v442_v47  ;;  %v422_v9 = vunpack.c.l.bf16 %v457_v1 }
  0x27   :  { %v180_v0 = vadd.f32 %v179_v53, %v178_v57  ;;  %v245_v18 = vadd.f32 %v244_v8, %v243_v12  ;;  %v197_v53 = vsel %vm143_vm1, %v355_v37, 0.0  ;;  %v258_v57 = vsel %vm143_vm1, %v411_v41, 0.0  ;;  %v458_v12 = vld [vmem:[%s650_s0 + $0xf8] sm:$0xff]  }
  0x28   :  { %v426_v19 = vunpack.c.l.bf16 %v458_v12  ;;  %v427_v23 = vunpack.c.h.bf16 %v458_v12 }
  0x29   :  { %v182_v7 = vadd.f32 %v181_v61, %v180_v0  ;;  %v247_v26 = vadd.f32 %v246_v15, %v245_v18  ;;  %v418_v61 = vunpack.c.l.bf16 %v456_v52  ;;  %v363_v0 = vunpack.c.h.bf16 %v442_v47 }
  0x2a   :  { %v423_v15 = vunpack.c.h.bf16 %v457_v1  ;;  %v274_v30 = vsel %vm143_vm1, %v427_v23, 0.0 }
  0x2b   :  { %v184_v14 = vadd.f32 %v183_v3, %v182_v7  ;;  %v249_v32 = vadd.f32 %v248_v22, %v247_v26  ;;  %v203_v7 = vsel %vm143_vm1, %v362_v58, 0.0  ;;  %v205_v13 = vsel %vm143_vm1, %v363_v0, 0.0 }
  0x2d   :  { %v186_v21 = vadd.f32 %v185_v11, %v184_v14  ;;  %v251_v40 = vadd.f32 %v250_v29, %v249_v32  ;;  %v264_v11 = vsel %vm143_vm1, %v418_v61, 0.0 }
  0x2f   :  { %v188_v28 = vadd.f32 %v187_v17, %v186_v21  ;;  %v253_v46 = vadd.f32 %v252_v36, %v251_v40  ;;  %v266_v17 = vsel %vm143_vm1, %v419_v4, 0.0  ;;  %v268_v21 = vsel %vm143_vm1, %v422_v9, 0.0 }
  0x31   :  { %v190_v35 = vadd.f32 %v189_v25, %v188_v28  ;;  %v255_v54 = vadd.f32 %v254_v43, %v253_v46  ;;  %v270_v25 = vsel %vm143_vm1, %v423_v15, 0.0  ;;  %v272_v28 = vsel %vm143_vm1, %v426_v19, 0.0 }
  0x33   :  { %v192_v42 = vadd.f32 %v191_v31, %v190_v35  ;;  %v257_v60 = vadd.f32 %v256_v50, %v255_v54 }
  0x35   :  { %v194_v49 = vadd.f32 %v193_v39, %v192_v42  ;;  %v259_v3 = vadd.f32 %v258_v57, %v257_v60  ;;  %v14_v42 = vld [vmem:[%s649_s1] sm:$0x3] }
  0x37   :  { %v196_v56 = vadd.f32 %v195_v45, %v194_v49  ;;  %v261_v8 = vadd.f32 %v260_v63, %v259_v3 }
  0x39   :  { %v198_v62 = vadd.f32 %v197_v53, %v196_v56  ;;  %v263_v14 = vadd.f32 %v262_v6, %v261_v8 }
  0x3b   :  { %v200_v5 = vadd.f32 %v199_v59, %v198_v62  ;;  %v265_v18 = vadd.f32 %v264_v11, %v263_v14 }
  0x3d   :  { %v202_v10 = vadd.f32 %v201_v2, %v200_v5  ;;  %v267_v22 = vadd.f32 %v266_v17, %v265_v18 }
  0x3f   :  { %v204_v16 = vadd.f32 %v203_v7, %v202_v10  ;;  %v269_v26 = vadd.f32 %v268_v21, %v267_v22 }
  0x41   :  { %v206_v20 = vadd.f32 %v205_v13, %v204_v16  ;;  %v271_v29 = vadd.f32 %v270_v25, %v269_v26 }
  0x43   :  { %v207_v24 = vrot.slane %v206_v20, 4  ;;  %v273_v32 = vadd.f32 %v272_v28, %v271_v29 }
  0x45   :  { %v208_v27 = vadd.f32 %v207_v24, %v206_v20  ;;  %v275_v33 = vadd.f32 %v274_v30, %v273_v32 }
  0x47   :  { %v209_v31 = vrot.slane %v208_v27, 2  ;;  %v276_v35 = vrot.slane %v275_v33, 4 }
  0x49   :  { %v210_v34 = vadd.f32 %v209_v31, %v208_v27  ;;  %v277_v36 = vadd.f32 %v276_v35, %v275_v33 }
  0x4b   :  { %v211_v37 = vrot.slane %v210_v34, 1  ;;  %v278_v38 = vrot.slane %v277_v36, 2 }
  0x4d   :  { %v279_v39 = vadd.f32 %v278_v38, %v277_v36  ;;  %v212_v40 = vadd.f32 %v211_v37, %v210_v34 }
  0x4f   :  { %v280_v41 = vrot.slane %v279_v39, 1 }
  0x51   :  { %v281_v43 = vadd.f32 %v280_v41, %v279_v39 }
  0x53   :  { %v285_v44 = vsel %vm284_vm2, %v281_v43, %v212_v40 }
  0x54   :  { %v287_v45 = vadd.f32 %v285_v44, %v14_v42 }
  0x56   :  { %289 = vst.msk [vmem:[%s649_s1] sm:$0x3] %vm12_vm0, %v287_v45 }
  0x5d   :  { %v293_v46 = vld [vmem:[%s649_s1] sm:$0x3] }
  0x5e   :  { %v294_v47 = vmul.f32 0.00390625, %v293_v46 }
  0x60   :  { %295 = vst.msk [vmem:[%s649_s1] sm:$0x3] %vm12_vm0, %v294_v47 }

// kernel: aspp_forward.6
= control target key start
LH: loop header
LB: loop body
LE: loop exit
PB: predicated region body
PF: predicated region fallthrough
CT: control target
= control target key end

     0   :  { %vm606_vm0 = vcmask 1041408   ;;  %v2302_v1 = vmov 0   ;;  %vm509_vm1 = vcmask 31744   ;;  %v1355_v36 = vlaneseq  ;;  %s2813_s1 = inlined_call_operand.vmem [shape: bf16[4,256], index: 1, kind: input, shape index: {}]   ;;  %s2814_s0 = inlined_call_operand.vmem [shape: bf16[512,4], index: 0, kind: input, shape index: {}]   ;;  %s2815_s2 = inlined_call_operand.vmem [shape: f32[1,256], index: 2, kind: input, shape index: {}]   ;;  %s2816_s3 = inlined_call_operand.vmem [shape: bf16[512,256], index: 3, kind: output, shape index: {}]  }
   0x1   :  { %v2105_v0 = vld.sshfl [vmem:[%s2813_s1] sm:$0x33 pattern:$0x76325410]  ;;  %645 = vmatprep.mubr.bf16.mxu0 %v2302_v1  ;;  %805 = vmatprep.mubr.bf16.mxu1 %v2302_v1  ;;  %v2272_v6 = vld [vmem:[%s2814_s0 + $0x8] sm:$0xff]   ;;  %v2274_v8 = vld [vmem:[%s2814_s0 + $0x10] sm:$0xff]  }
   0x2   :  { %v508_v2 = vcombine.high %v2105_v0, %v2105_v0  ;;  %v608_v3 = vsel %vm606_vm0, %v2105_v0, 0  ;;  %v2270_v4 = vld [vmem:[%s2814_s0] sm:$0xff]   ;;  %v2273_v7 = vld [vmem:[%s2814_s0 + $0x88] sm:$0xff]   ;;  %v2275_v9 = vld [vmem:[%s2814_s0 + $0x90] sm:$0xff]   ;;  %v1356_v37 = vshrl.u32 %v1355_v36, 7 }
   0x3   :  { %v2271_v5 = vld [vmem:[%s2814_s0 + $0x80] sm:$0xff]   ;;  %v2276_v10 = vld [vmem:[%s2814_s0 + $0x18] sm:$0xff]   ;;  %v2280_v14 = vld [vmem:[%s2814_s0 + $0x28] sm:$0xff]  }
   0x4   :  { %2106 = vmatprep.subr.msk.bf16.mxu0 %vm606_vm0, %v508_v2  ;;  %2267 = vmatprep.subr.msk.bf16.mxu1 %vm606_vm0, %v508_v2  ;;  %v2277_v11 = vld [vmem:[%s2814_s0 + $0x98] sm:$0xff]   ;;  %v2278_v12 = vld [vmem:[%s2814_s0 + $0x20] sm:$0xff]   ;;  %v2281_v15 = vld [vmem:[%s2814_s0 + $0xa8] sm:$0xff]   ;;  %v1357_v38 = vsub.s32 0, %v1356_v37  ;;  %v1361_v40 = vsub.s32 1, %v1356_v37 }
   0x5   :  { %614 = vmatpush1.bf16.msra.mxu0 %v608_v3  ;;  %2268 = vmatpush1.bf16.msra.mxu1 %v608_v3  ;;  %v2279_v13 = vld [vmem:[%s2814_s0 + $0xa0] sm:$0xff]   ;;  %v2282_v16 = vld [vmem:[%s2814_s0 + $0x30] sm:$0xff]   ;;  %v2284_v18 = vld [vmem:[%s2814_s0 + $0x38] sm:$0xff]  }
   0x6   :  { %v2283_v17 = vld [vmem:[%s2814_s0 + $0xb0] sm:$0xff]   ;;  %v2285_v19 = vld [vmem:[%s2814_s0 + $0xb8] sm:$0xff]   ;;  %v2286_v20 = vld [vmem:[%s2814_s0 + $0x40] sm:$0xff]  }
   0x7   :  { %v2287_v21 = vld [vmem:[%s2814_s0 + $0xc0] sm:$0xff]   ;;  %v2288_v22 = vld [vmem:[%s2814_s0 + $0x48] sm:$0xff]   ;;  %v2290_v24 = vld [vmem:[%s2814_s0 + $0x50] sm:$0xff]  }
   0x8   :  { %2107 = vmatmul.mubr.msk.bf16.vlgmr.msra.gmra.mrb[0].mxu0 %vm509_vm1, %v2270_v4  ;;  %2123 = vmatmul.mubr.msk.bf16.vlgmr.msra.gmra.mrb[0].mxu1 %vm509_vm1, %v2271_v5  ;;  %v2289_v23 = vld [vmem:[%s2814_s0 + $0xc8] sm:$0xff]   ;;  %v2291_v25 = vld [vmem:[%s2814_s0 + $0xd0] sm:$0xff]   ;;  %v2292_v26 = vld [vmem:[%s2814_s0 + $0x58] sm:$0xff]  }
   0x9   :  { %655 = vmatprep.mubr.bf16.mxu0 %v2302_v1  ;;  %815 = vmatprep.mubr.bf16.mxu1 %v2302_v1  ;;  %v2293_v27 = vld [vmem:[%s2814_s0 + $0xd8] sm:$0xff]   ;;  %v2294_v28 = vld [vmem:[%s2814_s0 + $0x60] sm:$0xff]   ;;  %v2296_v30 = vld [vmem:[%s2814_s0 + $0x68] sm:$0xff]  }
   0xa   :  { %v2295_v29 = vld [vmem:[%s2814_s0 + $0xe0] sm:$0xff]   ;;  %v2297_v31 = vld [vmem:[%s2814_s0 + $0xe8] sm:$0xff]   ;;  %v2298_v32 = vld [vmem:[%s2814_s0 + $0x70] sm:$0xff]  }
   0xb   :  { %v2299_v33 = vld [vmem:[%s2814_s0 + $0xf0] sm:$0xff]   ;;  %v2300_v34 = vld [vmem:[%s2814_s0 + $0x78] sm:$0xff]   ;;  %v1353_v39 = vld [vmem:[%s2815_s2] sm:$0x3] }
   0xc   :  { %v2301_v35 = vld [vmem:[%s2814_s0 + $0xf8] sm:$0xff]   ;;  %v2489_v41 = vrot.slane %v1353_v39, %v1357_v38  ;;  %v2491_v42 = vrot.slane %v1353_v39, %v1361_v40 }
  0x10   :  { %2108 = vmatmul.mubr.msk.bf16.gmra.mrb[4].mxu0 %vm509_vm1, %v2272_v6  ;;  %2124 = vmatmul.mubr.msk.bf16.gmra.mrb[4].mxu1 %vm509_vm1, %v2273_v7 }
  0x11   :  { %665 = vmatprep.mubr.bf16.mxu0 %v2302_v1  ;;  %825 = vmatprep.mubr.bf16.mxu1 %v2302_v1 }
  0x18   :  { %2109 = vmatmul.mubr.msk.bf16.gmra.mrb[8].mxu0 %vm509_vm1, %v2274_v8  ;;  %2125 = vmatmul.mubr.msk.bf16.gmra.mrb[8].mxu1 %vm509_vm1, %v2275_v9 }
  0x19   :  { %675 = vmatprep.mubr.bf16.mxu0 %v2302_v1  ;;  %835 = vmatprep.mubr.bf16.mxu1 %v2302_v1 }
  0x20   :  { %2110 = vmatmul.mubr.msk.bf16.gmra.mrb[12].mxu0 %vm509_vm1, %v2276_v10  ;;  %2126 = vmatmul.mubr.msk.bf16.gmra.mrb[12].mxu1 %vm509_vm1, %v2277_v11 }
  0x21   :  { %685 = vmatprep.mubr.bf16.mxu0 %v2302_v1  ;;  %845 = vmatprep.mubr.bf16.mxu1 %v2302_v1 }
  0x28   :  { %2111 = vmatmul.mubr.msk.bf16.gmra.mrb[16].mxu0 %vm509_vm1, %v2278_v12  ;;  %2127 = vmatmul.mubr.msk.bf16.gmra.mrb[16].mxu1 %vm509_vm1, %v2279_v13 }
  0x29   :  { %695 = vmatprep.mubr.bf16.mxu0 %v2302_v1  ;;  %855 = vmatprep.mubr.bf16.mxu1 %v2302_v1 }
  0x30   :  { %2112 = vmatmul.mubr.msk.bf16.gmra.mrb[20].mxu0 %vm509_vm1, %v2280_v14  ;;  %2128 = vmatmul.mubr.msk.bf16.gmra.mrb[20].mxu1 %vm509_vm1, %v2281_v15 }
  0x31   :  { %705 = vmatprep.mubr.bf16.mxu0 %v2302_v1  ;;  %865 = vmatprep.mubr.bf16.mxu1 %v2302_v1 }
  0x38   :  { %2113 = vmatmul.mubr.msk.bf16.gmra.mrb[24].mxu0 %vm509_vm1, %v2282_v16  ;;  %2129 = vmatmul.mubr.msk.bf16.gmra.mrb[24].mxu1 %vm509_vm1, %v2283_v17 }
  0x39   :  { %715 = vmatprep.mubr.bf16.mxu0 %v2302_v1  ;;  %875 = vmatprep.mubr.bf16.mxu1 %v2302_v1 }
  0x40   :  { %2114 = vmatmul.mubr.msk.bf16.gmra.mrb[28].mxu0 %vm509_vm1, %v2284_v18  ;;  %2130 = vmatmul.mubr.msk.bf16.gmra.mrb[28].mxu1 %vm509_vm1, %v2285_v19 }
  0x41   :  { %725 = vmatprep.mubr.bf16.mxu0 %v2302_v1  ;;  %885 = vmatprep.mubr.bf16.mxu1 %v2302_v1 }
  0x48   :  { %2115 = vmatmul.mubr.msk.bf16.gmra.mrb[32].mxu0 %vm509_vm1, %v2286_v20  ;;  %2131 = vmatmul.mubr.msk.bf16.gmra.mrb[32].mxu1 %vm509_vm1, %v2287_v21 }
  0x49   :  { %735 = vmatprep.mubr.bf16.mxu0 %v2302_v1  ;;  %895 = vmatprep.mubr.bf16.mxu1 %v2302_v1 }
  0x50   :  { %2116 = vmatmul.mubr.msk.bf16.gmra.mrb[36].mxu0 %vm509_vm1, %v2288_v22  ;;  %2132 = vmatmul.mubr.msk.bf16.gmra.mrb[36].mxu1 %vm509_vm1, %v2289_v23 }
  0x51   :  { %745 = vmatprep.mubr.bf16.mxu0 %v2302_v1  ;;  %905 = vmatprep.mubr.bf16.mxu1 %v2302_v1 }
  0x58   :  { %2117 = vmatmul.mubr.msk.bf16.gmra.mrb[40].mxu0 %vm509_vm1, %v2290_v24  ;;  %2133 = vmatmul.mubr.msk.bf16.gmra.mrb[40].mxu1 %vm509_vm1, %v2291_v25 }
  0x59   :  { %755 = vmatprep.mubr.bf16.mxu0 %v2302_v1  ;;  %915 = vmatprep.mubr.bf16.mxu1 %v2302_v1 }
  0x60   :  { %2118 = vmatmul.mubr.msk.bf16.gmra.mrb[44].mxu0 %vm509_vm1, %v2292_v26  ;;  %2134 = vmatmul.mubr.msk.bf16.gmra.mrb[44].mxu1 %vm509_vm1, %v2293_v27 }
  0x61   :  { %765 = vmatprep.mubr.bf16.mxu0 %v2302_v1  ;;  %925 = vmatprep.mubr.bf16.mxu1 %v2302_v1 }
  0x68   :  { %2119 = vmatmul.mubr.msk.bf16.gmra.mrb[48].mxu0 %vm509_vm1, %v2294_v28  ;;  %2135 = vmatmul.mubr.msk.bf16.gmra.mrb[48].mxu1 %vm509_vm1, %v2295_v29 }
  0x69   :  { %775 = vmatprep.mubr.bf16.mxu0 %v2302_v1  ;;  %935 = vmatprep.mubr.bf16.mxu1 %v2302_v1 }
  0x70   :  { %2120 = vmatmul.mubr.msk.bf16.gmra.mrb[52].mxu0 %vm509_vm1, %v2296_v30  ;;  %2136 = vmatmul.mubr.msk.bf16.gmra.mrb[52].mxu1 %vm509_vm1, %v2297_v31 }
  0x71   :  { %785 = vmatprep.mubr.bf16.mxu0 %v2302_v1  ;;  %945 = vmatprep.mubr.bf16.mxu1 %v2302_v1 }
  0x78   :  { %2121 = vmatmul.mubr.msk.bf16.gmra.mrb[56].mxu0 %vm509_vm1, %v2298_v32  ;;  %2137 = vmatmul.mubr.msk.bf16.gmra.mrb[56].mxu1 %vm509_vm1, %v2299_v33 }
  0x79   :  { %795 = vmatprep.mubr.bf16.mxu0 %v2302_v1  ;;  %955 = vmatprep.mubr.bf16.mxu1 %v2302_v1 }
  0x80   :  { %2122 = vmatmul.mubr.msk.bf16.gmra.mrb[60].mxu0 %vm509_vm1, %v2300_v34  ;;  %2138 = vmatmul.mubr.msk.bf16.gmra.mrb[60].mxu1 %vm509_vm1, %v2301_v35 }
  0xdb   :  { %v647_v43 = vpop.f32.mrb[0].mxu0  ;;  %v807_v44 = vpop.f32.mrb[0].mxu1 }
  0xdc   :  { %v1365_v45 = vadd.f32 %v2489_v41, %v647_v43  ;;  %v1429_v46 = vadd.f32 %v2489_v41, %v807_v44  ;;  %v649_v47 = vpop.f32.mrb[1].mxu0  ;;  %v809_v48 = vpop.f32.mrb[1].mxu1 }
  0xdd   :  { %v1366_v49 = vadd.f32 %v2491_v42, %v649_v47  ;;  %v1430_v50 = vadd.f32 %v2491_v42, %v809_v48  ;;  %v651_v51 = vpop.f32.mrb[2].mxu0  ;;  %v811_v52 = vpop.f32.mrb[2].mxu1 }
  0xde   :  { %v1493_v53 = vmax.f32 %v1365_v45, 0.0  ;;  %v1557_v54 = vmax.f32 %v1429_v46, 0.0  ;;  %v1367_v55 = vadd.f32 %v2489_v41, %v651_v51  ;;  %v1431_v56 = vadd.f32 %v2489_v41, %v811_v52  ;;  %v653_v57 = vpop.f32.mrb[3].mxu0  ;;  %v813_v58 = vpop.f32.mrb[3].mxu1 }
  0xdf   :  { %v1494_v59 = vmax.f32 %v1366_v49, 0.0  ;;  %v1558_v60 = vmax.f32 %v1430_v50, 0.0  ;;  %v1368_v61 = vadd.f32 %v2491_v42, %v653_v57  ;;  %v1432_v62 = vadd.f32 %v2491_v42, %v813_v58 }
  0xe0   :  { %v1495_v63 = vmax.f32 %v1367_v55, 0.0  ;;  %v1559_v0 = vmax.f32 %v1431_v56, 0.0 }
  0xe1   :  { %v2203_v1 = vpack.c.bf16 %v1494_v59, %v1493_v53  ;;  %v2235_v2 = vpack.c.bf16 %v1558_v60, %v1557_v54  ;;  %v1496_v3 = vmax.f32 %v1368_v61, 0.0  ;;  %v1560_v4 = vmax.f32 %v1432_v62, 0.0 }
  0xe3   :  { %2005 = vst [vmem:[%s2816_s3] sm:$0xff] %v2203_v1  ;;  %2037 = vst [vmem:[%s2816_s3 + $0x100] sm:$0xff] %v2235_v2  ;;  %v2204_v5 = vpack.c.bf16 %v1496_v3, %v1495_v63  ;;  %v2236_v6 = vpack.c.bf16 %v1560_v4, %v1559_v0  ;;  %v657_v7 = vpop.f32.mrb[4].mxu0  ;;  %v817_v8 = vpop.f32.mrb[4].mxu1 }
  0xe4   :  { %v1369_v9 = vadd.f32 %v2489_v41, %v657_v7  ;;  %v1433_v10 = vadd.f32 %v2489_v41, %v817_v8  ;;  %v659_v11 = vpop.f32.mrb[5].mxu0  ;;  %v819_v12 = vpop.f32.mrb[5].mxu1 }
  0xe5   :  { %2006 = vst [vmem:[%s2816_s3 + $0x8] sm:$0xff] %v2204_v5  ;;  %2038 = vst [vmem:[%s2816_s3 + $0x108] sm:$0xff] %v2236_v6  ;;  %v1370_v13 = vadd.f32 %v2491_v42, %v659_v11  ;;  %v1434_v14 = vadd.f32 %v2491_v42, %v819_v12  ;;  %v661_v15 = vpop.f32.mrb[6].mxu0  ;;  %v821_v16 = vpop.f32.mrb[6].mxu1 }
  0xe6   :  { %v1497_v17 = vmax.f32 %v1369_v9, 0.0  ;;  %v1561_v18 = vmax.f32 %v1433_v10, 0.0  ;;  %v1371_v19 = vadd.f32 %v2489_v41, %v661_v15  ;;  %v1435_v20 = vadd.f32 %v2489_v41, %v821_v16  ;;  %v663_v21 = vpop.f32.mrb[7].mxu0  ;;  %v823_v22 = vpop.f32.mrb[7].mxu1 }
  0xe7   :  { %v1498_v23 = vmax.f32 %v1370_v13, 0.0  ;;  %v1562_v24 = vmax.f32 %v1434_v14, 0.0  ;;  %v1372_v25 = vadd.f32 %v2491_v42, %v663_v21  ;;  %v1436_v26 = vadd.f32 %v2491_v42, %v823_v22 }
  0xe8   :  { %v1499_v27 = vmax.f32 %v1371_v19, 0.0  ;;  %v1563_v28 = vmax.f32 %v1435_v20, 0.0 }
  0xe9   :  { %v2205_v29 = vpack.c.bf16 %v1498_v23, %v1497_v17  ;;  %v2237_v30 = vpack.c.bf16 %v1562_v24, %v1561_v18  ;;  %v1500_v31 = vmax.f32 %v1372_v25, 0.0  ;;  %v1564_v32 = vmax.f32 %v1436_v26, 0.0 }
  0xeb   :  { %2007 = vst [vmem:[%s2816_s3 + $0x10] sm:$0xff] %v2205_v29  ;;  %2039 = vst [vmem:[%s2816_s3 + $0x110] sm:$0xff] %v2237_v30  ;;  %v2206_v33 = vpack.c.bf16 %v1500_v31, %v1499_v27  ;;  %v2238_v34 = vpack.c.bf16 %v1564_v32, %v1563_v28  ;;  %v667_v35 = vpop.f32.mrb[8].mxu0  ;;  %v827_v36 = vpop.f32.mrb[8].mxu1 }
  0xec   :  { %v1373_v37 = vadd.f32 %v2489_v41, %v667_v35  ;;  %v1437_v38 = vadd.f32 %v2489_v41, %v827_v36  ;;  %v669_v39 = vpop.f32.mrb[9].mxu0  ;;  %v829_v40 = vpop.f32.mrb[9].mxu1 }
  0xed   :  { %2008 = vst [vmem:[%s2816_s3 + $0x18] sm:$0xff] %v2206_v33  ;;  %2040 = vst [vmem:[%s2816_s3 + $0x118] sm:$0xff] %v2238_v34  ;;  %v1374_v43 = vadd.f32 %v2491_v42, %v669_v39  ;;  %v1438_v44 = vadd.f32 %v2491_v42, %v829_v40  ;;  %v671_v45 = vpop.f32.mrb[10].mxu0  ;;  %v831_v46 = vpop.f32.mrb[10].mxu1 }
  0xee   :  { %v1501_v47 = vmax.f32 %v1373_v37, 0.0  ;;  %v1565_v48 = vmax.f32 %v1437_v38, 0.0  ;;  %v1375_v49 = vadd.f32 %v2489_v41, %v671_v45  ;;  %v1439_v50 = vadd.f32 %v2489_v41, %v831_v46  ;;  %v673_v51 = vpop.f32.mrb[11].mxu0  ;;  %v833_v52 = vpop.f32.mrb[11].mxu1 }
  0xef   :  { %v1502_v53 = vmax.f32 %v1374_v43, 0.0  ;;  %v1566_v54 = vmax.f32 %v1438_v44, 0.0  ;;  %v1376_v55 = vadd.f32 %v2491_v42, %v673_v51  ;;  %v1440_v56 = vadd.f32 %v2491_v42, %v833_v52 }
  0xf0   :  { %v1503_v57 = vmax.f32 %v1375_v49, 0.0  ;;  %v1567_v58 = vmax.f32 %v1439_v50, 0.0 }
  0xf1   :  { %v2207_v59 = vpack.c.bf16 %v1502_v53, %v1501_v47  ;;  %v2239_v60 = vpack.c.bf16 %v1566_v54, %v1565_v48  ;;  %v1504_v61 = vmax.f32 %v1376_v55, 0.0  ;;  %v1568_v62 = vmax.f32 %v1440_v56, 0.0 }
  0xf3   :  { %2009 = vst [vmem:[%s2816_s3 + $0x20] sm:$0xff] %v2207_v59  ;;  %2041 = vst [vmem:[%s2816_s3 + $0x120] sm:$0xff] %v2239_v60  ;;  %v2208_v63 = vpack.c.bf16 %v1504_v61, %v1503_v57  ;;  %v2240_v0 = vpack.c.bf16 %v1568_v62, %v1567_v58  ;;  %v677_v1 = vpop.f32.mrb[12].mxu0  ;;  %v837_v2 = vpop.f32.mrb[12].mxu1 }
  0xf4   :  { %v1377_v3 = vadd.f32 %v2489_v41, %v677_v1  ;;  %v1441_v4 = vadd.f32 %v2489_v41, %v837_v2  ;;  %v679_v5 = vpop.f32.mrb[13].mxu0  ;;  %v839_v6 = vpop.f32.mrb[13].mxu1 }
  0xf5   :  { %2010 = vst [vmem:[%s2816_s3 + $0x28] sm:$0xff] %v2208_v63  ;;  %2042 = vst [vmem:[%s2816_s3 + $0x128] sm:$0xff] %v2240_v0  ;;  %v1378_v7 = vadd.f32 %v2491_v42, %v679_v5  ;;  %v1442_v8 = vadd.f32 %v2491_v42, %v839_v6  ;;  %v681_v9 = vpop.f32.mrb[14].mxu0  ;;  %v841_v10 = vpop.f32.mrb[14].mxu1 }
  0xf6   :  { %v1505_v11 = vmax.f32 %v1377_v3, 0.0  ;;  %v1569_v12 = vmax.f32 %v1441_v4, 0.0  ;;  %v1379_v13 = vadd.f32 %v2489_v41, %v681_v9  ;;  %v1443_v14 = vadd.f32 %v2489_v41, %v841_v10  ;;  %v683_v15 = vpop.f32.mrb[15].mxu0  ;;  %v843_v16 = vpop.f32.mrb[15].mxu1 }
  0xf7   :  { %v1506_v17 = vmax.f32 %v1378_v7, 0.0  ;;  %v1570_v18 = vmax.f32 %v1442_v8, 0.0  ;;  %v1380_v19 = vadd.f32 %v2491_v42, %v683_v15  ;;  %v1444_v20 = vadd.f32 %v2491_v42, %v843_v16 }
  0xf8   :  { %v1507_v21 = vmax.f32 %v1379_v13, 0.0  ;;  %v1571_v22 = vmax.f32 %v1443_v14, 0.0 }
  0xf9   :  { %v2209_v23 = vpack.c.bf16 %v1506_v17, %v1505_v11  ;;  %v2241_v24 = vpack.c.bf16 %v1570_v18, %v1569_v12  ;;  %v1508_v25 = vmax.f32 %v1380_v19, 0.0  ;;  %v1572_v26 = vmax.f32 %v1444_v20, 0.0 }
  0xfb   :  { %2011 = vst [vmem:[%s2816_s3 + $0x30] sm:$0xff] %v2209_v23  ;;  %2043 = vst [vmem:[%s2816_s3 + $0x130] sm:$0xff] %v2241_v24  ;;  %v2210_v27 = vpack.c.bf16 %v1508_v25, %v1507_v21  ;;  %v2242_v28 = vpack.c.bf16 %v1572_v26, %v1571_v22  ;;  %v687_v29 = vpop.f32.mrb[16].mxu0  ;;  %v847_v30 = vpop.f32.mrb[16].mxu1 }
  0xfc   :  { %v1381_v31 = vadd.f32 %v2489_v41, %v687_v29  ;;  %v1445_v32 = vadd.f32 %v2489_v41, %v847_v30  ;;  %v689_v33 = vpop.f32.mrb[17].mxu0  ;;  %v849_v34 = vpop.f32.mrb[17].mxu1 }
  0xfd   :  { %2012 = vst [vmem:[%s2816_s3 + $0x38] sm:$0xff] %v2210_v27  ;;  %2044 = vst [vmem:[%s2816_s3 + $0x138] sm:$0xff] %v2242_v28  ;;  %v1382_v35 = vadd.f32 %v2491_v42, %v689_v33  ;;  %v1446_v36 = vadd.f32 %v2491_v42, %v849_v34  ;;  %v691_v37 = vpop.f32.mrb[18].mxu0  ;;  %v851_v38 = vpop.f32.mrb[18].mxu1 }
  0xfe   :  { %v1509_v39 = vmax.f32 %v1381_v31, 0.0  ;;  %v1573_v40 = vmax.f32 %v1445_v32, 0.0  ;;  %v1383_v43 = vadd.f32 %v2489_v41, %v691_v37  ;;  %v1447_v44 = vadd.f32 %v2489_v41, %v851_v38  ;;  %v693_v45 = vpop.f32.mrb[19].mxu0  ;;  %v853_v46 = vpop.f32.mrb[19].mxu1 }
  0xff   :  { %v1510_v47 = vmax.f32 %v1382_v35, 0.0  ;;  %v1574_v48 = vmax.f32 %v1446_v36, 0.0  ;;  %v1384_v49 = vadd.f32 %v2491_v42, %v693_v45  ;;  %v1448_v50 = vadd.f32 %v2491_v42, %v853_v46 }
 0x100   :  { %v1511_v51 = vmax.f32 %v1383_v43, 0.0  ;;  %v1575_v52 = vmax.f32 %v1447_v44, 0.0 }
 0x101   :  { %v2211_v53 = vpack.c.bf16 %v1510_v47, %v1509_v39  ;;  %v2243_v54 = vpack.c.bf16 %v1574_v48, %v1573_v40  ;;  %v1512_v55 = vmax.f32 %v1384_v49, 0.0  ;;  %v1576_v56 = vmax.f32 %v1448_v50, 0.0 }
 0x103   :  { %2013 = vst [vmem:[%s2816_s3 + $0x40] sm:$0xff] %v2211_v53  ;;  %2045 = vst [vmem:[%s2816_s3 + $0x140] sm:$0xff] %v2243_v54  ;;  %v2212_v57 = vpack.c.bf16 %v1512_v55, %v1511_v51  ;;  %v2244_v58 = vpack.c.bf16 %v1576_v56, %v1575_v52  ;;  %v697_v59 = vpop.f32.mrb[20].mxu0  ;;  %v857_v60 = vpop.f32.mrb[20].mxu1 }
 0x104   :  { %v1385_v61 = vadd.f32 %v2489_v41, %v697_v59  ;;  %v1449_v62 = vadd.f32 %v2489_v41, %v857_v60  ;;  %v699_v63 = vpop.f32.mrb[21].mxu0  ;;  %v859_v0 = vpop.f32.mrb[21].mxu1 }
 0x105   :  { %2014 = vst [vmem:[%s2816_s3 + $0x48] sm:$0xff] %v2212_v57  ;;  %2046 = vst [vmem:[%s2816_s3 + $0x148] sm:$0xff] %v2244_v58  ;;  %v1386_v1 = vadd.f32 %v2491_v42, %v699_v63  ;;  %v1450_v2 = vadd.f32 %v2491_v42, %v859_v0  ;;  %v701_v3 = vpop.f32.mrb[22].mxu0  ;;  %v861_v4 = vpop.f32.mrb[22].mxu1 }
 0x106   :  { %v1513_v5 = vmax.f32 %v1385_v61, 0.0  ;;  %v1577_v6 = vmax.f32 %v1449_v62, 0.0  ;;  %v1387_v7 = vadd.f32 %v2489_v41, %v701_v3  ;;  %v1451_v8 = vadd.f32 %v2489_v41, %v861_v4  ;;  %v703_v9 = vpop.f32.mrb[23].mxu0  ;;  %v863_v10 = vpop.f32.mrb[23].mxu1 }
 0x107   :  { %v1514_v11 = vmax.f32 %v1386_v1, 0.0  ;;  %v1578_v12 = vmax.f32 %v1450_v2, 0.0  ;;  %v1388_v13 = vadd.f32 %v2491_v42, %v703_v9  ;;  %v1452_v14 = vadd.f32 %v2491_v42, %v863_v10 }
 0x108   :  { %v1515_v15 = vmax.f32 %v1387_v7, 0.0  ;;  %v1579_v16 = vmax.f32 %v1451_v8, 0.0 }
 0x109   :  { %v2213_v17 = vpack.c.bf16 %v1514_v11, %v1513_v5  ;;  %v2245_v18 = vpack.c.bf16 %v1578_v12, %v1577_v6  ;;  %v1516_v19 = vmax.f32 %v1388_v13, 0.0  ;;  %v1580_v20 = vmax.f32 %v1452_v14, 0.0 }
 0x10b   :  { %2015 = vst [vmem:[%s2816_s3 + $0x50] sm:$0xff] %v2213_v17  ;;  %2047 = vst [vmem:[%s2816_s3 + $0x150] sm:$0xff] %v2245_v18  ;;  %v2214_v21 = vpack.c.bf16 %v1516_v19, %v1515_v15  ;;  %v2246_v22 = vpack.c.bf16 %v1580_v20, %v1579_v16  ;;  %v707_v23 = vpop.f32.mrb[24].mxu0  ;;  %v867_v24 = vpop.f32.mrb[24].mxu1 }
 0x10c   :  { %v1389_v25 = vadd.f32 %v2489_v41, %v707_v23  ;;  %v1453_v26 = vadd.f32 %v2489_v41, %v867_v24  ;;  %v709_v27 = vpop.f32.mrb[25].mxu0  ;;  %v869_v28 = vpop.f32.mrb[25].mxu1 }
 0x10d   :  { %2016 = vst [vmem:[%s2816_s3 + $0x58] sm:$0xff] %v2214_v21  ;;  %2048 = vst [vmem:[%s2816_s3 + $0x158] sm:$0xff] %v2246_v22  ;;  %v1390_v29 = vadd.f32 %v2491_v42, %v709_v27  ;;  %v1454_v30 = vadd.f32 %v2491_v42, %v869_v28  ;;  %v711_v31 = vpop.f32.mrb[26].mxu0  ;;  %v871_v32 = vpop.f32.mrb[26].mxu1 }
 0x10e   :  { %v1517_v33 = vmax.f32 %v1389_v25, 0.0  ;;  %v1581_v34 = vmax.f32 %v1453_v26, 0.0  ;;  %v1391_v35 = vadd.f32 %v2489_v41, %v711_v31  ;;  %v1455_v36 = vadd.f32 %v2489_v41, %v871_v32  ;;  %v713_v37 = vpop.f32.mrb[27].mxu0  ;;  %v873_v38 = vpop.f32.mrb[27].mxu1 }
 0x10f   :  { %v1518_v39 = vmax.f32 %v1390_v29, 0.0  ;;  %v1582_v40 = vmax.f32 %v1454_v30, 0.0  ;;  %v1392_v43 = vadd.f32 %v2491_v42, %v713_v37  ;;  %v1456_v44 = vadd.f32 %v2491_v42, %v873_v38 }
 0x110   :  { %v1519_v45 = vmax.f32 %v1391_v35, 0.0  ;;  %v1583_v46 = vmax.f32 %v1455_v36, 0.0 }
 0x111   :  { %v2215_v47 = vpack.c.bf16 %v1518_v39, %v1517_v33  ;;  %v2247_v48 = vpack.c.bf16 %v1582_v40, %v1581_v34  ;;  %v1520_v49 = vmax.f32 %v1392_v43, 0.0  ;;  %v1584_v50 = vmax.f32 %v1456_v44, 0.0 }
 0x113   :  { %2017 = vst [vmem:[%s2816_s3 + $0x60] sm:$0xff] %v2215_v47  ;;  %2049 = vst [vmem:[%s2816_s3 + $0x160] sm:$0xff] %v2247_v48  ;;  %v2216_v51 = vpack.c.bf16 %v1520_v49, %v1519_v45  ;;  %v2248_v52 = vpack.c.bf16 %v1584_v50, %v1583_v46  ;;  %v717_v53 = vpop.f32.mrb[28].mxu0  ;;  %v877_v54 = vpop.f32.mrb[28].mxu1 }
 0x114   :  { %v1393_v55 = vadd.f32 %v2489_v41, %v717_v53  ;;  %v1457_v56 = vadd.f32 %v2489_v41, %v877_v54  ;;  %v719_v57 = vpop.f32.mrb[29].mxu0  ;;  %v879_v58 = vpop.f32.mrb[29].mxu1 }
 0x115   :  { %2018 = vst [vmem:[%s2816_s3 + $0x68] sm:$0xff] %v2216_v51  ;;  %2050 = vst [vmem:[%s2816_s3 + $0x168] sm:$0xff] %v2248_v52  ;;  %v1394_v59 = vadd.f32 %v2491_v42, %v719_v57  ;;  %v1458_v60 = vadd.f32 %v2491_v42, %v879_v58  ;;  %v721_v61 = vpop.f32.mrb[30].mxu0  ;;  %v881_v62 = vpop.f32.mrb[30].mxu1 }
 0x116   :  { %v1521_v63 = vmax.f32 %v1393_v55, 0.0  ;;  %v1585_v0 = vmax.f32 %v1457_v56, 0.0  ;;  %v1395_v1 = vadd.f32 %v2489_v41, %v721_v61  ;;  %v1459_v2 = vadd.f32 %v2489_v41, %v881_v62  ;;  %v723_v3 = vpop.f32.mrb[31].mxu0  ;;  %v883_v4 = vpop.f32.mrb[31].mxu1 }
 0x117   :  { %v1522_v5 = vmax.f32 %v1394_v59, 0.0  ;;  %v1586_v6 = vmax.f32 %v1458_v60, 0.0  ;;  %v1396_v7 = vadd.f32 %v2491_v42, %v723_v3  ;;  %v1460_v8 = vadd.f32 %v2491_v42, %v883_v4 }
 0x118   :  { %v1523_v9 = vmax.f32 %v1395_v1, 0.0  ;;  %v1587_v10 = vmax.f32 %v1459_v2, 0.0 }
 0x119   :  { %v2217_v11 = vpack.c.bf16 %v1522_v5, %v1521_v63  ;;  %v2249_v12 = vpack.c.bf16 %v1586_v6, %v1585_v0  ;;  %v1524_v13 = vmax.f32 %v1396_v7, 0.0  ;;  %v1588_v14 = vmax.f32 %v1460_v8, 0.0 }
 0x11b   :  { %2019 = vst [vmem:[%s2816_s3 + $0x70] sm:$0xff] %v2217_v11  ;;  %2051 = vst [vmem:[%s2816_s3 + $0x170] sm:$0xff] %v2249_v12  ;;  %v2218_v15 = vpack.c.bf16 %v1524_v13, %v1523_v9  ;;  %v2250_v16 = vpack.c.bf16 %v1588_v14, %v1587_v10  ;;  %v727_v17 = vpop.f32.mrb[32].mxu0  ;;  %v887_v18 = vpop.f32.mrb[32].mxu1 }
 0x11c   :  { %v1397_v19 = vadd.f32 %v2489_v41, %v727_v17  ;;  %v1461_v20 = vadd.f32 %v2489_v41, %v887_v18  ;;  %v729_v21 = vpop.f32.mrb[33].mxu0  ;;  %v889_v22 = vpop.f32.mrb[33].mxu1 }
 0x11d   :  { %2020 = vst [vmem:[%s2816_s3 + $0x78] sm:$0xff] %v2218_v15  ;;  %2052 = vst [vmem:[%s2816_s3 + $0x178] sm:$0xff] %v2250_v16  ;;  %v1398_v23 = vadd.f32 %v2491_v42, %v729_v21  ;;  %v1462_v24 = vadd.f32 %v2491_v42, %v889_v22  ;;  %v731_v25 = vpop.f32.mrb[34].mxu0  ;;  %v891_v26 = vpop.f32.mrb[34].mxu1 }
 0x11e   :  { %v1525_v27 = vmax.f32 %v1397_v19, 0.0  ;;  %v1589_v28 = vmax.f32 %v1461_v20, 0.0  ;;  %v1399_v29 = vadd.f32 %v2489_v41, %v731_v25  ;;  %v1463_v30 = vadd.f32 %v2489_v41, %v891_v26  ;;  %v733_v31 = vpop.f32.mrb[35].mxu0  ;;  %v893_v32 = vpop.f32.mrb[35].mxu1 }
 0x11f   :  { %v1526_v33 = vmax.f32 %v1398_v23, 0.0  ;;  %v1590_v34 = vmax.f32 %v1462_v24, 0.0  ;;  %v1400_v35 = vadd.f32 %v2491_v42, %v733_v31  ;;  %v1464_v36 = vadd.f32 %v2491_v42, %v893_v32 }
 0x120   :  { %v1527_v37 = vmax.f32 %v1399_v29, 0.0  ;;  %v1591_v38 = vmax.f32 %v1463_v30, 0.0 }
 0x121   :  { %v2219_v39 = vpack.c.bf16 %v1526_v33, %v1525_v27  ;;  %v2251_v40 = vpack.c.bf16 %v1590_v34, %v1589_v28  ;;  %v1528_v43 = vmax.f32 %v1400_v35, 0.0  ;;  %v1592_v44 = vmax.f32 %v1464_v36, 0.0 }
 0x123   :  { %2021 = vst [vmem:[%s2816_s3 + $0x80] sm:$0xff] %v2219_v39  ;;  %2053 = vst [vmem:[%s2816_s3 + $0x180] sm:$0xff] %v2251_v40  ;;  %v2220_v45 = vpack.c.bf16 %v1528_v43, %v1527_v37  ;;  %v2252_v46 = vpack.c.bf16 %v1592_v44, %v1591_v38  ;;  %v737_v47 = vpop.f32.mrb[36].mxu0  ;;  %v897_v48 = vpop.f32.mrb[36].mxu1 }
 0x124   :  { %v1401_v49 = vadd.f32 %v2489_v41, %v737_v47  ;;  %v1465_v50 = vadd.f32 %v2489_v41, %v897_v48  ;;  %v739_v51 = vpop.f32.mrb[37].mxu0  ;;  %v899_v52 = vpop.f32.mrb[37].mxu1 }
 0x125   :  { %2022 = vst [vmem:[%s2816_s3 + $0x88] sm:$0xff] %v2220_v45  ;;  %2054 = vst [vmem:[%s2816_s3 + $0x188] sm:$0xff] %v2252_v46  ;;  %v1402_v53 = vadd.f32 %v2491_v42, %v739_v51  ;;  %v1466_v54 = vadd.f32 %v2491_v42, %v899_v52  ;;  %v741_v55 = vpop.f32.mrb[38].mxu0  ;;  %v901_v56 = vpop.f32.mrb[38].mxu1 }
 0x126   :  { %v1529_v57 = vmax.f32 %v1401_v49, 0.0  ;;  %v1593_v58 = vmax.f32 %v1465_v50, 0.0  ;;  %v1403_v59 = vadd.f32 %v2489_v41, %v741_v55  ;;  %v1467_v60 = vadd.f32 %v2489_v41, %v901_v56  ;;  %v743_v61 = vpop.f32.mrb[39].mxu0  ;;  %v903_v62 = vpop.f32.mrb[39].mxu1 }
 0x127   :  { %v1530_v63 = vmax.f32 %v1402_v53, 0.0  ;;  %v1594_v0 = vmax.f32 %v1466_v54, 0.0  ;;  %v1404_v1 = vadd.f32 %v2491_v42, %v743_v61  ;;  %v1468_v2 = vadd.f32 %v2491_v42, %v903_v62 }
 0x128   :  { %v1531_v3 = vmax.f32 %v1403_v59, 0.0  ;;  %v1595_v4 = vmax.f32 %v1467_v60, 0.0 }
 0x129   :  { %v2221_v5 = vpack.c.bf16 %v1530_v63, %v1529_v57  ;;  %v2253_v6 = vpack.c.bf16 %v1594_v0, %v1593_v58  ;;  %v1532_v7 = vmax.f32 %v1404_v1, 0.0  ;;  %v1596_v8 = vmax.f32 %v1468_v2, 0.0 }
 0x12b   :  { %2023 = vst [vmem:[%s2816_s3 + $0x90] sm:$0xff] %v2221_v5  ;;  %2055 = vst [vmem:[%s2816_s3 + $0x190] sm:$0xff] %v2253_v6  ;;  %v2222_v9 = vpack.c.bf16 %v1532_v7, %v1531_v3  ;;  %v2254_v10 = vpack.c.bf16 %v1596_v8, %v1595_v4  ;;  %v747_v11 = vpop.f32.mrb[40].mxu0  ;;  %v907_v12 = vpop.f32.mrb[40].mxu1 }
 0x12c   :  { %v1405_v13 = vadd.f32 %v2489_v41, %v747_v11  ;;  %v1469_v14 = vadd.f32 %v2489_v41, %v907_v12  ;;  %v749_v15 = vpop.f32.mrb[41].mxu0  ;;  %v909_v16 = vpop.f32.mrb[41].mxu1 }
 0x12d   :  { %2024 = vst [vmem:[%s2816_s3 + $0x98] sm:$0xff] %v2222_v9  ;;  %2056 = vst [vmem:[%s2816_s3 + $0x198] sm:$0xff] %v2254_v10  ;;  %v1406_v17 = vadd.f32 %v2491_v42, %v749_v15  ;;  %v1470_v18 = vadd.f32 %v2491_v42, %v909_v16  ;;  %v751_v19 = vpop.f32.mrb[42].mxu0  ;;  %v911_v20 = vpop.f32.mrb[42].mxu1 }
 0x12e   :  { %v1533_v21 = vmax.f32 %v1405_v13, 0.0  ;;  %v1597_v22 = vmax.f32 %v1469_v14, 0.0  ;;  %v1407_v23 = vadd.f32 %v2489_v41, %v751_v19  ;;  %v1471_v24 = vadd.f32 %v2489_v41, %v911_v20  ;;  %v753_v25 = vpop.f32.mrb[43].mxu0  ;;  %v913_v26 = vpop.f32.mrb[43].mxu1 }
 0x12f   :  { %v1534_v27 = vmax.f32 %v1406_v17, 0.0  ;;  %v1598_v28 = vmax.f32 %v1470_v18, 0.0  ;;  %v1408_v29 = vadd.f32 %v2491_v42, %v753_v25  ;;  %v1472_v30 = vadd.f32 %v2491_v42, %v913_v26 }
 0x130   :  { %v1535_v31 = vmax.f32 %v1407_v23, 0.0  ;;  %v1599_v32 = vmax.f32 %v1471_v24, 0.0 }
 0x131   :  { %v2223_v33 = vpack.c.bf16 %v1534_v27, %v1533_v21  ;;  %v2255_v34 = vpack.c.bf16 %v1598_v28, %v1597_v22  ;;  %v1536_v35 = vmax.f32 %v1408_v29, 0.0  ;;  %v1600_v36 = vmax.f32 %v1472_v30, 0.0 }
 0x133   :  { %2025 = vst [vmem:[%s2816_s3 + $0xa0] sm:$0xff] %v2223_v33  ;;  %2057 = vst [vmem:[%s2816_s3 + $0x1a0] sm:$0xff] %v2255_v34  ;;  %v2224_v37 = vpack.c.bf16 %v1536_v35, %v1535_v31  ;;  %v2256_v38 = vpack.c.bf16 %v1600_v36, %v1599_v32  ;;  %v757_v39 = vpop.f32.mrb[44].mxu0  ;;  %v917_v40 = vpop.f32.mrb[44].mxu1 }
 0x134   :  { %v1409_v43 = vadd.f32 %v2489_v41, %v757_v39  ;;  %v1473_v44 = vadd.f32 %v2489_v41, %v917_v40  ;;  %v759_v45 = vpop.f32.mrb[45].mxu0  ;;  %v919_v46 = vpop.f32.mrb[45].mxu1 }
 0x135   :  { %2026 = vst [vmem:[%s2816_s3 + $0xa8] sm:$0xff] %v2224_v37  ;;  %2058 = vst [vmem:[%s2816_s3 + $0x1a8] sm:$0xff] %v2256_v38  ;;  %v1410_v47 = vadd.f32 %v2491_v42, %v759_v45  ;;  %v1474_v48 = vadd.f32 %v2491_v42, %v919_v46  ;;  %v761_v49 = vpop.f32.mrb[46].mxu0  ;;  %v921_v50 = vpop.f32.mrb[46].mxu1 }
 0x136   :  { %v1537_v51 = vmax.f32 %v1409_v43, 0.0  ;;  %v1601_v52 = vmax.f32 %v1473_v44, 0.0  ;;  %v1411_v53 = vadd.f32 %v2489_v41, %v761_v49  ;;  %v1475_v54 = vadd.f32 %v2489_v41, %v921_v50  ;;  %v763_v55 = vpop.f32.mrb[47].mxu0  ;;  %v923_v56 = vpop.f32.mrb[47].mxu1 }
 0x137   :  { %v1538_v57 = vmax.f32 %v1410_v47, 0.0  ;;  %v1602_v58 = vmax.f32 %v1474_v48, 0.0  ;;  %v1412_v59 = vadd.f32 %v2491_v42, %v763_v55  ;;  %v1476_v60 = vadd.f32 %v2491_v42, %v923_v56 }
 0x138   :  { %v1539_v61 = vmax.f32 %v1411_v53, 0.0  ;;  %v1603_v62 = vmax.f32 %v1475_v54, 0.0 }
 0x139   :  { %v2225_v63 = vpack.c.bf16 %v1538_v57, %v1537_v51  ;;  %v2257_v0 = vpack.c.bf16 %v1602_v58, %v1601_v52  ;;  %v1540_v1 = vmax.f32 %v1412_v59, 0.0  ;;  %v1604_v2 = vmax.f32 %v1476_v60, 0.0 }
 0x13b   :  { %2027 = vst [vmem:[%s2816_s3 + $0xb0] sm:$0xff] %v2225_v63  ;;  %2059 = vst [vmem:[%s2816_s3 + $0x1b0] sm:$0xff] %v2257_v0  ;;  %v2226_v3 = vpack.c.bf16 %v1540_v1, %v1539_v61  ;;  %v2258_v4 = vpack.c.bf16 %v1604_v2, %v1603_v62  ;;  %v767_v5 = vpop.f32.mrb[48].mxu0  ;;  %v927_v6 = vpop.f32.mrb[48].mxu1 }
 0x13c   :  { %v1413_v7 = vadd.f32 %v2489_v41, %v767_v5  ;;  %v1477_v8 = vadd.f32 %v2489_v41, %v927_v6  ;;  %v769_v9 = vpop.f32.mrb[49].mxu0  ;;  %v929_v10 = vpop.f32.mrb[49].mxu1 }
 0x13d   :  { %2028 = vst [vmem:[%s2816_s3 + $0xb8] sm:$0xff] %v2226_v3  ;;  %2060 = vst [vmem:[%s2816_s3 + $0x1b8] sm:$0xff] %v2258_v4  ;;  %v1414_v11 = vadd.f32 %v2491_v42, %v769_v9  ;;  %v1478_v12 = vadd.f32 %v2491_v42, %v929_v10  ;;  %v771_v13 = vpop.f32.mrb[50].mxu0  ;;  %v931_v14 = vpop.f32.mrb[50].mxu1 }
 0x13e   :  { %v1541_v15 = vmax.f32 %v1413_v7, 0.0  ;;  %v1605_v16 = vmax.f32 %v1477_v8, 0.0  ;;  %v1415_v17 = vadd.f32 %v2489_v41, %v771_v13  ;;  %v1479_v18 = vadd.f32 %v2489_v41, %v931_v14  ;;  %v773_v19 = vpop.f32.mrb[51].mxu0  ;;  %v933_v20 = vpop.f32.mrb[51].mxu1 }
 0x13f   :  { %v1542_v21 = vmax.f32 %v1414_v11, 0.0  ;;  %v1606_v22 = vmax.f32 %v1478_v12, 0.0  ;;  %v1416_v23 = vadd.f32 %v2491_v42, %v773_v19  ;;  %v1480_v24 = vadd.f32 %v2491_v42, %v933_v20 }
 0x140   :  { %v1543_v25 = vmax.f32 %v1415_v17, 0.0  ;;  %v1607_v26 = vmax.f32 %v1479_v18, 0.0 }
 0x141   :  { %v2227_v27 = vpack.c.bf16 %v1542_v21, %v1541_v15  ;;  %v2259_v28 = vpack.c.bf16 %v1606_v22, %v1605_v16  ;;  %v1544_v29 = vmax.f32 %v1416_v23, 0.0  ;;  %v1608_v30 = vmax.f32 %v1480_v24, 0.0 }
 0x143   :  { %2029 = vst [vmem:[%s2816_s3 + $0xc0] sm:$0xff] %v2227_v27  ;;  %2061 = vst [vmem:[%s2816_s3 + $0x1c0] sm:$0xff] %v2259_v28  ;;  %v2228_v31 = vpack.c.bf16 %v1544_v29, %v1543_v25  ;;  %v2260_v32 = vpack.c.bf16 %v1608_v30, %v1607_v26  ;;  %v777_v33 = vpop.f32.mrb[52].mxu0  ;;  %v937_v34 = vpop.f32.mrb[52].mxu1 }
 0x144   :  { %v1417_v35 = vadd.f32 %v2489_v41, %v777_v33  ;;  %v1481_v36 = vadd.f32 %v2489_v41, %v937_v34  ;;  %v779_v37 = vpop.f32.mrb[53].mxu0  ;;  %v939_v38 = vpop.f32.mrb[53].mxu1 }
 0x145   :  { %2030 = vst [vmem:[%s2816_s3 + $0xc8] sm:$0xff] %v2228_v31  ;;  %2062 = vst [vmem:[%s2816_s3 + $0x1c8] sm:$0xff] %v2260_v32  ;;  %v1418_v39 = vadd.f32 %v2491_v42, %v779_v37  ;;  %v1482_v40 = vadd.f32 %v2491_v42, %v939_v38  ;;  %v781_v43 = vpop.f32.mrb[54].mxu0  ;;  %v941_v44 = vpop.f32.mrb[54].mxu1 }
 0x146   :  { %v1545_v45 = vmax.f32 %v1417_v35, 0.0  ;;  %v1609_v46 = vmax.f32 %v1481_v36, 0.0  ;;  %v1419_v47 = vadd.f32 %v2489_v41, %v781_v43  ;;  %v1483_v48 = vadd.f32 %v2489_v41, %v941_v44  ;;  %v783_v49 = vpop.f32.mrb[55].mxu0  ;;  %v943_v50 = vpop.f32.mrb[55].mxu1 }
 0x147   :  { %v1546_v51 = vmax.f32 %v1418_v39, 0.0  ;;  %v1610_v52 = vmax.f32 %v1482_v40, 0.0  ;;  %v1420_v53 = vadd.f32 %v2491_v42, %v783_v49  ;;  %v1484_v54 = vadd.f32 %v2491_v42, %v943_v50 }
 0x148   :  { %v1547_v55 = vmax.f32 %v1419_v47, 0.0  ;;  %v1611_v56 = vmax.f32 %v1483_v48, 0.0 }
 0x149   :  { %v2229_v57 = vpack.c.bf16 %v1546_v51, %v1545_v45  ;;  %v2261_v58 = vpack.c.bf16 %v1610_v52, %v1609_v46  ;;  %v1548_v59 = vmax.f32 %v1420_v53, 0.0  ;;  %v1612_v60 = vmax.f32 %v1484_v54, 0.0 }
 0x14b   :  { %2031 = vst [vmem:[%s2816_s3 + $0xd0] sm:$0xff] %v2229_v57  ;;  %2063 = vst [vmem:[%s2816_s3 + $0x1d0] sm:$0xff] %v2261_v58  ;;  %v2230_v61 = vpack.c.bf16 %v1548_v59, %v1547_v55  ;;  %v2262_v62 = vpack.c.bf16 %v1612_v60, %v1611_v56  ;;  %v787_v63 = vpop.f32.mrb[56].mxu0  ;;  %v947_v0 = vpop.f32.mrb[56].mxu1 }
 0x14c   :  { %v1421_v1 = vadd.f32 %v2489_v41, %v787_v63  ;;  %v1485_v2 = vadd.f32 %v2489_v41, %v947_v0  ;;  %v789_v3 = vpop.f32.mrb[57].mxu0  ;;  %v949_v4 = vpop.f32.mrb[57].mxu1 }
 0x14d   :  { %2032 = vst [vmem:[%s2816_s3 + $0xd8] sm:$0xff] %v2230_v61  ;;  %2064 = vst [vmem:[%s2816_s3 + $0x1d8] sm:$0xff] %v2262_v62  ;;  %v1422_v5 = vadd.f32 %v2491_v42, %v789_v3  ;;  %v1486_v6 = vadd.f32 %v2491_v42, %v949_v4  ;;  %v791_v7 = vpop.f32.mrb[58].mxu0  ;;  %v951_v8 = vpop.f32.mrb[58].mxu1 }
 0x14e   :  { %v1549_v9 = vmax.f32 %v1421_v1, 0.0  ;;  %v1613_v10 = vmax.f32 %v1485_v2, 0.0  ;;  %v1423_v11 = vadd.f32 %v2489_v41, %v791_v7  ;;  %v1487_v12 = vadd.f32 %v2489_v41, %v951_v8  ;;  %v793_v13 = vpop.f32.mrb[59].mxu0  ;;  %v953_v14 = vpop.f32.mrb[59].mxu1 }
 0x14f   :  { %v1550_v15 = vmax.f32 %v1422_v5, 0.0  ;;  %v1614_v16 = vmax.f32 %v1486_v6, 0.0  ;;  %v1424_v17 = vadd.f32 %v2491_v42, %v793_v13  ;;  %v1488_v18 = vadd.f32 %v2491_v42, %v953_v14 }
 0x150   :  { %v1551_v19 = vmax.f32 %v1423_v11, 0.0  ;;  %v1615_v20 = vmax.f32 %v1487_v12, 0.0 }
 0x151   :  { %v2231_v21 = vpack.c.bf16 %v1550_v15, %v1549_v9  ;;  %v2263_v22 = vpack.c.bf16 %v1614_v16, %v1613_v10  ;;  %v1552_v23 = vmax.f32 %v1424_v17, 0.0  ;;  %v1616_v24 = vmax.f32 %v1488_v18, 0.0 }
 0x153   :  { %2033 = vst [vmem:[%s2816_s3 + $0xe0] sm:$0xff] %v2231_v21  ;;  %2065 = vst [vmem:[%s2816_s3 + $0x1e0] sm:$0xff] %v2263_v22  ;;  %v2232_v25 = vpack.c.bf16 %v1552_v23, %v1551_v19  ;;  %v2264_v26 = vpack.c.bf16 %v1616_v24, %v1615_v20  ;;  %v797_v27 = vpop.f32.mrb[60].mxu0  ;;  %v957_v28 = vpop.f32.mrb[60].mxu1 }
 0x154   :  { %v1425_v29 = vadd.f32 %v2489_v41, %v797_v27  ;;  %v1489_v30 = vadd.f32 %v2489_v41, %v957_v28  ;;  %v799_v31 = vpop.f32.mrb[61].mxu0  ;;  %v959_v32 = vpop.f32.mrb[61].mxu1 }
 0x155   :  { %2034 = vst [vmem:[%s2816_s3 + $0xe8] sm:$0xff] %v2232_v25  ;;  %2066 = vst [vmem:[%s2816_s3 + $0x1e8] sm:$0xff] %v2264_v26  ;;  %v1426_v33 = vadd.f32 %v2491_v42, %v799_v31  ;;  %v1490_v34 = vadd.f32 %v2491_v42, %v959_v32  ;;  %v801_v35 = vpop.f32.mrb[62].mxu0  ;;  %v961_v36 = vpop.f32.mrb[62].mxu1 }
 0x156   :  { %v1553_v37 = vmax.f32 %v1425_v29, 0.0  ;;  %v1617_v38 = vmax.f32 %v1489_v30, 0.0  ;;  %v1427_v39 = vadd.f32 %v2489_v41, %v801_v35  ;;  %v1491_v40 = vadd.f32 %v2489_v41, %v961_v36  ;;  %v803_v43 = vpop.f32.mrb[63].mxu0  ;;  %v963_v44 = vpop.f32.mrb[63].mxu1 }
 0x157   :  { %v1554_v45 = vmax.f32 %v1426_v33, 0.0  ;;  %v1618_v46 = vmax.f32 %v1490_v34, 0.0  ;;  %v1428_v47 = vadd.f32 %v2491_v42, %v803_v43  ;;  %v1492_v48 = vadd.f32 %v2491_v42, %v963_v44 }
 0x158   :  { %v1555_v49 = vmax.f32 %v1427_v39, 0.0  ;;  %v1619_v50 = vmax.f32 %v1491_v40, 0.0 }
 0x159   :  { %v2233_v51 = vpack.c.bf16 %v1554_v45, %v1553_v37  ;;  %v2265_v52 = vpack.c.bf16 %v1618_v46, %v1617_v38  ;;  %v1556_v53 = vmax.f32 %v1428_v47, 0.0  ;;  %v1620_v54 = vmax.f32 %v1492_v48, 0.0 }
 0x15b   :  { %2035 = vst [vmem:[%s2816_s3 + $0xf0] sm:$0xff] %v2233_v51  ;;  %2067 = vst [vmem:[%s2816_s3 + $0x1f0] sm:$0xff] %v2265_v52  ;;  %v2234_v41 = vpack.c.bf16 %v1556_v53, %v1555_v49  ;;  %v2266_v55 = vpack.c.bf16 %v1620_v54, %v1619_v50 }
 0x15d   :  { %2036 = vst [vmem:[%s2816_s3 + $0xf8] sm:$0xff] %v2234_v41  ;;  %2068 = vst [vmem:[%s2816_s3 + $0x1f8] sm:$0xff] %v2266_v55 }

// kernel: aspp_forward.8
= control target key start
LH: loop header
LB: loop body
LE: loop exit
PB: predicated region body
PF: predicated region fallthrough
CT: control target
= control target key end

     0   :  { %v2339_v1 = vmov 0   ;;  %vm626_vm0 = vcmask 1041408   ;;  %vm529_vm1 = vcmask 293888   ;;  %v1375_v41 = vlaneseq  ;;  %s2862_s1 = inlined_call_operand.vmem [shape: bf16[36,256], index: 1, kind: input, shape index: {}]   ;;  %s2863_s0 = inlined_call_operand.vmem [shape: bf16[512,36], index: 0, kind: input, shape index: {}]   ;;  %s2864_s2 = inlined_call_operand.vmem [shape: f32[1,256], index: 2, kind: input, shape index: {}]   ;;  %s2865_s3 = inlined_call_operand.vmem [shape: bf16[512,256], index: 3, kind: output, shape index: {}]  }
   0x1   :  { %v2299_v0 = vld [vmem:[%s2862_s1 + $0x4] ss:$8 sps:$4 sm:$0xff]   ;;  %665 = vmatprep.mubr.bf16.mxu0 %v2339_v1  ;;  %825 = vmatprep.mubr.bf16.mxu1 %v2339_v1  ;;  %v2301_v2 = vld [vmem:[%s2862_s1] ss:$8 sps:$4 sm:$0xff]   ;;  %v2302_v3 = vld [vmem:[%s2862_s1 + $0x14] ss:$8 sps:$4 sm:$0xff]  }
   0x2   :  { %633 = vmatprep.subr.bf16.mxu0 %v2299_v0  ;;  %2292 = vmatprep.subr.bf16.mxu1 %v2299_v0  ;;  %v343_v4 = vld [vmem:[%s2862_s1 + $0x20] sm:$0x33]  ;;  %v2304_v5 = vld [vmem:[%s2862_s1 + $0x10] ss:$8 sps:$4 sm:$0xff]   ;;  %v2309_v11 = vld [vmem:[%s2863_s0 + $0x8] sm:$0xff]   ;;  %v1376_v42 = vshrl.u32 %v1375_v41, 7 }
   0x3   :  { %634 = vmatpush1.bf16.msra.mxu0 %v2301_v2  ;;  %2295 = vmatpush1.bf16.msra.mxu1 %v2301_v2  ;;  %v2130_v6 = vcombine.high %v343_v4, %v343_v4  ;;  %v2129_v7 = vcombine.low %v343_v4, %v343_v4  ;;  %v2307_v9 = vld [vmem:[%s2863_s0] sm:$0xff]   ;;  %v2310_v12 = vld [vmem:[%s2863_s0 + $0x88] sm:$0xff]   ;;  %v2311_v13 = vld [vmem:[%s2863_s0 + $0x10] sm:$0xff]  }
   0x4   :  { %635 = vmatprep.subr.bf16.mxu0 %v2302_v3  ;;  %2293 = vmatprep.subr.bf16.mxu1 %v2302_v3  ;;  %v2308_v10 = vld [vmem:[%s2863_s0 + $0x80] sm:$0xff]   ;;  %v2312_v14 = vld [vmem:[%s2863_s0 + $0x90] sm:$0xff]   ;;  %v2313_v15 = vld [vmem:[%s2863_s0 + $0x18] sm:$0xff]   ;;  %v1377_v43 = vsub.s32 0, %v1376_v42  ;;  %v1381_v45 = vsub.s32 1, %v1376_v42 }
   0x5   :  { %v628_v8 = vsel %vm626_vm0, %v2129_v7, 0  ;;  %v2314_v16 = vld [vmem:[%s2863_s0 + $0x98] sm:$0xff]   ;;  %v2315_v17 = vld [vmem:[%s2863_s0 + $0x20] sm:$0xff]   ;;  %v2317_v19 = vld [vmem:[%s2863_s0 + $0x28] sm:$0xff]  }
   0x6   :  { %v2316_v18 = vld [vmem:[%s2863_s0 + $0xa0] sm:$0xff]   ;;  %v2318_v20 = vld [vmem:[%s2863_s0 + $0xa8] sm:$0xff]   ;;  %v2319_v21 = vld [vmem:[%s2863_s0 + $0x30] sm:$0xff]  }
   0x7   :  { %636 = vmatpush1.bf16.msra.mxu0 %v2304_v5  ;;  %2296 = vmatpush1.bf16.msra.mxu1 %v2304_v5  ;;  %v2320_v22 = vld [vmem:[%s2863_s0 + $0xb0] sm:$0xff]   ;;  %v2321_v23 = vld [vmem:[%s2863_s0 + $0x38] sm:$0xff]   ;;  %v2323_v25 = vld [vmem:[%s2863_s0 + $0x40] sm:$0xff]  }
   0x8   :  { %2131 = vmatprep.subr.msk.bf16.mxu0 %vm626_vm0, %v2130_v6  ;;  %2294 = vmatprep.subr.msk.bf16.mxu1 %vm626_vm0, %v2130_v6  ;;  %v2322_v24 = vld [vmem:[%s2863_s0 + $0xb8] sm:$0xff]   ;;  %v2324_v26 = vld [vmem:[%s2863_s0 + $0xc0] sm:$0xff]   ;;  %v2325_v27 = vld [vmem:[%s2863_s0 + $0x48] sm:$0xff]  }
   0x9   :  { %v2326_v28 = vld [vmem:[%s2863_s0 + $0xc8] sm:$0xff]   ;;  %v2327_v29 = vld [vmem:[%s2863_s0 + $0x50] sm:$0xff]   ;;  %v2329_v31 = vld [vmem:[%s2863_s0 + $0x58] sm:$0xff]  }
   0xa   :  { %v2328_v30 = vld [vmem:[%s2863_s0 + $0xd0] sm:$0xff]   ;;  %v2330_v32 = vld [vmem:[%s2863_s0 + $0xd8] sm:$0xff]   ;;  %v2331_v33 = vld [vmem:[%s2863_s0 + $0x60] sm:$0xff]  }
   0xb   :  { %638 = vmatpush1.bf16.msra.mxu0 %v628_v8  ;;  %2297 = vmatpush1.bf16.msra.mxu1 %v628_v8  ;;  %v2332_v34 = vld [vmem:[%s2863_s0 + $0xe0] sm:$0xff]   ;;  %v2333_v35 = vld [vmem:[%s2863_s0 + $0x68] sm:$0xff]   ;;  %v2335_v37 = vld [vmem:[%s2863_s0 + $0x70] sm:$0xff]  }
   0xc   :  { %v2334_v36 = vld [vmem:[%s2863_s0 + $0xe8] sm:$0xff]   ;;  %v2336_v38 = vld [vmem:[%s2863_s0 + $0xf0] sm:$0xff]   ;;  %v2337_v39 = vld [vmem:[%s2863_s0 + $0x78] sm:$0xff]  }
   0xd   :  { %v2338_v40 = vld [vmem:[%s2863_s0 + $0xf8] sm:$0xff]   ;;  %v1373_v44 = vld [vmem:[%s2864_s2] sm:$0x3] }
   0xe   :  { %2132 = vmatmul.mubr.msk.bf16.vlgmr.msra.gmra.mrb[0].mxu0 %vm529_vm1, %v2307_v9  ;;  %2148 = vmatmul.mubr.msk.bf16.vlgmr.msra.gmra.mrb[0].mxu1 %vm529_vm1, %v2308_v10  ;;  %v2538_v46 = vrot.slane %v1373_v44, %v1377_v43  ;;  %v2540_v47 = vrot.slane %v1373_v44, %v1381_v45 }
   0xf   :  { %675 = vmatprep.mubr.bf16.mxu0 %v2339_v1  ;;  %835 = vmatprep.mubr.bf16.mxu1 %v2339_v1 }
  0x16   :  { %2133 = vmatmul.mubr.msk.bf16.gmra.mrb[4].mxu0 %vm529_vm1, %v2309_v11  ;;  %2149 = vmatmul.mubr.msk.bf16.gmra.mrb[4].mxu1 %vm529_vm1, %v2310_v12 }
  0x17   :  { %685 = vmatprep.mubr.bf16.mxu0 %v2339_v1  ;;  %845 = vmatprep.mubr.bf16.mxu1 %v2339_v1 }
  0x1e   :  { %2134 = vmatmul.mubr.msk.bf16.gmra.mrb[8].mxu0 %vm529_vm1, %v2311_v13  ;;  %2150 = vmatmul.mubr.msk.bf16.gmra.mrb[8].mxu1 %vm529_vm1, %v2312_v14 }
  0x1f   :  { %695 = vmatprep.mubr.bf16.mxu0 %v2339_v1  ;;  %855 = vmatprep.mubr.bf16.mxu1 %v2339_v1 }
  0x26   :  { %2135 = vmatmul.mubr.msk.bf16.gmra.mrb[12].mxu0 %vm529_vm1, %v2313_v15  ;;  %2151 = vmatmul.mubr.msk.bf16.gmra.mrb[12].mxu1 %vm529_vm1, %v2314_v16 }
  0x27   :  { %705 = vmatprep.mubr.bf16.mxu0 %v2339_v1  ;;  %865 = vmatprep.mubr.bf16.mxu1 %v2339_v1 }
  0x2e   :  { %2136 = vmatmul.mubr.msk.bf16.gmra.mrb[16].mxu0 %vm529_vm1, %v2315_v17  ;;  %2152 = vmatmul.mubr.msk.bf16.gmra.mrb[16].mxu1 %vm529_vm1, %v2316_v18 }
  0x2f   :  { %715 = vmatprep.mubr.bf16.mxu0 %v2339_v1  ;;  %875 = vmatprep.mubr.bf16.mxu1 %v2339_v1 }
  0x36   :  { %2137 = vmatmul.mubr.msk.bf16.gmra.mrb[20].mxu0 %vm529_vm1, %v2317_v19  ;;  %2153 = vmatmul.mubr.msk.bf16.gmra.mrb[20].mxu1 %vm529_vm1, %v2318_v20 }
  0x37   :  { %725 = vmatprep.mubr.bf16.mxu0 %v2339_v1  ;;  %885 = vmatprep.mubr.bf16.mxu1 %v2339_v1 }
  0x3e   :  { %2138 = vmatmul.mubr.msk.bf16.gmra.mrb[24].mxu0 %vm529_vm1, %v2319_v21  ;;  %2154 = vmatmul.mubr.msk.bf16.gmra.mrb[24].mxu1 %vm529_vm1, %v2320_v22 }
  0x3f   :  { %735 = vmatprep.mubr.bf16.mxu0 %v2339_v1  ;;  %895 = vmatprep.mubr.bf16.mxu1 %v2339_v1 }
  0x46   :  { %2139 = vmatmul.mubr.msk.bf16.gmra.mrb[28].mxu0 %vm529_vm1, %v2321_v23  ;;  %2155 = vmatmul.mubr.msk.bf16.gmra.mrb[28].mxu1 %vm529_vm1, %v2322_v24 }
  0x47   :  { %745 = vmatprep.mubr.bf16.mxu0 %v2339_v1  ;;  %905 = vmatprep.mubr.bf16.mxu1 %v2339_v1 }
  0x4e   :  { %2140 = vmatmul.mubr.msk.bf16.gmra.mrb[32].mxu0 %vm529_vm1, %v2323_v25  ;;  %2156 = vmatmul.mubr.msk.bf16.gmra.mrb[32].mxu1 %vm529_vm1, %v2324_v26 }
  0x4f   :  { %755 = vmatprep.mubr.bf16.mxu0 %v2339_v1  ;;  %915 = vmatprep.mubr.bf16.mxu1 %v2339_v1 }
  0x56   :  { %2141 = vmatmul.mubr.msk.bf16.gmra.mrb[36].mxu0 %vm529_vm1, %v2325_v27  ;;  %2157 = vmatmul.mubr.msk.bf16.gmra.mrb[36].mxu1 %vm529_vm1, %v2326_v28 }
  0x57   :  { %765 = vmatprep.mubr.bf16.mxu0 %v2339_v1  ;;  %925 = vmatprep.mubr.bf16.mxu1 %v2339_v1 }
  0x5e   :  { %2142 = vmatmul.mubr.msk.bf16.gmra.mrb[40].mxu0 %vm529_vm1, %v2327_v29  ;;  %2158 = vmatmul.mubr.msk.bf16.gmra.mrb[40].mxu1 %vm529_vm1, %v2328_v30 }
  0x5f   :  { %775 = vmatprep.mubr.bf16.mxu0 %v2339_v1  ;;  %935 = vmatprep.mubr.bf16.mxu1 %v2339_v1 }
  0x66   :  { %2143 = vmatmul.mubr.msk.bf16.gmra.mrb[44].mxu0 %vm529_vm1, %v2329_v31  ;;  %2159 = vmatmul.mubr.msk.bf16.gmra.mrb[44].mxu1 %vm529_vm1, %v2330_v32 }
  0x67   :  { %785 = vmatprep.mubr.bf16.mxu0 %v2339_v1  ;;  %945 = vmatprep.mubr.bf16.mxu1 %v2339_v1 }
  0x6e   :  { %2144 = vmatmul.mubr.msk.bf16.gmra.mrb[48].mxu0 %vm529_vm1, %v2331_v33  ;;  %2160 = vmatmul.mubr.msk.bf16.gmra.mrb[48].mxu1 %vm529_vm1, %v2332_v34 }
  0x6f   :  { %795 = vmatprep.mubr.bf16.mxu0 %v2339_v1  ;;  %955 = vmatprep.mubr.bf16.mxu1 %v2339_v1 }
  0x76   :  { %2145 = vmatmul.mubr.msk.bf16.gmra.mrb[52].mxu0 %vm529_vm1, %v2333_v35  ;;  %2161 = vmatmul.mubr.msk.bf16.gmra.mrb[52].mxu1 %vm529_vm1, %v2334_v36 }
  0x77   :  { %805 = vmatprep.mubr.bf16.mxu0 %v2339_v1  ;;  %965 = vmatprep.mubr.bf16.mxu1 %v2339_v1 }
  0x7e   :  { %2146 = vmatmul.mubr.msk.bf16.gmra.mrb[56].mxu0 %vm529_vm1, %v2335_v37  ;;  %2162 = vmatmul.mubr.msk.bf16.gmra.mrb[56].mxu1 %vm529_vm1, %v2336_v38 }
  0x7f   :  { %815 = vmatprep.mubr.bf16.mxu0 %v2339_v1  ;;  %975 = vmatprep.mubr.bf16.mxu1 %v2339_v1 }
  0x86   :  { %2147 = vmatmul.mubr.msk.bf16.gmra.mrb[60].mxu0 %vm529_vm1, %v2337_v39  ;;  %2163 = vmatmul.mubr.msk.bf16.gmra.mrb[60].mxu1 %vm529_vm1, %v2338_v40 }
  0xe1   :  { %v667_v48 = vpop.f32.mrb[0].mxu0  ;;  %v827_v49 = vpop.f32.mrb[0].mxu1 }
  0xe2   :  { %v1385_v50 = vadd.f32 %v2538_v46, %v667_v48  ;;  %v1449_v51 = vadd.f32 %v2538_v46, %v827_v49  ;;  %v669_v52 = vpop.f32.mrb[1].mxu0  ;;  %v829_v53 = vpop.f32.mrb[1].mxu1 }
  0xe3   :  { %v1386_v54 = vadd.f32 %v2540_v47, %v669_v52  ;;  %v1450_v55 = vadd.f32 %v2540_v47, %v829_v53  ;;  %v671_v56 = vpop.f32.mrb[2].mxu0  ;;  %v831_v57 = vpop.f32.mrb[2].mxu1 }
  0xe4   :  { %v1513_v58 = vmax.f32 %v1385_v50, 0.0  ;;  %v1577_v59 = vmax.f32 %v1449_v51, 0.0  ;;  %v1387_v60 = vadd.f32 %v2538_v46, %v671_v56  ;;  %v1451_v61 = vadd.f32 %v2538_v46, %v831_v57  ;;  %v673_v62 = vpop.f32.mrb[3].mxu0  ;;  %v833_v63 = vpop.f32.mrb[3].mxu1 }
  0xe5   :  { %v1514_v0 = vmax.f32 %v1386_v54, 0.0  ;;  %v1578_v1 = vmax.f32 %v1450_v55, 0.0  ;;  %v1388_v2 = vadd.f32 %v2540_v47, %v673_v62  ;;  %v1452_v3 = vadd.f32 %v2540_v47, %v833_v63 }
  0xe6   :  { %v1515_v4 = vmax.f32 %v1387_v60, 0.0  ;;  %v1579_v5 = vmax.f32 %v1451_v61, 0.0 }
  0xe7   :  { %v2228_v6 = vpack.c.bf16 %v1514_v0, %v1513_v58  ;;  %v2260_v7 = vpack.c.bf16 %v1578_v1, %v1577_v59  ;;  %v1516_v8 = vmax.f32 %v1388_v2, 0.0  ;;  %v1580_v9 = vmax.f32 %v1452_v3, 0.0 }
  0xe9   :  { %2025 = vst [vmem:[%s2865_s3] sm:$0xff] %v2228_v6  ;;  %2057 = vst [vmem:[%s2865_s3 + $0x100] sm:$0xff] %v2260_v7  ;;  %v2229_v10 = vpack.c.bf16 %v1516_v8, %v1515_v4  ;;  %v2261_v11 = vpack.c.bf16 %v1580_v9, %v1579_v5  ;;  %v677_v12 = vpop.f32.mrb[4].mxu0  ;;  %v837_v13 = vpop.f32.mrb[4].mxu1 }
  0xea   :  { %v1389_v14 = vadd.f32 %v2538_v46, %v677_v12  ;;  %v1453_v15 = vadd.f32 %v2538_v46, %v837_v13  ;;  %v679_v16 = vpop.f32.mrb[5].mxu0  ;;  %v839_v17 = vpop.f32.mrb[5].mxu1 }
  0xeb   :  { %2026 = vst [vmem:[%s2865_s3 + $0x8] sm:$0xff] %v2229_v10  ;;  %2058 = vst [vmem:[%s2865_s3 + $0x108] sm:$0xff] %v2261_v11  ;;  %v1390_v18 = vadd.f32 %v2540_v47, %v679_v16  ;;  %v1454_v19 = vadd.f32 %v2540_v47, %v839_v17  ;;  %v681_v20 = vpop.f32.mrb[6].mxu0  ;;  %v841_v21 = vpop.f32.mrb[6].mxu1 }
  0xec   :  { %v1517_v22 = vmax.f32 %v1389_v14, 0.0  ;;  %v1581_v23 = vmax.f32 %v1453_v15, 0.0  ;;  %v1391_v24 = vadd.f32 %v2538_v46, %v681_v20  ;;  %v1455_v25 = vadd.f32 %v2538_v46, %v841_v21  ;;  %v683_v26 = vpop.f32.mrb[7].mxu0  ;;  %v843_v27 = vpop.f32.mrb[7].mxu1 }
  0xed   :  { %v1518_v28 = vmax.f32 %v1390_v18, 0.0  ;;  %v1582_v29 = vmax.f32 %v1454_v19, 0.0  ;;  %v1392_v30 = vadd.f32 %v2540_v47, %v683_v26  ;;  %v1456_v31 = vadd.f32 %v2540_v47, %v843_v27 }
  0xee   :  { %v1519_v32 = vmax.f32 %v1391_v24, 0.0  ;;  %v1583_v33 = vmax.f32 %v1455_v25, 0.0 }
  0xef   :  { %v2230_v34 = vpack.c.bf16 %v1518_v28, %v1517_v22  ;;  %v2262_v35 = vpack.c.bf16 %v1582_v29, %v1581_v23  ;;  %v1520_v36 = vmax.f32 %v1392_v30, 0.0  ;;  %v1584_v37 = vmax.f32 %v1456_v31, 0.0 }
  0xf1   :  { %2027 = vst [vmem:[%s2865_s3 + $0x10] sm:$0xff] %v2230_v34  ;;  %2059 = vst [vmem:[%s2865_s3 + $0x110] sm:$0xff] %v2262_v35  ;;  %v2231_v38 = vpack.c.bf16 %v1520_v36, %v1519_v32  ;;  %v2263_v39 = vpack.c.bf16 %v1584_v37, %v1583_v33  ;;  %v687_v40 = vpop.f32.mrb[8].mxu0  ;;  %v847_v41 = vpop.f32.mrb[8].mxu1 }
  0xf2   :  { %v1393_v42 = vadd.f32 %v2538_v46, %v687_v40  ;;  %v1457_v43 = vadd.f32 %v2538_v46, %v847_v41  ;;  %v689_v44 = vpop.f32.mrb[9].mxu0  ;;  %v849_v45 = vpop.f32.mrb[9].mxu1 }
  0xf3   :  { %2028 = vst [vmem:[%s2865_s3 + $0x18] sm:$0xff] %v2231_v38  ;;  %2060 = vst [vmem:[%s2865_s3 + $0x118] sm:$0xff] %v2263_v39  ;;  %v1394_v48 = vadd.f32 %v2540_v47, %v689_v44  ;;  %v1458_v49 = vadd.f32 %v2540_v47, %v849_v45  ;;  %v691_v50 = vpop.f32.mrb[10].mxu0  ;;  %v851_v51 = vpop.f32.mrb[10].mxu1 }
  0xf4   :  { %v1521_v52 = vmax.f32 %v1393_v42, 0.0  ;;  %v1585_v53 = vmax.f32 %v1457_v43, 0.0  ;;  %v1395_v54 = vadd.f32 %v2538_v46, %v691_v50  ;;  %v1459_v55 = vadd.f32 %v2538_v46, %v851_v51  ;;  %v693_v56 = vpop.f32.mrb[11].mxu0  ;;  %v853_v57 = vpop.f32.mrb[11].mxu1 }
  0xf5   :  { %v1522_v58 = vmax.f32 %v1394_v48, 0.0  ;;  %v1586_v59 = vmax.f32 %v1458_v49, 0.0  ;;  %v1396_v60 = vadd.f32 %v2540_v47, %v693_v56  ;;  %v1460_v61 = vadd.f32 %v2540_v47, %v853_v57 }
  0xf6   :  { %v1523_v62 = vmax.f32 %v1395_v54, 0.0  ;;  %v1587_v63 = vmax.f32 %v1459_v55, 0.0 }
  0xf7   :  { %v2232_v0 = vpack.c.bf16 %v1522_v58, %v1521_v52  ;;  %v2264_v1 = vpack.c.bf16 %v1586_v59, %v1585_v53  ;;  %v1524_v2 = vmax.f32 %v1396_v60, 0.0  ;;  %v1588_v3 = vmax.f32 %v1460_v61, 0.0 }
  0xf9   :  { %2029 = vst [vmem:[%s2865_s3 + $0x20] sm:$0xff] %v2232_v0  ;;  %2061 = vst [vmem:[%s2865_s3 + $0x120] sm:$0xff] %v2264_v1  ;;  %v2233_v4 = vpack.c.bf16 %v1524_v2, %v1523_v62  ;;  %v2265_v5 = vpack.c.bf16 %v1588_v3, %v1587_v63  ;;  %v697_v6 = vpop.f32.mrb[12].mxu0  ;;  %v857_v7 = vpop.f32.mrb[12].mxu1 }
  0xfa   :  { %v1397_v8 = vadd.f32 %v2538_v46, %v697_v6  ;;  %v1461_v9 = vadd.f32 %v2538_v46, %v857_v7  ;;  %v699_v10 = vpop.f32.mrb[13].mxu0  ;;  %v859_v11 = vpop.f32.mrb[13].mxu1 }
  0xfb   :  { %2030 = vst [vmem:[%s2865_s3 + $0x28] sm:$0xff] %v2233_v4  ;;  %2062 = vst [vmem:[%s2865_s3 + $0x128] sm:$0xff] %v2265_v5  ;;  %v1398_v12 = vadd.f32 %v2540_v47, %v699_v10  ;;  %v1462_v13 = vadd.f32 %v2540_v47, %v859_v11  ;;  %v701_v14 = vpop.f32.mrb[14].mxu0  ;;  %v861_v15 = vpop.f32.mrb[14].mxu1 }
  0xfc   :  { %v1525_v16 = vmax.f32 %v1397_v8, 0.0  ;;  %v1589_v17 = vmax.f32 %v1461_v9, 0.0  ;;  %v1399_v18 = vadd.f32 %v2538_v46, %v701_v14  ;;  %v1463_v19 = vadd.f32 %v2538_v46, %v861_v15  ;;  %v703_v20 = vpop.f32.mrb[15].mxu0  ;;  %v863_v21 = vpop.f32.mrb[15].mxu1 }
  0xfd   :  { %v1526_v22 = vmax.f32 %v1398_v12, 0.0  ;;  %v1590_v23 = vmax.f32 %v1462_v13, 0.0  ;;  %v1400_v24 = vadd.f32 %v2540_v47, %v703_v20  ;;  %v1464_v25 = vadd.f32 %v2540_v47, %v863_v21 }
  0xfe   :  { %v1527_v26 = vmax.f32 %v1399_v18, 0.0  ;;  %v1591_v27 = vmax.f32 %v1463_v19, 0.0 }
  0xff   :  { %v2234_v28 = vpack.c.bf16 %v1526_v22, %v1525_v16  ;;  %v2266_v29 = vpack.c.bf16 %v1590_v23, %v1589_v17  ;;  %v1528_v30 = vmax.f32 %v1400_v24, 0.0  ;;  %v1592_v31 = vmax.f32 %v1464_v25, 0.0 }
 0x101   :  { %2031 = vst [vmem:[%s2865_s3 + $0x30] sm:$0xff] %v2234_v28  ;;  %2063 = vst [vmem:[%s2865_s3 + $0x130] sm:$0xff] %v2266_v29  ;;  %v2235_v32 = vpack.c.bf16 %v1528_v30, %v1527_v26  ;;  %v2267_v33 = vpack.c.bf16 %v1592_v31, %v1591_v27  ;;  %v707_v34 = vpop.f32.mrb[16].mxu0  ;;  %v867_v35 = vpop.f32.mrb[16].mxu1 }
 0x102   :  { %v1401_v36 = vadd.f32 %v2538_v46, %v707_v34  ;;  %v1465_v37 = vadd.f32 %v2538_v46, %v867_v35  ;;  %v709_v38 = vpop.f32.mrb[17].mxu0  ;;  %v869_v39 = vpop.f32.mrb[17].mxu1 }
 0x103   :  { %2032 = vst [vmem:[%s2865_s3 + $0x38] sm:$0xff] %v2235_v32  ;;  %2064 = vst [vmem:[%s2865_s3 + $0x138] sm:$0xff] %v2267_v33  ;;  %v1402_v40 = vadd.f32 %v2540_v47, %v709_v38  ;;  %v1466_v41 = vadd.f32 %v2540_v47, %v869_v39  ;;  %v711_v42 = vpop.f32.mrb[18].mxu0  ;;  %v871_v43 = vpop.f32.mrb[18].mxu1 }
 0x104   :  { %v1529_v44 = vmax.f32 %v1401_v36, 0.0  ;;  %v1593_v45 = vmax.f32 %v1465_v37, 0.0  ;;  %v1403_v48 = vadd.f32 %v2538_v46, %v711_v42  ;;  %v1467_v49 = vadd.f32 %v2538_v46, %v871_v43  ;;  %v713_v50 = vpop.f32.mrb[19].mxu0  ;;  %v873_v51 = vpop.f32.mrb[19].mxu1 }
 0x105   :  { %v1530_v52 = vmax.f32 %v1402_v40, 0.0  ;;  %v1594_v53 = vmax.f32 %v1466_v41, 0.0  ;;  %v1404_v54 = vadd.f32 %v2540_v47, %v713_v50  ;;  %v1468_v55 = vadd.f32 %v2540_v47, %v873_v51 }
 0x106   :  { %v1531_v56 = vmax.f32 %v1403_v48, 0.0  ;;  %v1595_v57 = vmax.f32 %v1467_v49, 0.0 }
 0x107   :  { %v2236_v58 = vpack.c.bf16 %v1530_v52, %v1529_v44  ;;  %v2268_v59 = vpack.c.bf16 %v1594_v53, %v1593_v45  ;;  %v1532_v60 = vmax.f32 %v1404_v54, 0.0  ;;  %v1596_v61 = vmax.f32 %v1468_v55, 0.0 }
 0x109   :  { %2033 = vst [vmem:[%s2865_s3 + $0x40] sm:$0xff] %v2236_v58  ;;  %2065 = vst [vmem:[%s2865_s3 + $0x140] sm:$0xff] %v2268_v59  ;;  %v2237_v62 = vpack.c.bf16 %v1532_v60, %v1531_v56  ;;  %v2269_v63 = vpack.c.bf16 %v1596_v61, %v1595_v57  ;;  %v717_v0 = vpop.f32.mrb[20].mxu0  ;;  %v877_v1 = vpop.f32.mrb[20].mxu1 }
 0x10a   :  { %v1405_v2 = vadd.f32 %v2538_v46, %v717_v0  ;;  %v1469_v3 = vadd.f32 %v2538_v46, %v877_v1  ;;  %v719_v4 = vpop.f32.mrb[21].mxu0  ;;  %v879_v5 = vpop.f32.mrb[21].mxu1 }
 0x10b   :  { %2034 = vst [vmem:[%s2865_s3 + $0x48] sm:$0xff] %v2237_v62  ;;  %2066 = vst [vmem:[%s2865_s3 + $0x148] sm:$0xff] %v2269_v63  ;;  %v1406_v6 = vadd.f32 %v2540_v47, %v719_v4  ;;  %v1470_v7 = vadd.f32 %v2540_v47, %v879_v5  ;;  %v721_v8 = vpop.f32.mrb[22].mxu0  ;;  %v881_v9 = vpop.f32.mrb[22].mxu1 }
 0x10c   :  { %v1533_v10 = vmax.f32 %v1405_v2, 0.0  ;;  %v1597_v11 = vmax.f32 %v1469_v3, 0.0  ;;  %v1407_v12 = vadd.f32 %v2538_v46, %v721_v8  ;;  %v1471_v13 = vadd.f32 %v2538_v46, %v881_v9  ;;  %v723_v14 = vpop.f32.mrb[23].mxu0  ;;  %v883_v15 = vpop.f32.mrb[23].mxu1 }
 0x10d   :  { %v1534_v16 = vmax.f32 %v1406_v6, 0.0  ;;  %v1598_v17 = vmax.f32 %v1470_v7, 0.0  ;;  %v1408_v18 = vadd.f32 %v2540_v47, %v723_v14  ;;  %v1472_v19 = vadd.f32 %v2540_v47, %v883_v15 }
 0x10e   :  { %v1535_v20 = vmax.f32 %v1407_v12, 0.0  ;;  %v1599_v21 = vmax.f32 %v1471_v13, 0.0 }
 0x10f   :  { %v2238_v22 = vpack.c.bf16 %v1534_v16, %v1533_v10  ;;  %v2270_v23 = vpack.c.bf16 %v1598_v17, %v1597_v11  ;;  %v1536_v24 = vmax.f32 %v1408_v18, 0.0  ;;  %v1600_v25 = vmax.f32 %v1472_v19, 0.0 }
 0x111   :  { %2035 = vst [vmem:[%s2865_s3 + $0x50] sm:$0xff] %v2238_v22  ;;  %2067 = vst [vmem:[%s2865_s3 + $0x150] sm:$0xff] %v2270_v23  ;;  %v2239_v26 = vpack.c.bf16 %v1536_v24, %v1535_v20  ;;  %v2271_v27 = vpack.c.bf16 %v1600_v25, %v1599_v21  ;;  %v727_v28 = vpop.f32.mrb[24].mxu0  ;;  %v887_v29 = vpop.f32.mrb[24].mxu1 }
 0x112   :  { %v1409_v30 = vadd.f32 %v2538_v46, %v727_v28  ;;  %v1473_v31 = vadd.f32 %v2538_v46, %v887_v29  ;;  %v729_v32 = vpop.f32.mrb[25].mxu0  ;;  %v889_v33 = vpop.f32.mrb[25].mxu1 }
 0x113   :  { %2036 = vst [vmem:[%s2865_s3 + $0x58] sm:$0xff] %v2239_v26  ;;  %2068 = vst [vmem:[%s2865_s3 + $0x158] sm:$0xff] %v2271_v27  ;;  %v1410_v34 = vadd.f32 %v2540_v47, %v729_v32  ;;  %v1474_v35 = vadd.f32 %v2540_v47, %v889_v33  ;;  %v731_v36 = vpop.f32.mrb[26].mxu0  ;;  %v891_v37 = vpop.f32.mrb[26].mxu1 }
 0x114   :  { %v1537_v38 = vmax.f32 %v1409_v30, 0.0  ;;  %v1601_v39 = vmax.f32 %v1473_v31, 0.0  ;;  %v1411_v40 = vadd.f32 %v2538_v46, %v731_v36  ;;  %v1475_v41 = vadd.f32 %v2538_v46, %v891_v37  ;;  %v733_v42 = vpop.f32.mrb[27].mxu0  ;;  %v893_v43 = vpop.f32.mrb[27].mxu1 }
 0x115   :  { %v1538_v44 = vmax.f32 %v1410_v34, 0.0  ;;  %v1602_v45 = vmax.f32 %v1474_v35, 0.0  ;;  %v1412_v48 = vadd.f32 %v2540_v47, %v733_v42  ;;  %v1476_v49 = vadd.f32 %v2540_v47, %v893_v43 }
 0x116   :  { %v1539_v50 = vmax.f32 %v1411_v40, 0.0  ;;  %v1603_v51 = vmax.f32 %v1475_v41, 0.0 }
 0x117   :  { %v2240_v52 = vpack.c.bf16 %v1538_v44, %v1537_v38  ;;  %v2272_v53 = vpack.c.bf16 %v1602_v45, %v1601_v39  ;;  %v1540_v54 = vmax.f32 %v1412_v48, 0.0  ;;  %v1604_v55 = vmax.f32 %v1476_v49, 0.0 }
 0x119   :  { %2037 = vst [vmem:[%s2865_s3 + $0x60] sm:$0xff] %v2240_v52  ;;  %2069 = vst [vmem:[%s2865_s3 + $0x160] sm:$0xff] %v2272_v53  ;;  %v2241_v56 = vpack.c.bf16 %v1540_v54, %v1539_v50  ;;  %v2273_v57 = vpack.c.bf16 %v1604_v55, %v1603_v51  ;;  %v737_v58 = vpop.f32.mrb[28].mxu0  ;;  %v897_v59 = vpop.f32.mrb[28].mxu1 }
 0x11a   :  { %v1413_v60 = vadd.f32 %v2538_v46, %v737_v58  ;;  %v1477_v61 = vadd.f32 %v2538_v46, %v897_v59  ;;  %v739_v62 = vpop.f32.mrb[29].mxu0  ;;  %v899_v63 = vpop.f32.mrb[29].mxu1 }
 0x11b   :  { %2038 = vst [vmem:[%s2865_s3 + $0x68] sm:$0xff] %v2241_v56  ;;  %2070 = vst [vmem:[%s2865_s3 + $0x168] sm:$0xff] %v2273_v57  ;;  %v1414_v0 = vadd.f32 %v2540_v47, %v739_v62  ;;  %v1478_v1 = vadd.f32 %v2540_v47, %v899_v63  ;;  %v741_v2 = vpop.f32.mrb[30].mxu0  ;;  %v901_v3 = vpop.f32.mrb[30].mxu1 }
 0x11c   :  { %v1541_v4 = vmax.f32 %v1413_v60, 0.0  ;;  %v1605_v5 = vmax.f32 %v1477_v61, 0.0  ;;  %v1415_v6 = vadd.f32 %v2538_v46, %v741_v2  ;;  %v1479_v7 = vadd.f32 %v2538_v46, %v901_v3  ;;  %v743_v8 = vpop.f32.mrb[31].mxu0  ;;  %v903_v9 = vpop.f32.mrb[31].mxu1 }
 0x11d   :  { %v1542_v10 = vmax.f32 %v1414_v0, 0.0  ;;  %v1606_v11 = vmax.f32 %v1478_v1, 0.0  ;;  %v1416_v12 = vadd.f32 %v2540_v47, %v743_v8  ;;  %v1480_v13 = vadd.f32 %v2540_v47, %v903_v9 }
 0x11e   :  { %v1543_v14 = vmax.f32 %v1415_v6, 0.0  ;;  %v1607_v15 = vmax.f32 %v1479_v7, 0.0 }
 0x11f   :  { %v2242_v16 = vpack.c.bf16 %v1542_v10, %v1541_v4  ;;  %v2274_v17 = vpack.c.bf16 %v1606_v11, %v1605_v5  ;;  %v1544_v18 = vmax.f32 %v1416_v12, 0.0  ;;  %v1608_v19 = vmax.f32 %v1480_v13, 0.0 }
 0x121   :  { %2039 = vst [vmem:[%s2865_s3 + $0x70] sm:$0xff] %v2242_v16  ;;  %2071 = vst [vmem:[%s2865_s3 + $0x170] sm:$0xff] %v2274_v17  ;;  %v2243_v20 = vpack.c.bf16 %v1544_v18, %v1543_v14  ;;  %v2275_v21 = vpack.c.bf16 %v1608_v19, %v1607_v15  ;;  %v747_v22 = vpop.f32.mrb[32].mxu0  ;;  %v907_v23 = vpop.f32.mrb[32].mxu1 }
 0x122   :  { %v1417_v24 = vadd.f32 %v2538_v46, %v747_v22  ;;  %v1481_v25 = vadd.f32 %v2538_v46, %v907_v23  ;;  %v749_v26 = vpop.f32.mrb[33].mxu0  ;;  %v909_v27 = vpop.f32.mrb[33].mxu1 }
 0x123   :  { %2040 = vst [vmem:[%s2865_s3 + $0x78] sm:$0xff] %v2243_v20  ;;  %2072 = vst [vmem:[%s2865_s3 + $0x178] sm:$0xff] %v2275_v21  ;;  %v1418_v28 = vadd.f32 %v2540_v47, %v749_v26  ;;  %v1482_v29 = vadd.f32 %v2540_v47, %v909_v27  ;;  %v751_v30 = vpop.f32.mrb[34].mxu0  ;;  %v911_v31 = vpop.f32.mrb[34].mxu1 }
 0x124   :  { %v1545_v32 = vmax.f32 %v1417_v24, 0.0  ;;  %v1609_v33 = vmax.f32 %v1481_v25, 0.0  ;;  %v1419_v34 = vadd.f32 %v2538_v46, %v751_v30  ;;  %v1483_v35 = vadd.f32 %v2538_v46, %v911_v31  ;;  %v753_v36 = vpop.f32.mrb[35].mxu0  ;;  %v913_v37 = vpop.f32.mrb[35].mxu1 }
 0x125   :  { %v1546_v38 = vmax.f32 %v1418_v28, 0.0  ;;  %v1610_v39 = vmax.f32 %v1482_v29, 0.0  ;;  %v1420_v40 = vadd.f32 %v2540_v47, %v753_v36  ;;  %v1484_v41 = vadd.f32 %v2540_v47, %v913_v37 }
 0x126   :  { %v1547_v42 = vmax.f32 %v1419_v34, 0.0  ;;  %v1611_v43 = vmax.f32 %v1483_v35, 0.0 }
 0x127   :  { %v2244_v44 = vpack.c.bf16 %v1546_v38, %v1545_v32  ;;  %v2276_v45 = vpack.c.bf16 %v1610_v39, %v1609_v33  ;;  %v1548_v48 = vmax.f32 %v1420_v40, 0.0  ;;  %v1612_v49 = vmax.f32 %v1484_v41, 0.0 }
 0x129   :  { %2041 = vst [vmem:[%s2865_s3 + $0x80] sm:$0xff] %v2244_v44  ;;  %2073 = vst [vmem:[%s2865_s3 + $0x180] sm:$0xff] %v2276_v45  ;;  %v2245_v50 = vpack.c.bf16 %v1548_v48, %v1547_v42  ;;  %v2277_v51 = vpack.c.bf16 %v1612_v49, %v1611_v43  ;;  %v757_v52 = vpop.f32.mrb[36].mxu0  ;;  %v917_v53 = vpop.f32.mrb[36].mxu1 }
 0x12a   :  { %v1421_v54 = vadd.f32 %v2538_v46, %v757_v52  ;;  %v1485_v55 = vadd.f32 %v2538_v46, %v917_v53  ;;  %v759_v56 = vpop.f32.mrb[37].mxu0  ;;  %v919_v57 = vpop.f32.mrb[37].mxu1 }
 0x12b   :  { %2042 = vst [vmem:[%s2865_s3 + $0x88] sm:$0xff] %v2245_v50  ;;  %2074 = vst [vmem:[%s2865_s3 + $0x188] sm:$0xff] %v2277_v51  ;;  %v1422_v58 = vadd.f32 %v2540_v47, %v759_v56  ;;  %v1486_v59 = vadd.f32 %v2540_v47, %v919_v57  ;;  %v761_v60 = vpop.f32.mrb[38].mxu0  ;;  %v921_v61 = vpop.f32.mrb[38].mxu1 }
 0x12c   :  { %v1549_v62 = vmax.f32 %v1421_v54, 0.0  ;;  %v1613_v63 = vmax.f32 %v1485_v55, 0.0  ;;  %v1423_v0 = vadd.f32 %v2538_v46, %v761_v60  ;;  %v1487_v1 = vadd.f32 %v2538_v46, %v921_v61  ;;  %v763_v2 = vpop.f32.mrb[39].mxu0  ;;  %v923_v3 = vpop.f32.mrb[39].mxu1 }
 0x12d   :  { %v1550_v4 = vmax.f32 %v1422_v58, 0.0  ;;  %v1614_v5 = vmax.f32 %v1486_v59, 0.0  ;;  %v1424_v6 = vadd.f32 %v2540_v47, %v763_v2  ;;  %v1488_v7 = vadd.f32 %v2540_v47, %v923_v3 }
 0x12e   :  { %v1551_v8 = vmax.f32 %v1423_v0, 0.0  ;;  %v1615_v9 = vmax.f32 %v1487_v1, 0.0 }
 0x12f   :  { %v2246_v10 = vpack.c.bf16 %v1550_v4, %v1549_v62  ;;  %v2278_v11 = vpack.c.bf16 %v1614_v5, %v1613_v63  ;;  %v1552_v12 = vmax.f32 %v1424_v6, 0.0  ;;  %v1616_v13 = vmax.f32 %v1488_v7, 0.0 }
 0x131   :  { %2043 = vst [vmem:[%s2865_s3 + $0x90] sm:$0xff] %v2246_v10  ;;  %2075 = vst [vmem:[%s2865_s3 + $0x190] sm:$0xff] %v2278_v11  ;;  %v2247_v14 = vpack.c.bf16 %v1552_v12, %v1551_v8  ;;  %v2279_v15 = vpack.c.bf16 %v1616_v13, %v1615_v9  ;;  %v767_v16 = vpop.f32.mrb[40].mxu0  ;;  %v927_v17 = vpop.f32.mrb[40].mxu1 }
 0x132   :  { %v1425_v18 = vadd.f32 %v2538_v46, %v767_v16  ;;  %v1489_v19 = vadd.f32 %v2538_v46, %v927_v17  ;;  %v769_v20 = vpop.f32.mrb[41].mxu0  ;;  %v929_v21 = vpop.f32.mrb[41].mxu1 }
 0x133   :  { %2044 = vst [vmem:[%s2865_s3 + $0x98] sm:$0xff] %v2247_v14  ;;  %2076 = vst [vmem:[%s2865_s3 + $0x198] sm:$0xff] %v2279_v15  ;;  %v1426_v22 = vadd.f32 %v2540_v47, %v769_v20  ;;  %v1490_v23 = vadd.f32 %v2540_v47, %v929_v21  ;;  %v771_v24 = vpop.f32.mrb[42].mxu0  ;;  %v931_v25 = vpop.f32.mrb[42].mxu1 }
 0x134   :  { %v1553_v26 = vmax.f32 %v1425_v18, 0.0  ;;  %v1617_v27 = vmax.f32 %v1489_v19, 0.0  ;;  %v1427_v28 = vadd.f32 %v2538_v46, %v771_v24  ;;  %v1491_v29 = vadd.f32 %v2538_v46, %v931_v25  ;;  %v773_v30 = vpop.f32.mrb[43].mxu0  ;;  %v933_v31 = vpop.f32.mrb[43].mxu1 }
 0x135   :  { %v1554_v32 = vmax.f32 %v1426_v22, 0.0  ;;  %v1618_v33 = vmax.f32 %v1490_v23, 0.0  ;;  %v1428_v34 = vadd.f32 %v2540_v47, %v773_v30  ;;  %v1492_v35 = vadd.f32 %v2540_v47, %v933_v31 }
 0x136   :  { %v1555_v36 = vmax.f32 %v1427_v28, 0.0  ;;  %v1619_v37 = vmax.f32 %v1491_v29, 0.0 }
 0x137   :  { %v2248_v38 = vpack.c.bf16 %v1554_v32, %v1553_v26  ;;  %v2280_v39 = vpack.c.bf16 %v1618_v33, %v1617_v27  ;;  %v1556_v40 = vmax.f32 %v1428_v34, 0.0  ;;  %v1620_v41 = vmax.f32 %v1492_v35, 0.0 }
 0x139   :  { %2045 = vst [vmem:[%s2865_s3 + $0xa0] sm:$0xff] %v2248_v38  ;;  %2077 = vst [vmem:[%s2865_s3 + $0x1a0] sm:$0xff] %v2280_v39  ;;  %v2249_v42 = vpack.c.bf16 %v1556_v40, %v1555_v36  ;;  %v2281_v43 = vpack.c.bf16 %v1620_v41, %v1619_v37  ;;  %v777_v44 = vpop.f32.mrb[44].mxu0  ;;  %v937_v45 = vpop.f32.mrb[44].mxu1 }
 0x13a   :  { %v1429_v48 = vadd.f32 %v2538_v46, %v777_v44  ;;  %v1493_v49 = vadd.f32 %v2538_v46, %v937_v45  ;;  %v779_v50 = vpop.f32.mrb[45].mxu0  ;;  %v939_v51 = vpop.f32.mrb[45].mxu1 }
 0x13b   :  { %2046 = vst [vmem:[%s2865_s3 + $0xa8] sm:$0xff] %v2249_v42  ;;  %2078 = vst [vmem:[%s2865_s3 + $0x1a8] sm:$0xff] %v2281_v43  ;;  %v1430_v52 = vadd.f32 %v2540_v47, %v779_v50  ;;  %v1494_v53 = vadd.f32 %v2540_v47, %v939_v51  ;;  %v781_v54 = vpop.f32.mrb[46].mxu0  ;;  %v941_v55 = vpop.f32.mrb[46].mxu1 }
 0x13c   :  { %v1557_v56 = vmax.f32 %v1429_v48, 0.0  ;;  %v1621_v57 = vmax.f32 %v1493_v49, 0.0  ;;  %v1431_v58 = vadd.f32 %v2538_v46, %v781_v54  ;;  %v1495_v59 = vadd.f32 %v2538_v46, %v941_v55  ;;  %v783_v60 = vpop.f32.mrb[47].mxu0  ;;  %v943_v61 = vpop.f32.mrb[47].mxu1 }
 0x13d   :  { %v1558_v62 = vmax.f32 %v1430_v52, 0.0  ;;  %v1622_v63 = vmax.f32 %v1494_v53, 0.0  ;;  %v1432_v0 = vadd.f32 %v2540_v47, %v783_v60  ;;  %v1496_v1 = vadd.f32 %v2540_v47, %v943_v61 }
 0x13e   :  { %v1559_v2 = vmax.f32 %v1431_v58, 0.0  ;;  %v1623_v3 = vmax.f32 %v1495_v59, 0.0 }
 0x13f   :  { %v2250_v4 = vpack.c.bf16 %v1558_v62, %v1557_v56  ;;  %v2282_v5 = vpack.c.bf16 %v1622_v63, %v1621_v57  ;;  %v1560_v6 = vmax.f32 %v1432_v0, 0.0  ;;  %v1624_v7 = vmax.f32 %v1496_v1, 0.0 }
 0x141   :  { %2047 = vst [vmem:[%s2865_s3 + $0xb0] sm:$0xff] %v2250_v4  ;;  %2079 = vst [vmem:[%s2865_s3 + $0x1b0] sm:$0xff] %v2282_v5  ;;  %v2251_v8 = vpack.c.bf16 %v1560_v6, %v1559_v2  ;;  %v2283_v9 = vpack.c.bf16 %v1624_v7, %v1623_v3  ;;  %v787_v10 = vpop.f32.mrb[48].mxu0  ;;  %v947_v11 = vpop.f32.mrb[48].mxu1 }
 0x142   :  { %v1433_v12 = vadd.f32 %v2538_v46, %v787_v10  ;;  %v1497_v13 = vadd.f32 %v2538_v46, %v947_v11  ;;  %v789_v14 = vpop.f32.mrb[49].mxu0  ;;  %v949_v15 = vpop.f32.mrb[49].mxu1 }
 0x143   :  { %2048 = vst [vmem:[%s2865_s3 + $0xb8] sm:$0xff] %v2251_v8  ;;  %2080 = vst [vmem:[%s2865_s3 + $0x1b8] sm:$0xff] %v2283_v9  ;;  %v1434_v16 = vadd.f32 %v2540_v47, %v789_v14  ;;  %v1498_v17 = vadd.f32 %v2540_v47, %v949_v15  ;;  %v791_v18 = vpop.f32.mrb[50].mxu0  ;;  %v951_v19 = vpop.f32.mrb[50].mxu1 }
 0x144   :  { %v1561_v20 = vmax.f32 %v1433_v12, 0.0  ;;  %v1625_v21 = vmax.f32 %v1497_v13, 0.0  ;;  %v1435_v22 = vadd.f32 %v2538_v46, %v791_v18  ;;  %v1499_v23 = vadd.f32 %v2538_v46, %v951_v19  ;;  %v793_v24 = vpop.f32.mrb[51].mxu0  ;;  %v953_v25 = vpop.f32.mrb[51].mxu1 }
 0x145   :  { %v1562_v26 = vmax.f32 %v1434_v16, 0.0  ;;  %v1626_v27 = vmax.f32 %v1498_v17, 0.0  ;;  %v1436_v28 = vadd.f32 %v2540_v47, %v793_v24  ;;  %v1500_v29 = vadd.f32 %v2540_v47, %v953_v25 }
 0x146   :  { %v1563_v30 = vmax.f32 %v1435_v22, 0.0  ;;  %v1627_v31 = vmax.f32 %v1499_v23, 0.0 }
 0x147   :  { %v2252_v32 = vpack.c.bf16 %v1562_v26, %v1561_v20  ;;  %v2284_v33 = vpack.c.bf16 %v1626_v27, %v1625_v21  ;;  %v1564_v34 = vmax.f32 %v1436_v28, 0.0  ;;  %v1628_v35 = vmax.f32 %v1500_v29, 0.0 }
 0x149   :  { %2049 = vst [vmem:[%s2865_s3 + $0xc0] sm:$0xff] %v2252_v32  ;;  %2081 = vst [vmem:[%s2865_s3 + $0x1c0] sm:$0xff] %v2284_v33  ;;  %v2253_v36 = vpack.c.bf16 %v1564_v34, %v1563_v30  ;;  %v2285_v37 = vpack.c.bf16 %v1628_v35, %v1627_v31  ;;  %v797_v38 = vpop.f32.mrb[52].mxu0  ;;  %v957_v39 = vpop.f32.mrb[52].mxu1 }
 0x14a   :  { %v1437_v40 = vadd.f32 %v2538_v46, %v797_v38  ;;  %v1501_v41 = vadd.f32 %v2538_v46, %v957_v39  ;;  %v799_v42 = vpop.f32.mrb[53].mxu0  ;;  %v959_v43 = vpop.f32.mrb[53].mxu1 }
 0x14b   :  { %2050 = vst [vmem:[%s2865_s3 + $0xc8] sm:$0xff] %v2253_v36  ;;  %2082 = vst [vmem:[%s2865_s3 + $0x1c8] sm:$0xff] %v2285_v37  ;;  %v1438_v44 = vadd.f32 %v2540_v47, %v799_v42  ;;  %v1502_v45 = vadd.f32 %v2540_v47, %v959_v43  ;;  %v801_v48 = vpop.f32.mrb[54].mxu0  ;;  %v961_v49 = vpop.f32.mrb[54].mxu1 }
 0x14c   :  { %v1565_v50 = vmax.f32 %v1437_v40, 0.0  ;;  %v1629_v51 = vmax.f32 %v1501_v41, 0.0  ;;  %v1439_v52 = vadd.f32 %v2538_v46, %v801_v48  ;;  %v1503_v53 = vadd.f32 %v2538_v46, %v961_v49  ;;  %v803_v54 = vpop.f32.mrb[55].mxu0  ;;  %v963_v55 = vpop.f32.mrb[55].mxu1 }
 0x14d   :  { %v1566_v56 = vmax.f32 %v1438_v44, 0.0  ;;  %v1630_v57 = vmax.f32 %v1502_v45, 0.0  ;;  %v1440_v58 = vadd.f32 %v2540_v47, %v803_v54  ;;  %v1504_v59 = vadd.f32 %v2540_v47, %v963_v55 }
 0x14e   :  { %v1567_v60 = vmax.f32 %v1439_v52, 0.0  ;;  %v1631_v61 = vmax.f32 %v1503_v53, 0.0 }
 0x14f   :  { %v2254_v62 = vpack.c.bf16 %v1566_v56, %v1565_v50  ;;  %v2286_v63 = vpack.c.bf16 %v1630_v57, %v1629_v51  ;;  %v1568_v0 = vmax.f32 %v1440_v58, 0.0  ;;  %v1632_v1 = vmax.f32 %v1504_v59, 0.0 }
 0x151   :  { %2051 = vst [vmem:[%s2865_s3 + $0xd0] sm:$0xff] %v2254_v62  ;;  %2083 = vst [vmem:[%s2865_s3 + $0x1d0] sm:$0xff] %v2286_v63  ;;  %v2255_v2 = vpack.c.bf16 %v1568_v0, %v1567_v60  ;;  %v2287_v3 = vpack.c.bf16 %v1632_v1, %v1631_v61  ;;  %v807_v4 = vpop.f32.mrb[56].mxu0  ;;  %v967_v5 = vpop.f32.mrb[56].mxu1 }
 0x152   :  { %v1441_v6 = vadd.f32 %v2538_v46, %v807_v4  ;;  %v1505_v7 = vadd.f32 %v2538_v46, %v967_v5  ;;  %v809_v8 = vpop.f32.mrb[57].mxu0  ;;  %v969_v9 = vpop.f32.mrb[57].mxu1 }
 0x153   :  { %2052 = vst [vmem:[%s2865_s3 + $0xd8] sm:$0xff] %v2255_v2  ;;  %2084 = vst [vmem:[%s2865_s3 + $0x1d8] sm:$0xff] %v2287_v3  ;;  %v1442_v10 = vadd.f32 %v2540_v47, %v809_v8  ;;  %v1506_v11 = vadd.f32 %v2540_v47, %v969_v9  ;;  %v811_v12 = vpop.f32.mrb[58].mxu0  ;;  %v971_v13 = vpop.f32.mrb[58].mxu1 }
 0x154   :  { %v1569_v14 = vmax.f32 %v1441_v6, 0.0  ;;  %v1633_v15 = vmax.f32 %v1505_v7, 0.0  ;;  %v1443_v16 = vadd.f32 %v2538_v46, %v811_v12  ;;  %v1507_v17 = vadd.f32 %v2538_v46, %v971_v13  ;;  %v813_v18 = vpop.f32.mrb[59].mxu0  ;;  %v973_v19 = vpop.f32.mrb[59].mxu1 }
 0x155   :  { %v1570_v20 = vmax.f32 %v1442_v10, 0.0  ;;  %v1634_v21 = vmax.f32 %v1506_v11, 0.0  ;;  %v1444_v22 = vadd.f32 %v2540_v47, %v813_v18  ;;  %v1508_v23 = vadd.f32 %v2540_v47, %v973_v19 }
 0x156   :  { %v1571_v24 = vmax.f32 %v1443_v16, 0.0  ;;  %v1635_v25 = vmax.f32 %v1507_v17, 0.0 }
 0x157   :  { %v2256_v26 = vpack.c.bf16 %v1570_v20, %v1569_v14  ;;  %v2288_v27 = vpack.c.bf16 %v1634_v21, %v1633_v15  ;;  %v1572_v28 = vmax.f32 %v1444_v22, 0.0  ;;  %v1636_v29 = vmax.f32 %v1508_v23, 0.0 }
 0x159   :  { %2053 = vst [vmem:[%s2865_s3 + $0xe0] sm:$0xff] %v2256_v26  ;;  %2085 = vst [vmem:[%s2865_s3 + $0x1e0] sm:$0xff] %v2288_v27  ;;  %v2257_v30 = vpack.c.bf16 %v1572_v28, %v1571_v24  ;;  %v2289_v31 = vpack.c.bf16 %v1636_v29, %v1635_v25  ;;  %v817_v32 = vpop.f32.mrb[60].mxu0  ;;  %v977_v33 = vpop.f32.mrb[60].mxu1 }
 0x15a   :  { %v1445_v34 = vadd.f32 %v2538_v46, %v817_v32  ;;  %v1509_v35 = vadd.f32 %v2538_v46, %v977_v33  ;;  %v819_v36 = vpop.f32.mrb[61].mxu0  ;;  %v979_v37 = vpop.f32.mrb[61].mxu1 }
 0x15b   :  { %2054 = vst [vmem:[%s2865_s3 + $0xe8] sm:$0xff] %v2257_v30  ;;  %2086 = vst [vmem:[%s2865_s3 + $0x1e8] sm:$0xff] %v2289_v31  ;;  %v1446_v38 = vadd.f32 %v2540_v47, %v819_v36  ;;  %v1510_v39 = vadd.f32 %v2540_v47, %v979_v37  ;;  %v821_v40 = vpop.f32.mrb[62].mxu0  ;;  %v981_v41 = vpop.f32.mrb[62].mxu1 }
 0x15c   :  { %v1573_v42 = vmax.f32 %v1445_v34, 0.0  ;;  %v1637_v43 = vmax.f32 %v1509_v35, 0.0  ;;  %v1447_v44 = vadd.f32 %v2538_v46, %v821_v40  ;;  %v1511_v45 = vadd.f32 %v2538_v46, %v981_v41  ;;  %v823_v48 = vpop.f32.mrb[63].mxu0  ;;  %v983_v49 = vpop.f32.mrb[63].mxu1 }
 0x15d   :  { %v1574_v50 = vmax.f32 %v1446_v38, 0.0  ;;  %v1638_v51 = vmax.f32 %v1510_v39, 0.0  ;;  %v1448_v52 = vadd.f32 %v2540_v47, %v823_v48  ;;  %v1512_v53 = vadd.f32 %v2540_v47, %v983_v49 }
 0x15e   :  { %v1575_v54 = vmax.f32 %v1447_v44, 0.0  ;;  %v1639_v55 = vmax.f32 %v1511_v45, 0.0 }
 0x15f   :  { %v2258_v56 = vpack.c.bf16 %v1574_v50, %v1573_v42  ;;  %v2290_v57 = vpack.c.bf16 %v1638_v51, %v1637_v43  ;;  %v1576_v58 = vmax.f32 %v1448_v52, 0.0  ;;  %v1640_v59 = vmax.f32 %v1512_v53, 0.0 }
 0x161   :  { %2055 = vst [vmem:[%s2865_s3 + $0xf0] sm:$0xff] %v2258_v56  ;;  %2087 = vst [vmem:[%s2865_s3 + $0x1f0] sm:$0xff] %v2290_v57  ;;  %v2259_v46 = vpack.c.bf16 %v1576_v58, %v1575_v54  ;;  %v2291_v60 = vpack.c.bf16 %v1640_v59, %v1639_v55 }
 0x163   :  { %2056 = vst [vmem:[%s2865_s3 + $0xf8] sm:$0xff] %v2259_v46  ;;  %2088 = vst [vmem:[%s2865_s3 + $0x1f8] sm:$0xff] %v2291_v60 }

// kernel: aspp_forward.11
= control target key start
LH: loop header
LB: loop body
LE: loop exit
PB: predicated region body
PF: predicated region fallthrough
CT: control target
= control target key end

     0   :  { %11 = vsyncpa [#allocation3], 0  ;;  %s5159_s0 = inlined_call_operand.vmem [shape: bf16[2,256,256], index: 0, kind: input, shape index: {}]   ;;  %s5160_s1 = inlined_call_operand.vmem [shape: bf16[2,256,256], index: 1, kind: input, shape index: {}]   ;;  %s5161_s2 = inlined_call_operand.vmem [shape: bf16[2,256,256], index: 2, kind: input, shape index: {}]   ;;  %s5162_s3 = inlined_call_operand.vmem [shape: bf16[2,256,256], index: 3, kind: input, shape index: {}]   ;;  %s5163_s4 = inlined_call_operand.vmem [shape: bf16[4,256,256], index: 4, kind: input, shape index: {}]   ;;  %s5164_s5 = inlined_call_operand.vmem [shape: f32[2,1,256], index: 5, kind: input, shape index: {}]   ;;  %s5165_s6 = inlined_call_operand.hbm [shape: f32[2,256,256], index: 6, kind: output, shape index: {}]  }
   0x1   :  { %13 = vsyncpa [#allocation3 + $0x1], 0  ;;  %s4363_s21 = smov 0   ;;  %s4365_s22 = smov 0  }
   0x2   :  { %s4367_s23 = smov 0   ;;  %s4369_s24 = smov 0  }
   0x3   :  { %s4371_s25 = smov 0   ;;  %s4373_s26 = smov 0  }
   0x4 LB: > { %s3235_s27 = sadd.s32 4294967295, %s4323_s26   ;;  %s3236_s28 = sadd.s32 4294967294, %s4323_s26   ;;  %s4323_s26 = sphi %s4373_s26, %s19_s26   ;;  %s4319_s25 = sphi %s4371_s25, %s5172_s25   ;;  %s4315_s24 = sphi %s4369_s24, %s5171_s24   ;;  %s4311_s23 = sphi %s4367_s23, %s5170_s23   ;;  %s4307_s22 = sphi %s4365_s22, %s5169_s22   ;;  %s4303_s21 = sphi %s4363_s21, %s5168_s21  }
   0x5   : > { %s31_s29 = sadd.s32 1, %s4319_s25  ;;  %s199_s30 = sadd.s32 1, %s4311_s23 }
   0x6   : > { %p33_p0 = scmp.ge.s32.totalorder %s31_s29, 2  ;;  %p209_p1 = scmp.ne.s32.totalorder %s4311_s23, %s4307_s22 }
   0x7   : > { %p210_p2 = scmp.eq.s32.totalorder %s3235_s27, 1  ;;  %p215_p3 = scmp.ne.s32.totalorder %s4307_s22, %s4303_s21 }
   0x8   : > { %s5174_s29 = smov (%p33_p0, %s31_s29), 0  ;;  %p216_p5 = scmp.eq.s32.totalorder %s3236_s28, 1 }
   0x9   : > { %p4403_p4 = por %p210_p2, %p209_p1  ;;  %s194_s8 = ssub.s32 %s4319_s25, %s5174_s29 }
   0xa   : > { %p3239_p6 = scmp.ge.s32.totalorder %s4323_s26, 1  ;;  %p197_p7 = scmp.eq.s32.totalorder %s194_s8, 0 }
   0xb   : > { %p4410_p8 = por %p216_p5, %p215_p3  ;;  %p300_p9 = scmp.lt.s32.totalorder %s4323_s26, 3 }
   0xc   : > { %s4416_s10 = scalar_select %p197_p7, %s4311_s23, %s199_s30  }
   0xd   : > { %p301_p10 = pnand %p3239_p6, %p300_p9 }
   0xe   : > { %v3861_v0 = vld [vmem:[%s5163_s4 + $0x104] ss:$8 sps:$4 sm:$0xff] (!%p301_p10)   ;;  %v3865_v2 = vld [vmem:[%s5163_s4 + $0x100] ss:$8 sps:$4 sm:$0xff] (!%p301_p10)   ;;  %v3867_v4 = vld [vmem:[%s5163_s4 + $0x114] ss:$8 sps:$4 sm:$0xff] (!%p301_p10)  }
   0xf   : > { %304 = sbr.rel (%p301_p10) target bundleno = 564 (0x234), region = 44  ;;  %v3863_v1 = vld [vmem:[%s5163_s4 + $0x204] ss:$8 sps:$4 sm:$0xff] (!%p301_p10)   ;;  %867 = vmatprep.subr.bf16.mxu1 (!%p301_p10), %v3861_v0  ;;  %v3866_v3 = vld [vmem:[%s5163_s4 + $0x200] ss:$8 sps:$4 sm:$0xff] (!%p301_p10)   ;;  %p370_p11 = scmp.lt.s32.totalorder (!%p301_p10), %s4315_s24, 1 }
  0x10   : > { %1958 = vmatprep.subr.bf16.mxu0 (!%p301_p10), %v3863_v1  ;;  %868 = vmatpush1.bf16.msra.mxu1 (!%p301_p10), %v3865_v2  ;;  %v3869_v5 = vld [vmem:[%s5163_s4 + $0x214] ss:$8 sps:$4 sm:$0xff] (!%p301_p10)   ;;  %v3871_v6 = vld [vmem:[%s5163_s4 + $0x110] ss:$8 sps:$4 sm:$0xff] (!%p301_p10)   ;;  %v3873_v8 = vld [vmem:[%s5163_s4 + $0x124] ss:$8 sps:$4 sm:$0xff] (!%p301_p10)  }
  0x11   : > { %1959 = vmatpush1.bf16.msra.mxu0 (!%p301_p10), %v3866_v3  ;;  %869 = vmatprep.subr.bf16.mxu1 (!%p301_p10), %v3867_v4  ;;  %v3872_v7 = vld [vmem:[%s5163_s4 + $0x210] ss:$8 sps:$4 sm:$0xff] (!%p301_p10)   ;;  %v3875_v9 = vld [vmem:[%s5163_s4 + $0x224] ss:$8 sps:$4 sm:$0xff] (!%p301_p10)   ;;  %v3877_v10 = vld [vmem:[%s5163_s4 + $0x120] ss:$8 sps:$4 sm:$0xff] (!%p301_p10)  }
  0x12   : > { %1960 = vmatprep.subr.bf16.mxu0 (!%p301_p10), %v3869_v5  ;;  %v3878_v11 = vld [vmem:[%s5163_s4 + $0x220] ss:$8 sps:$4 sm:$0xff] (!%p301_p10)   ;;  %v3879_v12 = vld [vmem:[%s5163_s4 + $0x134] ss:$8 sps:$4 sm:$0xff] (!%p301_p10)   ;;  %v3883_v14 = vld [vmem:[%s5163_s4 + $0x130] ss:$8 sps:$4 sm:$0xff] (!%p301_p10)  }
  0x13   : > { %v3881_v13 = vld [vmem:[%s5163_s4 + $0x234] ss:$8 sps:$4 sm:$0xff] (!%p301_p10)   ;;  %v3884_v15 = vld [vmem:[%s5163_s4 + $0x230] ss:$8 sps:$4 sm:$0xff] (!%p301_p10)   ;;  %v3885_v16 = vld [vmem:[%s5163_s4 + $0x144] ss:$8 sps:$4 sm:$0xff] (!%p301_p10)  }
  0x14   : > { %870 = vmatpush1.bf16.msra.mxu1 (!%p301_p10), %v3871_v6  ;;  %v3887_v17 = vld [vmem:[%s5163_s4 + $0x244] ss:$8 sps:$4 sm:$0xff] (!%p301_p10)   ;;  %v3889_v18 = vld [vmem:[%s5163_s4 + $0x140] ss:$8 sps:$4 sm:$0xff] (!%p301_p10)   ;;  %v3891_v20 = vld [vmem:[%s5163_s4 + $0x154] ss:$8 sps:$4 sm:$0xff] (!%p301_p10)  }
  0x15   : > { %1961 = vmatpush1.bf16.msra.mxu0 (!%p301_p10), %v3872_v7  ;;  %871 = vmatprep.subr.bf16.mxu1 (!%p301_p10), %v3873_v8  ;;  %v3890_v19 = vld [vmem:[%s5163_s4 + $0x240] ss:$8 sps:$4 sm:$0xff] (!%p301_p10)   ;;  %v3893_v21 = vld [vmem:[%s5163_s4 + $0x254] ss:$8 sps:$4 sm:$0xff] (!%p301_p10)   ;;  %v3895_v22 = vld [vmem:[%s5163_s4 + $0x150] ss:$8 sps:$4 sm:$0xff] (!%p301_p10)  }
  0x16   : > { %1962 = vmatprep.subr.bf16.mxu0 %v3875_v9  ;;  %v3896_v23 = vld [vmem:[%s5163_s4 + $0x250] ss:$8 sps:$4 sm:$0xff]   ;;  %v3897_v24 = vld [vmem:[%s5163_s4 + $0x164] ss:$8 sps:$4 sm:$0xff]   ;;  %v3901_v26 = vld [vmem:[%s5163_s4 + $0x160] ss:$8 sps:$4 sm:$0xff]  }
  0x17   : > { %v3899_v25 = vld [vmem:[%s5163_s4 + $0x264] ss:$8 sps:$4 sm:$0xff]   ;;  %v3902_v27 = vld [vmem:[%s5163_s4 + $0x260] ss:$8 sps:$4 sm:$0xff]   ;;  %v3903_v28 = vld [vmem:[%s5163_s4 + $0x174] ss:$8 sps:$4 sm:$0xff]  }
  0x18   : > { %872 = vmatpush1.bf16.msra.mxu1 %v3877_v10  ;;  %v3905_v29 = vld [vmem:[%s5163_s4 + $0x274] ss:$8 sps:$4 sm:$0xff]   ;;  %v3907_v30 = vld [vmem:[%s5163_s4 + $0x170] ss:$8 sps:$4 sm:$0xff]   ;;  %v3909_v32 = vld [vmem:[%s5163_s4 + $0x184] ss:$8 sps:$4 sm:$0xff]  }
  0x19   : > { %1963 = vmatpush1.bf16.msra.mxu0 %v3878_v11  ;;  %873 = vmatprep.subr.bf16.mxu1 %v3879_v12  ;;  %v3908_v31 = vld [vmem:[%s5163_s4 + $0x270] ss:$8 sps:$4 sm:$0xff]   ;;  %v3911_v33 = vld [vmem:[%s5163_s4 + $0x284] ss:$8 sps:$4 sm:$0xff]   ;;  %v3913_v34 = vld [vmem:[%s5163_s4 + $0x180] ss:$8 sps:$4 sm:$0xff]  }
  0x1a   : > { %1964 = vmatprep.subr.bf16.mxu0 %v3881_v13  ;;  %v3914_v35 = vld [vmem:[%s5163_s4 + $0x280] ss:$8 sps:$4 sm:$0xff]   ;;  %v3915_v36 = vld [vmem:[%s5163_s4 + $0x194] ss:$8 sps:$4 sm:$0xff]   ;;  %s4534_s17 = scalar_select %p370_p11, %s4315_s24, 1 }
  0x1b   : > { %v3917_v37 = vld [vmem:[%s5163_s4 + $0x294] ss:$8 sps:$4 sm:$0xff]   ;;  %v3919_v38 = vld [vmem:[%s5163_s4 + $0x190] ss:$8 sps:$4 sm:$0xff]   ;;  %v3921_v40 = vld [vmem:[%s5163_s4 + $0x1a4] ss:$8 sps:$4 sm:$0xff]  }
  0x1c   : > { %874 = vmatpush1.bf16.msra.mxu1 %v3883_v14  ;;  %v3920_v39 = vld [vmem:[%s5163_s4 + $0x290] ss:$8 sps:$4 sm:$0xff]   ;;  %v3923_v41 = vld [vmem:[%s5163_s4 + $0x2a4] ss:$8 sps:$4 sm:$0xff]   ;;  %s4549_s12 = sshll.u32 %s4534_s17, 8  ;;  %s366_s15 = sand.u32 1, %s4307_s22  }
  0x1d   : > { %1965 = vmatpush1.bf16.msra.mxu0 %v3884_v15  ;;  %875 = vmatprep.subr.bf16.mxu1 %v3885_v16  ;;  %v3925_v42 = vld [vmem:[%s5163_s4 + $0x1a0] ss:$8 sps:$4 sm:$0xff]   ;;  %v3927_v44 = vld [vmem:[%s5163_s4 + $0x1b4] ss:$8 sps:$4 sm:$0xff]   ;;  %s4564_s28 = scalar_lea.vmem %s5160_s1, %s4549_s12  ;;  %v3931_v46 = vld [vmem:[%s5163_s4 + $0x1b0] ss:$8 sps:$4 sm:$0xff]   ;;  %s4576_s16 = scalar_lea.vmem %s5161_s2, %s4549_s12 }
  0x1e   : > { %1966 = vmatprep.subr.bf16.mxu0 %v3887_v17  ;;  %v3926_v43 = vld [vmem:[%s5163_s4 + $0x2a0] ss:$8 sps:$4 sm:$0xff]   ;;  %v3929_v45 = vld [vmem:[%s5163_s4 + $0x2b4] ss:$8 sps:$4 sm:$0xff]   ;;  %v3932_v47 = vld [vmem:[%s5163_s4 + $0x2b0] ss:$8 sps:$4 sm:$0xff]   ;;  %s4857_s18 = scalar_lea.vmem %s5159_s0, %s4549_s12  ;;  %s4866_s8 = scalar_lea.vmem %s5162_s3, %s4549_s12 }
  0x1f   : > { %v3959_v48 = vld [vmem:[%s4564_s28 + $0x4] ss:$8 sps:$4 sm:$0xff]   ;;  %v3937_v52 = vld [vmem:[%s5163_s4 + $0x1c0] ss:$8 sps:$4 sm:$0xff]   ;;  %v3939_v54 = vld [vmem:[%s5163_s4 + $0x1d4] ss:$8 sps:$4 sm:$0xff]  }
  0x20   : > { %876 = vmatpush1.bf16.msra.mxu1 %v3889_v18  ;;  %v3933_v49 = vld [vmem:[%s5163_s4 + $0x1c4] ss:$8 sps:$4 sm:$0xff]   ;;  %899 = vmatprep.mubr.bf16.mxu1 %v3959_v48  ;;  %v3938_v53 = vld [vmem:[%s5163_s4 + $0x2c0] ss:$8 sps:$4 sm:$0xff]   ;;  %v3941_v55 = vld [vmem:[%s5163_s4 + $0x2d4] ss:$8 sps:$4 sm:$0xff]  }
  0x21   : > { %1967 = vmatpush1.bf16.msra.mxu0 %v3890_v19  ;;  %877 = vmatprep.subr.bf16.mxu1 %v3891_v20  ;;  %v3935_v50 = vld [vmem:[%s5163_s4 + $0x2c4] ss:$8 sps:$4 sm:$0xff]   ;;  %v3943_v56 = vld [vmem:[%s5163_s4 + $0x1d0] ss:$8 sps:$4 sm:$0xff]   ;;  %v3949_v60 = vld [vmem:[%s5163_s4 + $0x1e0] ss:$8 sps:$4 sm:$0xff]  }
  0x22   : > { %1968 = vmatprep.subr.bf16.mxu0 %v3893_v21  ;;  %v3962_v51 = vld [vmem:[%s4576_s16 + $0x4] ss:$8 sps:$4 sm:$0xff]   ;;  %v3944_v57 = vld [vmem:[%s5163_s4 + $0x2d0] ss:$8 sps:$4 sm:$0xff]   ;;  %v3950_v61 = vld [vmem:[%s5163_s4 + $0x2e0] ss:$8 sps:$4 sm:$0xff]  }
  0x23   : > { %1990 = vmatprep.mubr.bf16.mxu0 %v3962_v51  ;;  %v3945_v58 = vld [vmem:[%s5163_s4 + $0x1e4] ss:$8 sps:$4 sm:$0xff]   ;;  %v3951_v62 = vld [vmem:[%s5163_s4 + $0x1f4] ss:$8 sps:$4 sm:$0xff]   ;;  %v3955_v0 = vld [vmem:[%s5163_s4 + $0x1f0] ss:$8 sps:$4 sm:$0xff]  }
  0x24   : > { %878 = vmatpush1.bf16.msra.mxu1 %v3895_v22  ;;  %v3947_v59 = vld [vmem:[%s5163_s4 + $0x2e4] ss:$8 sps:$4 sm:$0xff]   ;;  %v3953_v63 = vld [vmem:[%s5163_s4 + $0x2f4] ss:$8 sps:$4 sm:$0xff]   ;;  %v3956_v1 = vld [vmem:[%s5163_s4 + $0x2f0] ss:$8 sps:$4 sm:$0xff]  }
  0x25   : > { %1969 = vmatpush1.bf16.msra.mxu0 %v3896_v23  ;;  %879 = vmatprep.subr.bf16.mxu1 %v3897_v24  ;;  %v3965_v2 = vld [vmem:[%s5163_s4 + $0x4] ss:$8 sps:$4 sm:$0xff]   ;;  %v3957_v4 = vld [vmem:[%s4564_s28] ss:$8 sps:$4 sm:$0xff]   ;;  %v3969_v8 = vld [vmem:[%s4564_s28 + $0x14] ss:$8 sps:$4 sm:$0xff]  }
  0x26   : > { %1970 = vmatprep.subr.bf16.mxu0 %v3899_v25  ;;  %v3968_v3 = vld [vmem:[%s5163_s4 + $0x304] ss:$8 sps:$4 sm:$0xff]   ;;  %v3960_v5 = vld [vmem:[%s4576_s16] ss:$8 sps:$4 sm:$0xff]   ;;  %v3971_v9 = vld [vmem:[%s4576_s16 + $0x14] ss:$8 sps:$4 sm:$0xff]  }
  0x27   : > { %v3963_v6 = vld [vmem:[%s5163_s4] ss:$8 sps:$4 sm:$0xff]   ;;  %v3976_v10 = vld [vmem:[%s5163_s4 + $0x14] ss:$8 sps:$4 sm:$0xff]   ;;  %v3974_v12 = vld [vmem:[%s5163_s4 + $0x10] ss:$8 sps:$4 sm:$0xff]  }
  0x28   : > { %880 = vmatpush1.bf16.msra.mxu1 %v3901_v26  ;;  %v3966_v7 = vld [vmem:[%s5163_s4 + $0x300] ss:$8 sps:$4 sm:$0xff]   ;;  %v3980_v11 = vld [vmem:[%s5163_s4 + $0x314] ss:$8 sps:$4 sm:$0xff]   ;;  %v3978_v13 = vld [vmem:[%s5163_s4 + $0x310] ss:$8 sps:$4 sm:$0xff]  }
  0x29   : > { %1971 = vmatpush1.bf16.msra.mxu0 %v3902_v27  ;;  %881 = vmatprep.subr.bf16.mxu1 %v3903_v28  ;;  %v3988_v14 = vld [vmem:[%s5163_s4 + $0x24] ss:$8 sps:$4 sm:$0xff]   ;;  %v3973_v16 = vld [vmem:[%s4564_s28 + $0x10] ss:$8 sps:$4 sm:$0xff]   ;;  %v3986_v20 = vld [vmem:[%s5163_s4 + $0x20] ss:$8 sps:$4 sm:$0xff]  }
  0x2a   : > { %1972 = vmatprep.subr.bf16.mxu0 %v3905_v29  ;;  %v3992_v15 = vld [vmem:[%s5163_s4 + $0x324] ss:$8 sps:$4 sm:$0xff]   ;;  %v3977_v17 = vld [vmem:[%s4576_s16 + $0x10] ss:$8 sps:$4 sm:$0xff]   ;;  %v3990_v21 = vld [vmem:[%s5163_s4 + $0x320] ss:$8 sps:$4 sm:$0xff]  }
  0x2b   : > { %v3981_v18 = vld [vmem:[%s4564_s28 + $0x24] ss:$8 sps:$4 sm:$0xff]   ;;  %v4000_v22 = vld [vmem:[%s5163_s4 + $0x34] ss:$8 sps:$4 sm:$0xff]   ;;  %v3998_v24 = vld [vmem:[%s5163_s4 + $0x30] ss:$8 sps:$4 sm:$0xff]  }
  0x2c   : > { %882 = vmatpush1.bf16.msra.mxu1 %v3907_v30  ;;  %v3983_v19 = vld [vmem:[%s4576_s16 + $0x24] ss:$8 sps:$4 sm:$0xff]   ;;  %v4004_v23 = vld [vmem:[%s5163_s4 + $0x334] ss:$8 sps:$4 sm:$0xff]   ;;  %v3985_v25 = vld [vmem:[%s4564_s28 + $0x20] ss:$8 sps:$4 sm:$0xff]  }
  0x2d   : > { %1973 = vmatpush1.bf16.msra.mxu0 %v3908_v31  ;;  %883 = vmatprep.subr.bf16.mxu1 %v3909_v32  ;;  %v3989_v26 = vld [vmem:[%s4576_s16 + $0x20] ss:$8 sps:$4 sm:$0xff]   ;;  %v4002_v27 = vld [vmem:[%s5163_s4 + $0x330] ss:$8 sps:$4 sm:$0xff]   ;;  %v3993_v28 = vld [vmem:[%s4564_s28 + $0x34] ss:$8 sps:$4 sm:$0xff]  }
  0x2e   : > { %1974 = vmatprep.subr.bf16.mxu0 %v3911_v33  ;;  %v4012_v29 = vld [vmem:[%s5163_s4 + $0x44] ss:$8 sps:$4 sm:$0xff]   ;;  %v3995_v31 = vld [vmem:[%s4576_s16 + $0x34] ss:$8 sps:$4 sm:$0xff]   ;;  %v4010_v32 = vld [vmem:[%s5163_s4 + $0x40] ss:$8 sps:$4 sm:$0xff]  }
  0x2f   : > { %v4016_v30 = vld [vmem:[%s5163_s4 + $0x344] ss:$8 sps:$4 sm:$0xff]   ;;  %v4014_v33 = vld [vmem:[%s5163_s4 + $0x340] ss:$8 sps:$4 sm:$0xff]   ;;  %v4046_v48 = vld [vmem:[%s5163_s4 + $0x70] ss:$8 sps:$4 sm:$0xff]  }
  0x30   : > { %884 = vmatpush1.bf16.msra.mxu1 %v3913_v34  ;;  %v4024_v34 = vld [vmem:[%s5163_s4 + $0x54] ss:$8 sps:$4 sm:$0xff]   ;;  %v4050_v51 = vld [vmem:[%s5163_s4 + $0x370] ss:$8 sps:$4 sm:$0xff]   ;;  %s3249_s12 = sshll.u32 %s4534_s17, 1  ;;  %s3611_s19 = sshll.u32 %s4315_s24, 13 }
  0x31   : > { %1975 = vmatpush1.bf16.msra.mxu0 %v3914_v35  ;;  %885 = vmatprep.subr.bf16.mxu1 %v3915_v36  ;;  %v4028_v35 = vld [vmem:[%s5163_s4 + $0x354] ss:$8 sps:$4 sm:$0xff]   ;;  %v4022_v36 = vld [vmem:[%s5163_s4 + $0x50] ss:$8 sps:$4 sm:$0xff]   ;;  %s416_s14 = scalar_lea.vmem %s5164_s5, %s3249_s12  ;;  %s5113_s24 = scalar_lea.sflag [#allocation3], %s366_s15 }
  0x32   : > { %1976 = vmatprep.subr.bf16.mxu0 %v3917_v37  ;;  %v3997_v37 = vld [vmem:[%s4564_s28 + $0x30] ss:$8 sps:$4 sm:$0xff]   ;;  %s4325_s13 = smov [#allocation2]  }
  0x33   : > { %s4249_s12 = sshll.u32 %s4325_s13, 4  ;;  %s4250_s12 = int_to_ptr.vmem [resolvable:$false] %s4249_s12 }
  0x34   : > { %886 = vmatpush1.bf16.msra.mxu1 %v3919_v38  ;;  %v4026_v38 = vld [vmem:[%s5163_s4 + $0x350] ss:$8 sps:$4 sm:$0xff]  }
  0x35   : > { %1977 = vmatpush1.bf16.msra.mxu0 %v3920_v39  ;;  %887 = vmatprep.subr.bf16.mxu1 %v3921_v40  ;;  %v4036_v39 = vld [vmem:[%s5163_s4 + $0x64] ss:$8 sps:$4 sm:$0xff]  }
  0x36   : > { %1978 = vmatprep.subr.bf16.mxu0 %v3923_v41  ;;  %v4040_v40 = vld [vmem:[%s5163_s4 + $0x364] ss:$8 sps:$4 sm:$0xff]   ;;  %v4001_v41 = vld [vmem:[%s4576_s16 + $0x30] ss:$8 sps:$4 sm:$0xff]  }
  0x38   : > { %888 = vmatpush1.bf16.msra.mxu1 %v3925_v42  ;;  %v4005_v42 = vld [vmem:[%s4564_s28 + $0x44] ss:$8 sps:$4 sm:$0xff]  }
  0x39   : > { %1979 = vmatpush1.bf16.msra.mxu0 %v3926_v43  ;;  %889 = vmatprep.subr.bf16.mxu1 %v3927_v44  ;;  %v4007_v43 = vld [vmem:[%s4576_s16 + $0x44] ss:$8 sps:$4 sm:$0xff]   ;;  %v4034_v44 = vld [vmem:[%s5163_s4 + $0x60] ss:$8 sps:$4 sm:$0xff]  }
  0x3a   : > { %1980 = vmatprep.subr.bf16.mxu0 %v3929_v45  ;;  %v4038_v45 = vld [vmem:[%s5163_s4 + $0x360] ss:$8 sps:$4 sm:$0xff]  }
  0x3c   : > { %890 = vmatpush1.bf16.msra.mxu1 %v3931_v46  ;;  %v4048_v46 = vld [vmem:[%s5163_s4 + $0x74] ss:$8 sps:$4 sm:$0xff]  }
  0x3d   : > { %1981 = vmatpush1.bf16.msra.mxu0 %v3932_v47  ;;  %891 = vmatprep.subr.bf16.mxu1 %v3933_v49  ;;  %v4052_v47 = vld [vmem:[%s5163_s4 + $0x374] ss:$8 sps:$4 sm:$0xff]   ;;  %v4009_v49 = vld [vmem:[%s4564_s28 + $0x40] ss:$8 sps:$4 sm:$0xff]  }
  0x3e   : > { %1982 = vmatprep.subr.bf16.mxu0 %v3935_v50  ;;  %v4013_v50 = vld [vmem:[%s4576_s16 + $0x40] ss:$8 sps:$4 sm:$0xff]  }
  0x40   : > { %892 = vmatpush1.bf16.msra.mxu1 %v3937_v52  ;;  %v4017_v52 = vld [vmem:[%s4564_s28 + $0x54] ss:$8 sps:$4 sm:$0xff]  }
  0x41   : > { %1983 = vmatpush1.bf16.msra.mxu0 %v3938_v53  ;;  %893 = vmatprep.subr.bf16.mxu1 %v3939_v54  ;;  %v4060_v53 = vld [vmem:[%s5163_s4 + $0x84] ss:$8 sps:$4 sm:$0xff]  }
  0x42   : > { %1984 = vmatprep.subr.bf16.mxu0 %v3941_v55  ;;  %v4064_v54 = vld [vmem:[%s5163_s4 + $0x384] ss:$8 sps:$4 sm:$0xff]   ;;  %v4019_v55 = vld [vmem:[%s4576_s16 + $0x54] ss:$8 sps:$4 sm:$0xff]  }
  0x44   : > { %894 = vmatpush1.bf16.msra.mxu1 %v3943_v56  ;;  %v4058_v56 = vld [vmem:[%s5163_s4 + $0x80] ss:$8 sps:$4 sm:$0xff]  }
  0x45   : > { %1985 = vmatpush1.bf16.msra.mxu0 %v3944_v57  ;;  %895 = vmatprep.subr.bf16.mxu1 %v3945_v58  ;;  %v4062_v57 = vld [vmem:[%s5163_s4 + $0x380] ss:$8 sps:$4 sm:$0xff]   ;;  %v4072_v58 = vld [vmem:[%s5163_s4 + $0x94] ss:$8 sps:$4 sm:$0xff]  }
  0x46   : > { %1986 = vmatprep.subr.bf16.mxu0 %v3947_v59  ;;  %v4076_v59 = vld [vmem:[%s5163_s4 + $0x394] ss:$8 sps:$4 sm:$0xff]  }
  0x48   : > { %896 = vmatpush1.bf16.msra.mxu1 %v3949_v60  ;;  %v4070_v60 = vld [vmem:[%s5163_s4 + $0x90] ss:$8 sps:$4 sm:$0xff]  }
  0x49   : > { %1987 = vmatpush1.bf16.msra.mxu0 %v3950_v61  ;;  %897 = vmatprep.subr.bf16.mxu1 %v3951_v62  ;;  %v4021_v61 = vld [vmem:[%s4564_s28 + $0x50] ss:$8 sps:$4 sm:$0xff]  }
  0x4a   : > { %1988 = vmatprep.subr.bf16.mxu0 %v3953_v63  ;;  %v4074_v62 = vld [vmem:[%s5163_s4 + $0x390] ss:$8 sps:$4 sm:$0xff]   ;;  %v4084_v63 = vld [vmem:[%s5163_s4 + $0xa4] ss:$8 sps:$4 sm:$0xff]  }
  0x4c   : > { %898 = vmatpush1.bf16.msra.mxu1 %v3955_v0  ;;  %v4088_v0 = vld [vmem:[%s5163_s4 + $0x3a4] ss:$8 sps:$4 sm:$0xff]  }
  0x4d   : > { %1989 = vmatpush1.bf16.msra.mxu0 %v3956_v1  ;;  %1380 = vmatprep.subr.bf16.mxu1 %v3965_v2  ;;  %v4025_v1 = vld [vmem:[%s4576_s16 + $0x50] ss:$8 sps:$4 sm:$0xff]   ;;  %v4029_v2 = vld [vmem:[%s4564_s28 + $0x64] ss:$8 sps:$4 sm:$0xff]  }
  0x4e   : > { %2600 = vmatprep.subr.bf16.mxu0 %v3968_v3  ;;  %v4031_v3 = vld [vmem:[%s4576_s16 + $0x64] ss:$8 sps:$4 sm:$0xff]  }
  0x4f   : > { %900 = vmatmul.mubr.bf16.vlgmr.msra.gmra.mrb[0].mxu1 %v3957_v4  ;;  %v4082_v4 = vld [vmem:[%s5163_s4 + $0xa0] ss:$8 sps:$4 sm:$0xff]  }
  0x50   : > { %1991 = vmatmul.mubr.bf16.vlgmr.msra.gmra.mrb[0].mxu0 %v3960_v5  ;;  %1381 = vmatpush1.bf16.msra.mxu1 %v3963_v6  ;;  %v4086_v5 = vld [vmem:[%s5163_s4 + $0x3a0] ss:$8 sps:$4 sm:$0xff]   ;;  %v4096_v6 = vld [vmem:[%s5163_s4 + $0xb4] ss:$8 sps:$4 sm:$0xff]  }
  0x51   : > { %2601 = vmatpush1.bf16.msra.mxu0 %v3966_v7  ;;  %909 = vmatprep.mubr.bf16.mxu1 %v3969_v8  ;;  %v4100_v7 = vld [vmem:[%s5163_s4 + $0x3b4] ss:$8 sps:$4 sm:$0xff]   ;;  %v4094_v8 = vld [vmem:[%s5163_s4 + $0xb0] ss:$8 sps:$4 sm:$0xff]  }
  0x52   : > { %2000 = vmatprep.mubr.bf16.mxu0 %v3971_v9  ;;  %1382 = vmatprep.subr.bf16.mxu1 %v3976_v10  ;;  %v4033_v9 = vld [vmem:[%s4564_s28 + $0x60] ss:$8 sps:$4 sm:$0xff]  }
  0x53   : > { %2602 = vmatprep.subr.bf16.mxu0 %v3980_v11  ;;  %v4037_v10 = vld [vmem:[%s4576_s16 + $0x60] ss:$8 sps:$4 sm:$0xff]   ;;  %v4098_v11 = vld [vmem:[%s5163_s4 + $0x3b0] ss:$8 sps:$4 sm:$0xff]  }
  0x54   : > { %1383 = vmatpush1.bf16.msra.mxu1 %v3974_v12  ;;  %v4041_v12 = vld [vmem:[%s4564_s28 + $0x74] ss:$8 sps:$4 sm:$0xff]  }
  0x55   : > { %2603 = vmatpush1.bf16.msra.mxu0 %v3978_v13  ;;  %1384 = vmatprep.subr.bf16.mxu1 %v3988_v14  ;;  %v4043_v13 = vld [vmem:[%s4576_s16 + $0x74] ss:$8 sps:$4 sm:$0xff]   ;;  %v4108_v14 = vld [vmem:[%s5163_s4 + $0xc4] ss:$8 sps:$4 sm:$0xff]  }
  0x56   : > { %2604 = vmatprep.subr.bf16.mxu0 %v3992_v15  ;;  %v4106_v15 = vld [vmem:[%s5163_s4 + $0xc0] ss:$8 sps:$4 sm:$0xff]  }
  0x57   : > { %910 = vmatmul.mubr.bf16.gmra.mrb[4].mxu1 %v3973_v16  ;;  %v4112_v16 = vld [vmem:[%s5163_s4 + $0x3c4] ss:$8 sps:$4 sm:$0xff]  }
  0x58   : > { %2001 = vmatmul.mubr.bf16.gmra.mrb[4].mxu0 %v3977_v17  ;;  %919 = vmatprep.mubr.bf16.mxu1 %v3981_v18  ;;  %v4110_v17 = vld [vmem:[%s5163_s4 + $0x3c0] ss:$8 sps:$4 sm:$0xff]   ;;  %v4120_v18 = vld [vmem:[%s5163_s4 + $0xd4] ss:$8 sps:$4 sm:$0xff]  }
  0x59   : > { %2010 = vmatprep.mubr.bf16.mxu0 %v3983_v19  ;;  %1385 = vmatpush1.bf16.msra.mxu1 %v3986_v20  ;;  %v4118_v19 = vld [vmem:[%s5163_s4 + $0xd0] ss:$8 sps:$4 sm:$0xff]  }
  0x5a   : > { %2605 = vmatpush1.bf16.msra.mxu0 %v3990_v21  ;;  %1386 = vmatprep.subr.bf16.mxu1 %v4000_v22  ;;  %v4122_v20 = vld [vmem:[%s5163_s4 + $0x3d0] ss:$8 sps:$4 sm:$0xff]   ;;  %v4124_v21 = vld [vmem:[%s5163_s4 + $0x3d4] ss:$8 sps:$4 sm:$0xff]  }
  0x5b   : > { %2606 = vmatprep.subr.bf16.mxu0 %v4004_v23  ;;  %v4045_v22 = vld [vmem:[%s4564_s28 + $0x70] ss:$8 sps:$4 sm:$0xff]  }
  0x5c   : > { %v4049_v23 = vld [vmem:[%s4576_s16 + $0x70] ss:$8 sps:$4 sm:$0xff]  }
  0x5d   : > { %1387 = vmatpush1.bf16.msra.mxu1 %v3998_v24  ;;  %v4053_v24 = vld [vmem:[%s4564_s28 + $0x84] ss:$8 sps:$4 sm:$0xff]  }
  0x5e   : > { %2607 = vmatpush1.bf16.msra.mxu0 %v4002_v27  ;;  %1388 = vmatprep.subr.bf16.mxu1 %v4012_v29  ;;  %v4132_v27 = vld [vmem:[%s5163_s4 + $0xe4] ss:$8 sps:$4 sm:$0xff]  }
  0x5f   : > { %2608 = vmatprep.subr.bf16.mxu0 %v4016_v30  ;;  %920 = vmatmul.mubr.bf16.gmra.mrb[8].mxu1 %v3985_v25  ;;  %v4055_v25 = vld [vmem:[%s4576_s16 + $0x84] ss:$8 sps:$4 sm:$0xff]   ;;  %v4057_v30 = vld [vmem:[%s4564_s28 + $0x80] ss:$8 sps:$4 sm:$0xff]  }
  0x60   : > { %2011 = vmatmul.mubr.bf16.gmra.mrb[8].mxu0 %v3989_v26  ;;  %929 = vmatprep.mubr.bf16.mxu1 %v3993_v28  ;;  %v4130_v26 = vld [vmem:[%s5163_s4 + $0xe0] ss:$8 sps:$4 sm:$0xff]   ;;  %v4136_v29 = vld [vmem:[%s5163_s4 + $0x3e4] ss:$8 sps:$4 sm:$0xff]  }
  0x61   : > { %2020 = vmatprep.mubr.bf16.mxu0 %v3995_v31  ;;  %1389 = vmatpush1.bf16.msra.mxu1 %v4010_v32  ;;  %v4134_v28 = vld [vmem:[%s5163_s4 + $0x3e0] ss:$8 sps:$4 sm:$0xff]   ;;  %v4065_v32 = vld [vmem:[%s4564_s28 + $0x94] ss:$8 sps:$4 sm:$0xff]  }
  0x62   : > { %2609 = vmatpush1.bf16.msra.mxu0 %v4014_v33  ;;  %1390 = vmatprep.subr.bf16.mxu1 %v4024_v34  ;;  %v4061_v31 = vld [vmem:[%s4576_s16 + $0x80] ss:$8 sps:$4 sm:$0xff]   ;;  %v4142_v33 = vld [vmem:[%s5163_s4 + $0xf0] ss:$8 sps:$4 sm:$0xff]   ;;  %v4144_v34 = vld [vmem:[%s5163_s4 + $0xf4] ss:$8 sps:$4 sm:$0xff]  }
  0x63   : > { %2610 = vmatprep.subr.bf16.mxu0 %v4028_v35  ;;  %v4067_v35 = vld [vmem:[%s4576_s16 + $0x94] ss:$8 sps:$4 sm:$0xff]  }
  0x65   : > { %1391 = vmatpush1.bf16.msra.mxu1 %v4022_v36  ;;  %v4148_v36 = vld [vmem:[%s5163_s4 + $0x3f4] ss:$8 sps:$4 sm:$0xff]  }
  0x66   : > { %2611 = vmatpush1.bf16.msra.mxu0 %v4026_v38  ;;  %1392 = vmatprep.subr.bf16.mxu1 %v4036_v39  ;;  %v4069_v38 = vld [vmem:[%s4564_s28 + $0x90] ss:$8 sps:$4 sm:$0xff]  }
  0x67   : > { %2612 = vmatprep.subr.bf16.mxu0 %v4040_v40  ;;  %930 = vmatmul.mubr.bf16.gmra.mrb[12].mxu1 %v3997_v37  ;;  %v4146_v37 = vld [vmem:[%s5163_s4 + $0x3f0] ss:$8 sps:$4 sm:$0xff]   ;;  %v4077_v40 = vld [vmem:[%s4564_s28 + $0xa4] ss:$8 sps:$4 sm:$0xff]  }
  0x68   : > { %2021 = vmatmul.mubr.bf16.gmra.mrb[12].mxu0 %v4001_v41  ;;  %939 = vmatprep.mubr.bf16.mxu1 %v4005_v42  ;;  %v4073_v39 = vld [vmem:[%s4576_s16 + $0x90] ss:$8 sps:$4 sm:$0xff]   ;;  %v4079_v41 = vld [vmem:[%s4576_s16 + $0xa4] ss:$8 sps:$4 sm:$0xff]   ;;  %v4081_v42 = vld [vmem:[%s4564_s28 + $0xa0] ss:$8 sps:$4 sm:$0xff]  }
  0x69   : > { %2030 = vmatprep.mubr.bf16.mxu0 %v4007_v43  ;;  %1393 = vmatpush1.bf16.msra.mxu1 %v4034_v44  ;;  %v4085_v43 = vld [vmem:[%s4576_s16 + $0xa0] ss:$8 sps:$4 sm:$0xff]   ;;  %v4089_v44 = vld [vmem:[%s4564_s28 + $0xb4] ss:$8 sps:$4 sm:$0xff]  }
  0x6a   : > { %2613 = vmatpush1.bf16.msra.mxu0 %v4038_v45  ;;  %1394 = vmatprep.subr.bf16.mxu1 %v4048_v46  ;;  %v4091_v45 = vld [vmem:[%s4576_s16 + $0xb4] ss:$8 sps:$4 sm:$0xff]   ;;  %v4093_v46 = vld [vmem:[%s4564_s28 + $0xb0] ss:$8 sps:$4 sm:$0xff]  }
  0x6b   : > { %2614 = vmatprep.subr.bf16.mxu0 %v4052_v47  ;;  %v4097_v47 = vld [vmem:[%s4576_s16 + $0xb0] ss:$8 sps:$4 sm:$0xff]  }
  0x6d   : > { %1395 = vmatpush1.bf16.msra.mxu1 %v4046_v48  ;;  %v4101_v48 = vld [vmem:[%s4564_s28 + $0xc4] ss:$8 sps:$4 sm:$0xff]  }
  0x6e   : > { %2615 = vmatpush1.bf16.msra.mxu0 %v4050_v51  ;;  %1396 = vmatprep.subr.bf16.mxu1 %v4060_v53  ;;  %v4109_v51 = vld [vmem:[%s4576_s16 + $0xc0] ss:$8 sps:$4 sm:$0xff]   ;;  %v4115_v53 = vld [vmem:[%s4576_s16 + $0xd4] ss:$8 sps:$4 sm:$0xff]  }
  0x6f   : > { %2616 = vmatprep.subr.bf16.mxu0 %v4064_v54  ;;  %940 = vmatmul.mubr.bf16.gmra.mrb[16].mxu1 %v4009_v49  ;;  %v4103_v49 = vld [vmem:[%s4576_s16 + $0xc4] ss:$8 sps:$4 sm:$0xff]   ;;  %v4117_v54 = vld [vmem:[%s4564_s28 + $0xd0] ss:$8 sps:$4 sm:$0xff]  }
  0x70   : > { %2031 = vmatmul.mubr.bf16.gmra.mrb[16].mxu0 %v4013_v50  ;;  %949 = vmatprep.mubr.bf16.mxu1 %v4017_v52  ;;  %v4105_v50 = vld [vmem:[%s4564_s28 + $0xc0] ss:$8 sps:$4 sm:$0xff]   ;;  %v4113_v52 = vld [vmem:[%s4564_s28 + $0xd4] ss:$8 sps:$4 sm:$0xff]  }
  0x71   : > { %2040 = vmatprep.mubr.bf16.mxu0 %v4019_v55  ;;  %1397 = vmatpush1.bf16.msra.mxu1 %v4058_v56  ;;  %v4121_v55 = vld [vmem:[%s4576_s16 + $0xd0] ss:$8 sps:$4 sm:$0xff]   ;;  %v4125_v56 = vld [vmem:[%s4564_s28 + $0xe4] ss:$8 sps:$4 sm:$0xff]  }
  0x72   : > { %2617 = vmatpush1.bf16.msra.mxu0 %v4062_v57  ;;  %1398 = vmatprep.subr.bf16.mxu1 %v4072_v58  ;;  %v4127_v57 = vld [vmem:[%s4576_s16 + $0xe4] ss:$8 sps:$4 sm:$0xff]   ;;  %v4129_v58 = vld [vmem:[%s4564_s28 + $0xe0] ss:$8 sps:$4 sm:$0xff]  }
  0x73   : > { %2618 = vmatprep.subr.bf16.mxu0 %v4076_v59  ;;  %v4133_v59 = vld [vmem:[%s4576_s16 + $0xe0] ss:$8 sps:$4 sm:$0xff]  }
  0x75   : > { %1399 = vmatpush1.bf16.msra.mxu1 %v4070_v60  ;;  %v4137_v60 = vld [vmem:[%s4564_s28 + $0xf4] ss:$8 sps:$4 sm:$0xff]  }
  0x76   : > { %2619 = vmatpush1.bf16.msra.mxu0 %v4074_v62  ;;  %1400 = vmatprep.subr.bf16.mxu1 %v4084_v63  ;;  %v4141_v62 = vld [vmem:[%s4564_s28 + $0xf0] ss:$8 sps:$4 sm:$0xff]   ;;  %s4251_s28 = scalar_lea.vmem %s4250_s12, 16384 }
  0x77   : > { %2620 = vmatprep.subr.bf16.mxu0 %v4088_v0  ;;  %950 = vmatmul.mubr.bf16.gmra.mrb[20].mxu1 %v4021_v61  ;;  %v4139_v61 = vld [vmem:[%s4576_s16 + $0xf4] ss:$8 sps:$4 sm:$0xff]   ;;  %v4145_v63 = vld [vmem:[%s4576_s16 + $0xf0] ss:$8 sps:$4 sm:$0xff]   ;;  %v4151_v0 = vld [vmem:[%s4857_s18 + $0x4] ss:$8 sps:$4 sm:$0xff]  }
  0x78   : > { %2041 = vmatmul.mubr.bf16.gmra.mrb[20].mxu0 %v4025_v1  ;;  %959 = vmatprep.mubr.bf16.mxu1 %v4029_v2  ;;  %v4154_v1 = vld [vmem:[%s4866_s8 + $0x4] ss:$8 sps:$4 sm:$0xff]   ;;  %v4149_v2 = vld [vmem:[%s4857_s18] ss:$8 sps:$4 sm:$0xff]  }
  0x79   : > { %2050 = vmatprep.mubr.bf16.mxu0 %v4031_v3  ;;  %1401 = vmatpush1.bf16.msra.mxu1 %v4082_v4  ;;  %v4152_v3 = vld [vmem:[%s4866_s8] ss:$8 sps:$4 sm:$0xff]   ;;  %v4155_v4 = vld [vmem:[%s4857_s18 + $0x14] ss:$8 sps:$4 sm:$0xff]  }
  0x7a   : > { %2621 = vmatpush1.bf16.msra.mxu0 %v4086_v5  ;;  %1402 = vmatprep.subr.bf16.mxu1 %v4096_v6  ;;  %v4157_v5 = vld [vmem:[%s4866_s8 + $0x14] ss:$8 sps:$4 sm:$0xff]   ;;  %v4159_v6 = vld [vmem:[%s4857_s18 + $0x10] ss:$8 sps:$4 sm:$0xff]  }
  0x7b   : > { %2622 = vmatprep.subr.bf16.mxu0 %v4100_v7  ;;  %v4160_v7 = vld [vmem:[%s4866_s8 + $0x10] ss:$8 sps:$4 sm:$0xff]  }
  0x7d   : > { %1403 = vmatpush1.bf16.msra.mxu1 %v4094_v8  ;;  %v4161_v8 = vld [vmem:[%s4857_s18 + $0x24] ss:$8 sps:$4 sm:$0xff]  }
  0x7e   : > { %2623 = vmatpush1.bf16.msra.mxu0 %v4098_v11  ;;  %1404 = vmatprep.subr.bf16.mxu1 %v4108_v14  ;;  %v4166_v11 = vld [vmem:[%s4866_s8 + $0x20] ss:$8 sps:$4 sm:$0xff]   ;;  %v4171_v14 = vld [vmem:[%s4857_s18 + $0x30] ss:$8 sps:$4 sm:$0xff]  }
  0x7f   : > { %2624 = vmatprep.subr.bf16.mxu0 %v4112_v16  ;;  %960 = vmatmul.mubr.bf16.gmra.mrb[24].mxu1 %v4033_v9  ;;  %v4163_v9 = vld [vmem:[%s4866_s8 + $0x24] ss:$8 sps:$4 sm:$0xff]  }
  0x80   : > { %2051 = vmatmul.mubr.bf16.gmra.mrb[24].mxu0 %v4037_v10  ;;  %969 = vmatprep.mubr.bf16.mxu1 %v4041_v12  ;;  %v4165_v10 = vld [vmem:[%s4857_s18 + $0x20] ss:$8 sps:$4 sm:$0xff]   ;;  %v4167_v12 = vld [vmem:[%s4857_s18 + $0x34] ss:$8 sps:$4 sm:$0xff]   ;;  %v4173_v16 = vld [vmem:[%s4857_s18 + $0x44] ss:$8 sps:$4 sm:$0xff]  }
  0x81   : > { %2060 = vmatprep.mubr.bf16.mxu0 %v4043_v13  ;;  %1405 = vmatpush1.bf16.msra.mxu1 %v4106_v15  ;;  %v4169_v13 = vld [vmem:[%s4866_s8 + $0x34] ss:$8 sps:$4 sm:$0xff]   ;;  %v4172_v15 = vld [vmem:[%s4866_s8 + $0x30] ss:$8 sps:$4 sm:$0xff]  }
  0x82   : > { %2625 = vmatpush1.bf16.msra.mxu0 %v4110_v17  ;;  %1406 = vmatprep.subr.bf16.mxu1 %v4120_v18  ;;  %v4175_v17 = vld [vmem:[%s4866_s8 + $0x44] ss:$8 sps:$4 sm:$0xff]   ;;  %v4177_v18 = vld [vmem:[%s4857_s18 + $0x40] ss:$8 sps:$4 sm:$0xff]  }
  0x83   : > { %2626 = vmatprep.subr.bf16.mxu0 %v4124_v21  ;;  %v4181_v21 = vld [vmem:[%s4866_s8 + $0x54] ss:$8 sps:$4 sm:$0xff]  }
  0x85   : > { %1407 = vmatpush1.bf16.msra.mxu1 %v4118_v19  ;;  %v4178_v19 = vld [vmem:[%s4866_s8 + $0x40] ss:$8 sps:$4 sm:$0xff]  }
  0x86   : > { %2627 = vmatpush1.bf16.msra.mxu0 %v4122_v20  ;;  %1408 = vmatprep.subr.bf16.mxu1 %v4132_v27  ;;  %v4179_v20 = vld [vmem:[%s4857_s18 + $0x54] ss:$8 sps:$4 sm:$0xff]   ;;  %v4190_v27 = vld [vmem:[%s4866_s8 + $0x60] ss:$8 sps:$4 sm:$0xff]  }
  0x87   : > { %970 = vmatmul.mubr.bf16.gmra.mrb[28].mxu1 %v4045_v22  ;;  %2628 = vmatprep.subr.bf16.mxu0 %v4136_v29  ;;  %v4183_v22 = vld [vmem:[%s4857_s18 + $0x50] ss:$8 sps:$4 sm:$0xff]   ;;  %v4193_v29 = vld [vmem:[%s4866_s8 + $0x74] ss:$8 sps:$4 sm:$0xff]  }
  0x88   : > { %2061 = vmatmul.mubr.bf16.gmra.mrb[28].mxu0 %v4049_v23  ;;  %979 = vmatprep.mubr.bf16.mxu1 %v4053_v24  ;;  %v4184_v23 = vld [vmem:[%s4866_s8 + $0x50] ss:$8 sps:$4 sm:$0xff]   ;;  %v4185_v24 = vld [vmem:[%s4857_s18 + $0x64] ss:$8 sps:$4 sm:$0xff]  }
  0x89   : > { %2070 = vmatprep.mubr.bf16.mxu0 %v4055_v25  ;;  %1409 = vmatpush1.bf16.msra.mxu1 %v4130_v26  ;;  %v4187_v25 = vld [vmem:[%s4866_s8 + $0x64] ss:$8 sps:$4 sm:$0xff]   ;;  %v4189_v26 = vld [vmem:[%s4857_s18 + $0x60] ss:$8 sps:$4 sm:$0xff]  }
  0x8a   : > { %2629 = vmatpush1.bf16.msra.mxu0 %v4134_v28  ;;  %1410 = vmatprep.subr.bf16.mxu1 %v4144_v34  ;;  %v4191_v28 = vld [vmem:[%s4857_s18 + $0x74] ss:$8 sps:$4 sm:$0xff]   ;;  %v4201_v34 = vld [vmem:[%s4857_s18 + $0x80] ss:$8 sps:$4 sm:$0xff]  }
  0x8b   : > { %2630 = vmatprep.subr.bf16.mxu0 %v4148_v36  ;;  %v4203_v36 = vld [vmem:[%s4857_s18 + $0x94] ss:$8 sps:$4 sm:$0xff]  }
  0x8d   : > { %1411 = vmatpush1.bf16.msra.mxu1 %v4142_v33  ;;  %v4199_v33 = vld [vmem:[%s4866_s8 + $0x84] ss:$8 sps:$4 sm:$0xff]  }
  0x8e   : > { %2631 = vmatpush1.bf16.msra.mxu0 %v4146_v37  ;;  %v4205_v37 = vld [vmem:[%s4866_s8 + $0x94] ss:$8 sps:$4 sm:$0xff]  }
  0x8f   : > { %980 = vmatmul.mubr.bf16.gmra.mrb[32].mxu1 %v4057_v30  ;;  %v4195_v30 = vld [vmem:[%s4857_s18 + $0x70] ss:$8 sps:$4 sm:$0xff]  }
  0x90   : > { %2071 = vmatmul.mubr.bf16.gmra.mrb[32].mxu0 %v4061_v31  ;;  %989 = vmatprep.mubr.bf16.mxu1 %v4065_v32  ;;  %v4196_v31 = vld [vmem:[%s4866_s8 + $0x70] ss:$8 sps:$4 sm:$0xff]   ;;  %v4197_v32 = vld [vmem:[%s4857_s18 + $0x84] ss:$8 sps:$4 sm:$0xff]  }
  0x91   : > { %2080 = vmatprep.mubr.bf16.mxu0 %v4067_v35  ;;  %v4202_v35 = vld [vmem:[%s4866_s8 + $0x80] ss:$8 sps:$4 sm:$0xff]  }
  0x97   : > { %990 = vmatmul.mubr.bf16.gmra.mrb[36].mxu1 %v4069_v38  ;;  %v4207_v38 = vld [vmem:[%s4857_s18 + $0x90] ss:$8 sps:$4 sm:$0xff]  }
  0x98   : > { %2081 = vmatmul.mubr.bf16.gmra.mrb[36].mxu0 %v4073_v39  ;;  %999 = vmatprep.mubr.bf16.mxu1 %v4077_v40  ;;  %v4208_v39 = vld [vmem:[%s4866_s8 + $0x90] ss:$8 sps:$4 sm:$0xff]   ;;  %v4209_v40 = vld [vmem:[%s4857_s18 + $0xa4] ss:$8 sps:$4 sm:$0xff]  }
  0x99   : > { %2090 = vmatprep.mubr.bf16.mxu0 %v4079_v41  ;;  %v4211_v41 = vld [vmem:[%s4866_s8 + $0xa4] ss:$8 sps:$4 sm:$0xff]  }
  0x9f   : > { %1000 = vmatmul.mubr.bf16.gmra.mrb[40].mxu1 %v4081_v42  ;;  %v4213_v42 = vld [vmem:[%s4857_s18 + $0xa0] ss:$8 sps:$4 sm:$0xff]  }
  0xa0   : > { %2091 = vmatmul.mubr.bf16.gmra.mrb[40].mxu0 %v4085_v43  ;;  %1009 = vmatprep.mubr.bf16.mxu1 %v4089_v44  ;;  %v4214_v43 = vld [vmem:[%s4866_s8 + $0xa0] ss:$8 sps:$4 sm:$0xff]   ;;  %v4215_v44 = vld [vmem:[%s4857_s18 + $0xb4] ss:$8 sps:$4 sm:$0xff]  }
  0xa1   : > { %2100 = vmatprep.mubr.bf16.mxu0 %v4091_v45  ;;  %v4217_v45 = vld [vmem:[%s4866_s8 + $0xb4] ss:$8 sps:$4 sm:$0xff]  }
  0xa7   : > { %1010 = vmatmul.mubr.bf16.gmra.mrb[44].mxu1 %v4093_v46  ;;  %v4219_v46 = vld [vmem:[%s4857_s18 + $0xb0] ss:$8 sps:$4 sm:$0xff]  }
  0xa8   : > { %2101 = vmatmul.mubr.bf16.gmra.mrb[44].mxu0 %v4097_v47  ;;  %1019 = vmatprep.mubr.bf16.mxu1 %v4101_v48  ;;  %v4220_v47 = vld [vmem:[%s4866_s8 + $0xb0] ss:$8 sps:$4 sm:$0xff]   ;;  %v4221_v48 = vld [vmem:[%s4857_s18 + $0xc4] ss:$8 sps:$4 sm:$0xff]  }
  0xa9   : > { %2110 = vmatprep.mubr.bf16.mxu0 %v4103_v49  ;;  %v4223_v49 = vld [vmem:[%s4866_s8 + $0xc4] ss:$8 sps:$4 sm:$0xff]  }
  0xaf   : > { %1020 = vmatmul.mubr.bf16.gmra.mrb[48].mxu1 %v4105_v50  ;;  %v4225_v50 = vld [vmem:[%s4857_s18 + $0xc0] ss:$8 sps:$4 sm:$0xff]  }
  0xb0   : > { %2111 = vmatmul.mubr.bf16.gmra.mrb[48].mxu0 %v4109_v51  ;;  %1029 = vmatprep.mubr.bf16.mxu1 %v4113_v52  ;;  %v4226_v51 = vld [vmem:[%s4866_s8 + $0xc0] ss:$8 sps:$4 sm:$0xff]   ;;  %v4227_v52 = vld [vmem:[%s4857_s18 + $0xd4] ss:$8 sps:$4 sm:$0xff]  }
  0xb1   : > { %2120 = vmatprep.mubr.bf16.mxu0 %v4115_v53  ;;  %v4229_v53 = vld [vmem:[%s4866_s8 + $0xd4] ss:$8 sps:$4 sm:$0xff]  }
  0xb7   : > { %1030 = vmatmul.mubr.bf16.gmra.mrb[52].mxu1 %v4117_v54  ;;  %v4231_v54 = vld [vmem:[%s4857_s18 + $0xd0] ss:$8 sps:$4 sm:$0xff]  }
  0xb8   : > { %2121 = vmatmul.mubr.bf16.gmra.mrb[52].mxu0 %v4121_v55  ;;  %1039 = vmatprep.mubr.bf16.mxu1 %v4125_v56  ;;  %v4232_v55 = vld [vmem:[%s4866_s8 + $0xd0] ss:$8 sps:$4 sm:$0xff]   ;;  %v4233_v56 = vld [vmem:[%s4857_s18 + $0xe4] ss:$8 sps:$4 sm:$0xff]  }
  0xb9   : > { %2130 = vmatprep.mubr.bf16.mxu0 %v4127_v57  ;;  %v4235_v57 = vld [vmem:[%s4866_s8 + $0xe4] ss:$8 sps:$4 sm:$0xff]  }
  0xbf   : > { %1040 = vmatmul.mubr.bf16.gmra.mrb[56].mxu1 %v4129_v58  ;;  %v4237_v58 = vld [vmem:[%s4857_s18 + $0xe0] ss:$8 sps:$4 sm:$0xff]  }
  0xc0   : > { %2131 = vmatmul.mubr.bf16.gmra.mrb[56].mxu0 %v4133_v59  ;;  %1049 = vmatprep.mubr.bf16.mxu1 %v4137_v60  ;;  %v4238_v59 = vld [vmem:[%s4866_s8 + $0xe0] ss:$8 sps:$4 sm:$0xff]   ;;  %v4239_v60 = vld [vmem:[%s4857_s18 + $0xf4] ss:$8 sps:$4 sm:$0xff]  }
  0xc1   : > { %2140 = vmatprep.mubr.bf16.mxu0 %v4139_v61  ;;  %v4241_v61 = vld [vmem:[%s4866_s8 + $0xf4] ss:$8 sps:$4 sm:$0xff]  }
  0xc7   : > { %1050 = vmatmul.mubr.bf16.gmra.mrb[60].mxu1 %v4141_v62  ;;  %v4243_v62 = vld [vmem:[%s4857_s18 + $0xf0] ss:$8 sps:$4 sm:$0xff]   ;;  %s3240_s18 = sshll.u32 %s366_s15, 9 }
  0xc8   : > { %2141 = vmatmul.mubr.bf16.gmra.mrb[60].mxu0 %v4145_v63  ;;  %1412 = vmatprep.mubr.bf16.mxu1 %v4151_v0  ;;  %v4244_v63 = vld [vmem:[%s4866_s8 + $0xf0] ss:$8 sps:$4 sm:$0xff]   ;;  %v2859_v0 = vlaneseq  ;;  %s4976_s17 = scalar_lea.vmem [#allocation2], %s3240_s18  ;;  %s5104_s8 = scalar_lea.hbm %s5165_s6, %s3611_s19 }
  0xc9   : > { %2632 = vmatprep.mubr.bf16.mxu0 %v4154_v1  ;;  %s3078_s20 = sshll.u32 %s4976_s17, 4  ;;  %s5106_s20 = int_to_ptr.vmem [resolvable:$true] %s3078_s20 }
  0xca   : > { %v2860_v1 = vshrl.u32 %v2859_v0, 7  ;;  %s4245_s11 = scalar_lea.vmem %s5106_s20, 8192  ;;  %p4252_p1 = scmp.lt.s32.totalorder %s5106_s20, %s4250_s12 }
  0xcb   : > { %p4246_p12 = scmp.ne.s32.totalorder %s5106_s20, %s4245_s11  ;;  %p4253_p2 = scmp.lt.s32.totalorder %s4251_s28, %s4245_s11 }
  0xcd   : > { %p4247_p13 = pnand %p4246_p12, %p4403_p4  ;;  %p4254_p3 = por %p4253_p2, %p4252_p1 }
  0xcf   : > { %1413 = vmatmul.mubr.bf16.vlgmr.msra.gmra.mrb[0].mxu1 %v4149_v2  ;;  %v2861_v2 = vsub.s32 0, %v2860_v1  ;;  %p4248_p0 = pneg %p4247_p13 }
  0xd0   : > { %2633 = vmatmul.mubr.bf16.vlgmr.msra.gmra.mrb[0].mxu0 %v4152_v3  ;;  %1422 = vmatprep.mubr.bf16.mxu1 %v4155_v4  ;;  %v2857_v3 = vld [vmem:[%s416_s14] sm:$0x3]  ;;  %v2865_v4 = vsub.s32 1, %v2860_v1 }
  0xd1   : > { %2642 = vmatprep.mubr.bf16.mxu0 %v4157_v5  ;;  %v4966_v5 = vrot.slane %v2857_v3, %v2861_v2  ;;  %p4255_p5 = pnand %p4254_p3, %p4248_p0 }
  0xd7   : > { %1423 = vmatmul.mubr.bf16.gmra.mrb[4].mxu1 %v4159_v6  ;;  %v4968_v6 = vrot.slane %v2857_v3, %v2865_v4 }
  0xd8   : > { %2643 = vmatmul.mubr.bf16.gmra.mrb[4].mxu0 %v4160_v7  ;;  %1432 = vmatprep.mubr.bf16.mxu1 %v4161_v8 }
  0xd9   : > { %2652 = vmatprep.mubr.bf16.mxu0 %v4163_v9 }
  0xdf   : > { %1433 = vmatmul.mubr.bf16.gmra.mrb[8].mxu1 %v4165_v10 }
  0xe0   : > { %2653 = vmatmul.mubr.bf16.gmra.mrb[8].mxu0 %v4166_v11  ;;  %1442 = vmatprep.mubr.bf16.mxu1 %v4167_v12 }
  0xe1   : > { %2662 = vmatprep.mubr.bf16.mxu0 %v4169_v13 }
  0xe7   : > { %1443 = vmatmul.mubr.bf16.gmra.mrb[12].mxu1 %v4171_v14 }
  0xe8   : > { %2663 = vmatmul.mubr.bf16.gmra.mrb[12].mxu0 %v4172_v15  ;;  %1452 = vmatprep.mubr.bf16.mxu1 %v4173_v16 }
  0xe9   : > { %2672 = vmatprep.mubr.bf16.mxu0 %v4175_v17 }
  0xef   : > { %1453 = vmatmul.mubr.bf16.gmra.mrb[16].mxu1 %v4177_v18 }
  0xf0   : > { %2673 = vmatmul.mubr.bf16.gmra.mrb[16].mxu0 %v4178_v19  ;;  %1462 = vmatprep.mubr.bf16.mxu1 %v4179_v20 }
  0xf1   : > { %2682 = vmatprep.mubr.bf16.mxu0 %v4181_v21 }
  0xf7   : > { %1463 = vmatmul.mubr.bf16.gmra.mrb[20].mxu1 %v4183_v22 }
  0xf8   : > { %2683 = vmatmul.mubr.bf16.gmra.mrb[20].mxu0 %v4184_v23  ;;  %1472 = vmatprep.mubr.bf16.mxu1 %v4185_v24 }
  0xf9   : > { %2692 = vmatprep.mubr.bf16.mxu0 %v4187_v25 }
  0xff   : > { %1473 = vmatmul.mubr.bf16.gmra.mrb[24].mxu1 %v4189_v26 }
 0x100   : > { %2693 = vmatmul.mubr.bf16.gmra.mrb[24].mxu0 %v4190_v27  ;;  %1482 = vmatprep.mubr.bf16.mxu1 %v4191_v28 }
 0x101   : > { %2702 = vmatprep.mubr.bf16.mxu0 %v4193_v29 }
 0x107   : > { %1483 = vmatmul.mubr.bf16.gmra.mrb[28].mxu1 %v4195_v30 }
 0x108   : > { %2703 = vmatmul.mubr.bf16.gmra.mrb[28].mxu0 %v4196_v31  ;;  %1492 = vmatprep.mubr.bf16.mxu1 %v4197_v32 }
 0x109   : > { %2712 = vmatprep.mubr.bf16.mxu0 %v4199_v33 }
 0x10f   : > { %1493 = vmatmul.mubr.bf16.gmra.mrb[32].mxu1 %v4201_v34 }
 0x110   : > { %2713 = vmatmul.mubr.bf16.gmra.mrb[32].mxu0 %v4202_v35  ;;  %1502 = vmatprep.mubr.bf16.mxu1 %v4203_v36 }
 0x111   : > { %2722 = vmatprep.mubr.bf16.mxu0 %v4205_v37 }
 0x117   : > { %1503 = vmatmul.mubr.bf16.gmra.mrb[36].mxu1 %v4207_v38 }
 0x118   : > { %2723 = vmatmul.mubr.bf16.gmra.mrb[36].mxu0 %v4208_v39  ;;  %1512 = vmatprep.mubr.bf16.mxu1 %v4209_v40 }
 0x119   : > { %2732 = vmatprep.mubr.bf16.mxu0 %v4211_v41 }
 0x11f   : > { %1513 = vmatmul.mubr.bf16.gmra.mrb[40].mxu1 %v4213_v42 }
 0x120   : > { %2733 = vmatmul.mubr.bf16.gmra.mrb[40].mxu0 %v4214_v43  ;;  %1522 = vmatprep.mubr.bf16.mxu1 %v4215_v44 }
 0x121   : > { %2742 = vmatprep.mubr.bf16.mxu0 %v4217_v45 }
 0x127   : > { %1523 = vmatmul.mubr.bf16.gmra.mrb[44].mxu1 %v4219_v46 }
 0x128   : > { %2743 = vmatmul.mubr.bf16.gmra.mrb[44].mxu0 %v4220_v47  ;;  %1532 = vmatprep.mubr.bf16.mxu1 %v4221_v48 }
 0x129   : > { %2752 = vmatprep.mubr.bf16.mxu0 %v4223_v49 }
 0x12f   : > { %1533 = vmatmul.mubr.bf16.gmra.mrb[48].mxu1 %v4225_v50 }
 0x130   : > { %2753 = vmatmul.mubr.bf16.gmra.mrb[48].mxu0 %v4226_v51  ;;  %1542 = vmatprep.mubr.bf16.mxu1 %v4227_v52 }
 0x131   : > { %2762 = vmatprep.mubr.bf16.mxu0 %v4229_v53 }
 0x137   : > { %1543 = vmatmul.mubr.bf16.gmra.mrb[52].mxu1 %v4231_v54 }
 0x138   : > { %2763 = vmatmul.mubr.bf16.gmra.mrb[52].mxu0 %v4232_v55  ;;  %1552 = vmatprep.mubr.bf16.mxu1 %v4233_v56 }
 0x139   : > { %2772 = vmatprep.mubr.bf16.mxu0 %v4235_v57 }
 0x13f   : > { %1553 = vmatmul.mubr.bf16.gmra.mrb[56].mxu1 %v4237_v58 }
 0x140   : > { %2773 = vmatmul.mubr.bf16.gmra.mrb[56].mxu0 %v4238_v59  ;;  %1562 = vmatprep.mubr.bf16.mxu1 %v4239_v60 }
 0x141   : > { %2782 = vmatprep.mubr.bf16.mxu0 %v4241_v61 }
 0x147   : > { %1563 = vmatmul.mubr.bf16.gmra.mrb[60].mxu1 %v4243_v62 }
 0x148   : > { %2783 = vmatmul.mubr.bf16.gmra.mrb[60].mxu0 %v4244_v63 }
 0x1a2   : > { %v1414_v7 = vpop.f32.mrb[0].mxu1 }
 0x1a3   : > { %v2634_v8 = vpop.f32.mrb[0].mxu0  ;;  %v1416_v10 = vpop.f32.mrb[1].mxu1 }
 0x1a4   : > { %v3612_v9 = vadd.f32 %v2634_v8, %v1414_v7  ;;  %v2636_v11 = vpop.f32.mrb[1].mxu0  ;;  %v1418_v13 = vpop.f32.mrb[2].mxu1 }
 0x1a5   : > { %v3613_v12 = vadd.f32 %v2636_v11, %v1416_v10  ;;  %v2638_v14 = vpop.f32.mrb[2].mxu0  ;;  %v1420_v17 = vpop.f32.mrb[3].mxu1 }
 0x1a6   : > { %v2869_v15 = vadd.f32 %v3612_v9, %v4966_v5  ;;  %v3614_v16 = vadd.f32 %v2638_v14, %v1418_v13  ;;  %v2640_v18 = vpop.f32.mrb[3].mxu0 }
 0x1a7   : > { %v2870_v19 = vadd.f32 %v3613_v12, %v4968_v6  ;;  %v3615_v20 = vadd.f32 %v2640_v18, %v1420_v17 }
 0x1a8   : > { %v2933_v21 = vmax.f32 %v2869_v15, 0.0  ;;  %v2871_v22 = vadd.f32 %v3614_v16, %v4966_v5 }
 0x1a9   : > { %v2934_v23 = vmax.f32 %v2870_v19, 0.0  ;;  %v2872_v24 = vadd.f32 %v3615_v20, %v4968_v6 }
 0x1aa   : > { %2997 = vst [vmem:[%s4976_s17] sm:$0xff] %v2933_v21  ;;  %v2935_v25 = vmax.f32 %v2871_v22, 0.0  ;;  %v1424_v27 = vpop.f32.mrb[4].mxu1 }
 0x1ab   : > { %2998 = vst [vmem:[%s4976_s17 + $0x8] sm:$0xff] %v2934_v23  ;;  %v2936_v26 = vmax.f32 %v2872_v24, 0.0  ;;  %v2644_v28 = vpop.f32.mrb[4].mxu0  ;;  %v1426_v30 = vpop.f32.mrb[5].mxu1 }
 0x1ac   : > { %2999 = vst [vmem:[%s4976_s17 + $0x10] sm:$0xff] %v2935_v25  ;;  %v3616_v29 = vadd.f32 %v2644_v28, %v1424_v27  ;;  %v2646_v31 = vpop.f32.mrb[5].mxu0  ;;  %v1428_v33 = vpop.f32.mrb[6].mxu1 }
 0x1ad   : > { %3000 = vst [vmem:[%s4976_s17 + $0x18] sm:$0xff] %v2936_v26  ;;  %v3617_v32 = vadd.f32 %v2646_v31, %v1426_v30  ;;  %v2648_v34 = vpop.f32.mrb[6].mxu0  ;;  %v1430_v37 = vpop.f32.mrb[7].mxu1 }
 0x1ae   : > { %v2873_v35 = vadd.f32 %v3616_v29, %v4966_v5  ;;  %v3618_v36 = vadd.f32 %v2648_v34, %v1428_v33  ;;  %v2650_v38 = vpop.f32.mrb[7].mxu0 }
 0x1af   : > { %v2874_v39 = vadd.f32 %v3617_v32, %v4968_v6  ;;  %v3619_v40 = vadd.f32 %v2650_v38, %v1430_v37 }
 0x1b0   : > { %v2937_v41 = vmax.f32 %v2873_v35, 0.0  ;;  %v2875_v42 = vadd.f32 %v3618_v36, %v4966_v5 }
 0x1b1   : > { %v2938_v43 = vmax.f32 %v2874_v39, 0.0  ;;  %v2876_v44 = vadd.f32 %v3619_v40, %v4968_v6 }
 0x1b2   : > { %3001 = vst [vmem:[%s4976_s17 + $0x20] sm:$0xff] %v2937_v41  ;;  %v2939_v45 = vmax.f32 %v2875_v42, 0.0  ;;  %v1434_v47 = vpop.f32.mrb[8].mxu1 }
 0x1b3   : > { %3002 = vst [vmem:[%s4976_s17 + $0x28] sm:$0xff] %v2938_v43  ;;  %v2940_v46 = vmax.f32 %v2876_v44, 0.0  ;;  %v2654_v48 = vpop.f32.mrb[8].mxu0  ;;  %v1436_v50 = vpop.f32.mrb[9].mxu1 }
 0x1b4   : > { %3003 = vst [vmem:[%s4976_s17 + $0x30] sm:$0xff] %v2939_v45  ;;  %v3620_v49 = vadd.f32 %v2654_v48, %v1434_v47  ;;  %v2656_v51 = vpop.f32.mrb[9].mxu0  ;;  %v1438_v53 = vpop.f32.mrb[10].mxu1 }
 0x1b5   : > { %3004 = vst [vmem:[%s4976_s17 + $0x38] sm:$0xff] %v2940_v46  ;;  %v3621_v52 = vadd.f32 %v2656_v51, %v1436_v50  ;;  %v2658_v54 = vpop.f32.mrb[10].mxu0  ;;  %v1440_v57 = vpop.f32.mrb[11].mxu1 }
 0x1b6   : > { %v2877_v55 = vadd.f32 %v3620_v49, %v4966_v5  ;;  %v3622_v56 = vadd.f32 %v2658_v54, %v1438_v53  ;;  %v2660_v58 = vpop.f32.mrb[11].mxu0 }
 0x1b7   : > { %v2878_v59 = vadd.f32 %v3621_v52, %v4968_v6  ;;  %v3623_v60 = vadd.f32 %v2660_v58, %v1440_v57 }
 0x1b8   : > { %v2941_v61 = vmax.f32 %v2877_v55, 0.0  ;;  %v2879_v62 = vadd.f32 %v3622_v56, %v4966_v5 }
 0x1b9   : > { %v2942_v63 = vmax.f32 %v2878_v59, 0.0  ;;  %v2880_v0 = vadd.f32 %v3623_v60, %v4968_v6 }
 0x1ba   : > { %3005 = vst [vmem:[%s4976_s17 + $0x40] sm:$0xff] %v2941_v61  ;;  %v2943_v1 = vmax.f32 %v2879_v62, 0.0  ;;  %v1444_v3 = vpop.f32.mrb[12].mxu1 }
 0x1bb   : > { %3006 = vst [vmem:[%s4976_s17 + $0x48] sm:$0xff] %v2942_v63  ;;  %v2944_v2 = vmax.f32 %v2880_v0, 0.0  ;;  %v2664_v4 = vpop.f32.mrb[12].mxu0  ;;  %v1446_v8 = vpop.f32.mrb[13].mxu1 }
 0x1bc   : > { %3007 = vst [vmem:[%s4976_s17 + $0x50] sm:$0xff] %v2943_v1  ;;  %v3624_v7 = vadd.f32 %v2664_v4, %v1444_v3  ;;  %v2666_v9 = vpop.f32.mrb[13].mxu0  ;;  %v1448_v11 = vpop.f32.mrb[14].mxu1 }
 0x1bd   : > { %3008 = vst [vmem:[%s4976_s17 + $0x58] sm:$0xff] %v2944_v2  ;;  %v3625_v10 = vadd.f32 %v2666_v9, %v1446_v8  ;;  %v2668_v12 = vpop.f32.mrb[14].mxu0  ;;  %v1450_v15 = vpop.f32.mrb[15].mxu1 }
 0x1be   : > { %v2881_v13 = vadd.f32 %v3624_v7, %v4966_v5  ;;  %v3626_v14 = vadd.f32 %v2668_v12, %v1448_v11  ;;  %v2670_v16 = vpop.f32.mrb[15].mxu0 }
 0x1bf   : > { %v2882_v17 = vadd.f32 %v3625_v10, %v4968_v6  ;;  %v3627_v18 = vadd.f32 %v2670_v16, %v1450_v15 }
 0x1c0   : > { %v2945_v19 = vmax.f32 %v2881_v13, 0.0  ;;  %v2883_v20 = vadd.f32 %v3626_v14, %v4966_v5 }
 0x1c1   : > { %v2946_v21 = vmax.f32 %v2882_v17, 0.0  ;;  %v2884_v22 = vadd.f32 %v3627_v18, %v4968_v6 }
 0x1c2   : > { %3009 = vst [vmem:[%s4976_s17 + $0x60] sm:$0xff] %v2945_v19  ;;  %v2947_v23 = vmax.f32 %v2883_v20, 0.0  ;;  %v1454_v25 = vpop.f32.mrb[16].mxu1 }
 0x1c3   : > { %3010 = vst [vmem:[%s4976_s17 + $0x68] sm:$0xff] %v2946_v21  ;;  %v2948_v24 = vmax.f32 %v2884_v22, 0.0  ;;  %v2674_v26 = vpop.f32.mrb[16].mxu0  ;;  %v1456_v28 = vpop.f32.mrb[17].mxu1 }
 0x1c4   : > { %3011 = vst [vmem:[%s4976_s17 + $0x70] sm:$0xff] %v2947_v23  ;;  %v3628_v27 = vadd.f32 %v2674_v26, %v1454_v25  ;;  %v2676_v29 = vpop.f32.mrb[17].mxu0  ;;  %v1458_v31 = vpop.f32.mrb[18].mxu1 }
 0x1c5   : > { %3012 = vst [vmem:[%s4976_s17 + $0x78] sm:$0xff] %v2948_v24  ;;  %v3629_v30 = vadd.f32 %v2676_v29, %v1456_v28  ;;  %v2678_v32 = vpop.f32.mrb[18].mxu0  ;;  %v1460_v35 = vpop.f32.mrb[19].mxu1 }
 0x1c6   : > { %v2885_v33 = vadd.f32 %v3628_v27, %v4966_v5  ;;  %v3630_v34 = vadd.f32 %v2678_v32, %v1458_v31  ;;  %v2680_v36 = vpop.f32.mrb[19].mxu0 }
 0x1c7   : > { %v2886_v37 = vadd.f32 %v3629_v30, %v4968_v6  ;;  %v3631_v38 = vadd.f32 %v2680_v36, %v1460_v35 }
 0x1c8   : > { %v2949_v39 = vmax.f32 %v2885_v33, 0.0  ;;  %v2887_v40 = vadd.f32 %v3630_v34, %v4966_v5 }
 0x1c9   : > { %v2950_v41 = vmax.f32 %v2886_v37, 0.0  ;;  %v2888_v42 = vadd.f32 %v3631_v38, %v4968_v6 }
 0x1ca   : > { %3013 = vst [vmem:[%s4976_s17 + $0x80] sm:$0xff] %v2949_v39  ;;  %v2951_v43 = vmax.f32 %v2887_v40, 0.0  ;;  %v1464_v45 = vpop.f32.mrb[20].mxu1 }
 0x1cb   : > { %3014 = vst [vmem:[%s4976_s17 + $0x88] sm:$0xff] %v2950_v41  ;;  %v2952_v44 = vmax.f32 %v2888_v42, 0.0  ;;  %v2684_v46 = vpop.f32.mrb[20].mxu0  ;;  %v1466_v48 = vpop.f32.mrb[21].mxu1 }
 0x1cc   : > { %3015 = vst [vmem:[%s4976_s17 + $0x90] sm:$0xff] %v2951_v43  ;;  %v3632_v47 = vadd.f32 %v2684_v46, %v1464_v45  ;;  %v2686_v49 = vpop.f32.mrb[21].mxu0  ;;  %v1468_v51 = vpop.f32.mrb[22].mxu1 }
 0x1cd   : > { %3016 = vst [vmem:[%s4976_s17 + $0x98] sm:$0xff] %v2952_v44  ;;  %v3633_v50 = vadd.f32 %v2686_v49, %v1466_v48  ;;  %v2688_v52 = vpop.f32.mrb[22].mxu0  ;;  %v1470_v55 = vpop.f32.mrb[23].mxu1 }
 0x1ce   : > { %v2889_v53 = vadd.f32 %v3632_v47, %v4966_v5  ;;  %v3634_v54 = vadd.f32 %v2688_v52, %v1468_v51  ;;  %v2690_v56 = vpop.f32.mrb[23].mxu0 }
 0x1cf   : > { %v2890_v57 = vadd.f32 %v3633_v50, %v4968_v6  ;;  %v3635_v58 = vadd.f32 %v2690_v56, %v1470_v55 }
 0x1d0   : > { %v2953_v59 = vmax.f32 %v2889_v53, 0.0  ;;  %v2891_v60 = vadd.f32 %v3634_v54, %v4966_v5 }
 0x1d1   : > { %v2954_v61 = vmax.f32 %v2890_v57, 0.0  ;;  %v2892_v62 = vadd.f32 %v3635_v58, %v4968_v6 }
 0x1d2   : > { %3017 = vst [vmem:[%s4976_s17 + $0xa0] sm:$0xff] %v2953_v59  ;;  %v2955_v63 = vmax.f32 %v2891_v60, 0.0  ;;  %v1474_v1 = vpop.f32.mrb[24].mxu1 }
 0x1d3   : > { %3018 = vst [vmem:[%s4976_s17 + $0xa8] sm:$0xff] %v2954_v61  ;;  %v2956_v0 = vmax.f32 %v2892_v62, 0.0  ;;  %v2694_v2 = vpop.f32.mrb[24].mxu0  ;;  %v1476_v4 = vpop.f32.mrb[25].mxu1 }
 0x1d4   : > { %3019 = vst [vmem:[%s4976_s17 + $0xb0] sm:$0xff] %v2955_v63  ;;  %v3636_v3 = vadd.f32 %v2694_v2, %v1474_v1  ;;  %v2696_v7 = vpop.f32.mrb[25].mxu0  ;;  %v1478_v9 = vpop.f32.mrb[26].mxu1 }
 0x1d5   : > { %3020 = vst [vmem:[%s4976_s17 + $0xb8] sm:$0xff] %v2956_v0  ;;  %v3637_v8 = vadd.f32 %v2696_v7, %v1476_v4  ;;  %v2698_v10 = vpop.f32.mrb[26].mxu0  ;;  %v1480_v13 = vpop.f32.mrb[27].mxu1 }
 0x1d6   : > { %v2893_v11 = vadd.f32 %v3636_v3, %v4966_v5  ;;  %v3638_v12 = vadd.f32 %v2698_v10, %v1478_v9  ;;  %v2700_v14 = vpop.f32.mrb[27].mxu0 }
 0x1d7   : > { %v2894_v15 = vadd.f32 %v3637_v8, %v4968_v6  ;;  %v3639_v16 = vadd.f32 %v2700_v14, %v1480_v13 }
 0x1d8   : > { %v2957_v17 = vmax.f32 %v2893_v11, 0.0  ;;  %v2895_v18 = vadd.f32 %v3638_v12, %v4966_v5 }
 0x1d9   : > { %v2958_v19 = vmax.f32 %v2894_v15, 0.0  ;;  %v2896_v20 = vadd.f32 %v3639_v16, %v4968_v6 }
 0x1da   : > { %3021 = vst [vmem:[%s4976_s17 + $0xc0] sm:$0xff] %v2957_v17  ;;  %v2959_v21 = vmax.f32 %v2895_v18, 0.0  ;;  %v1484_v23 = vpop.f32.mrb[28].mxu1 }
 0x1db   : > { %3022 = vst [vmem:[%s4976_s17 + $0xc8] sm:$0xff] %v2958_v19  ;;  %v2960_v22 = vmax.f32 %v2896_v20, 0.0  ;;  %v2704_v24 = vpop.f32.mrb[28].mxu0  ;;  %v1486_v26 = vpop.f32.mrb[29].mxu1 }
 0x1dc   : > { %3023 = vst [vmem:[%s4976_s17 + $0xd0] sm:$0xff] %v2959_v21  ;;  %v3640_v25 = vadd.f32 %v2704_v24, %v1484_v23  ;;  %v2706_v27 = vpop.f32.mrb[29].mxu0  ;;  %v1488_v29 = vpop.f32.mrb[30].mxu1 }
 0x1dd   : > { %3024 = vst [vmem:[%s4976_s17 + $0xd8] sm:$0xff] %v2960_v22  ;;  %v3641_v28 = vadd.f32 %v2706_v27, %v1486_v26  ;;  %v2708_v30 = vpop.f32.mrb[30].mxu0  ;;  %v1490_v33 = vpop.f32.mrb[31].mxu1 }
 0x1de   : > { %v2897_v31 = vadd.f32 %v3640_v25, %v4966_v5  ;;  %v3642_v32 = vadd.f32 %v2708_v30, %v1488_v29  ;;  %v2710_v34 = vpop.f32.mrb[31].mxu0 }
 0x1df   : > { %v2898_v35 = vadd.f32 %v3641_v28, %v4968_v6  ;;  %v3643_v36 = vadd.f32 %v2710_v34, %v1490_v33 }
 0x1e0   : > { %v2961_v37 = vmax.f32 %v2897_v31, 0.0  ;;  %v2899_v38 = vadd.f32 %v3642_v32, %v4966_v5 }
 0x1e1   : > { %v2962_v39 = vmax.f32 %v2898_v35, 0.0  ;;  %v2900_v40 = vadd.f32 %v3643_v36, %v4968_v6 }
 0x1e2   : > { %3025 = vst [vmem:[%s4976_s17 + $0xe0] sm:$0xff] %v2961_v37  ;;  %v2963_v41 = vmax.f32 %v2899_v38, 0.0  ;;  %v1494_v43 = vpop.f32.mrb[32].mxu1 }
 0x1e3   : > { %3026 = vst [vmem:[%s4976_s17 + $0xe8] sm:$0xff] %v2962_v39  ;;  %v2964_v42 = vmax.f32 %v2900_v40, 0.0  ;;  %v2714_v44 = vpop.f32.mrb[32].mxu0  ;;  %v1496_v46 = vpop.f32.mrb[33].mxu1 }
 0x1e4   : > { %3027 = vst [vmem:[%s4976_s17 + $0xf0] sm:$0xff] %v2963_v41  ;;  %v3644_v45 = vadd.f32 %v2714_v44, %v1494_v43  ;;  %v2716_v47 = vpop.f32.mrb[33].mxu0  ;;  %v1498_v49 = vpop.f32.mrb[34].mxu1 }
 0x1e5   : > { %3028 = vst [vmem:[%s4976_s17 + $0xf8] sm:$0xff] %v2964_v42  ;;  %v3645_v48 = vadd.f32 %v2716_v47, %v1496_v46  ;;  %v2718_v50 = vpop.f32.mrb[34].mxu0  ;;  %v1500_v53 = vpop.f32.mrb[35].mxu1 }
 0x1e6   : > { %v2901_v51 = vadd.f32 %v3644_v45, %v4966_v5  ;;  %v3646_v52 = vadd.f32 %v2718_v50, %v1498_v49  ;;  %v2720_v54 = vpop.f32.mrb[35].mxu0 }
 0x1e7   : > { %v2902_v55 = vadd.f32 %v3645_v48, %v4968_v6  ;;  %v3647_v56 = vadd.f32 %v2720_v54, %v1500_v53 }
 0x1e8   : > { %v2965_v57 = vmax.f32 %v2901_v51, 0.0  ;;  %v2903_v58 = vadd.f32 %v3646_v52, %v4966_v5 }
 0x1e9   : > { %v2966_v59 = vmax.f32 %v2902_v55, 0.0  ;;  %v2904_v60 = vadd.f32 %v3647_v56, %v4968_v6 }
 0x1ea   : > { %3029 = vst [vmem:[%s4976_s17 + $0x100] sm:$0xff] %v2965_v57  ;;  %v2967_v61 = vmax.f32 %v2903_v58, 0.0  ;;  %v1504_v63 = vpop.f32.mrb[36].mxu1 }
 0x1eb   : > { %3030 = vst [vmem:[%s4976_s17 + $0x108] sm:$0xff] %v2966_v59  ;;  %v2968_v62 = vmax.f32 %v2904_v60, 0.0  ;;  %v2724_v0 = vpop.f32.mrb[36].mxu0  ;;  %v1506_v2 = vpop.f32.mrb[37].mxu1 }
 0x1ec   : > { %3031 = vst [vmem:[%s4976_s17 + $0x110] sm:$0xff] %v2967_v61  ;;  %v3648_v1 = vadd.f32 %v2724_v0, %v1504_v63  ;;  %v2726_v3 = vpop.f32.mrb[37].mxu0  ;;  %v1508_v7 = vpop.f32.mrb[38].mxu1 }
 0x1ed   : > { %3032 = vst [vmem:[%s4976_s17 + $0x118] sm:$0xff] %v2968_v62  ;;  %v3649_v4 = vadd.f32 %v2726_v3, %v1506_v2  ;;  %v2728_v8 = vpop.f32.mrb[38].mxu0  ;;  %v1510_v11 = vpop.f32.mrb[39].mxu1 }
 0x1ee   : > { %v2905_v9 = vadd.f32 %v3648_v1, %v4966_v5  ;;  %v3650_v10 = vadd.f32 %v2728_v8, %v1508_v7  ;;  %v2730_v12 = vpop.f32.mrb[39].mxu0 }
 0x1ef   : > { %v2906_v13 = vadd.f32 %v3649_v4, %v4968_v6  ;;  %v3651_v14 = vadd.f32 %v2730_v12, %v1510_v11 }
 0x1f0   : > { %v2969_v15 = vmax.f32 %v2905_v9, 0.0  ;;  %v2907_v16 = vadd.f32 %v3650_v10, %v4966_v5 }
 0x1f1   : > { %v2970_v17 = vmax.f32 %v2906_v13, 0.0  ;;  %v2908_v18 = vadd.f32 %v3651_v14, %v4968_v6 }
 0x1f2   : > { %3033 = vst [vmem:[%s4976_s17 + $0x120] sm:$0xff] %v2969_v15  ;;  %v2971_v19 = vmax.f32 %v2907_v16, 0.0  ;;  %v1514_v21 = vpop.f32.mrb[40].mxu1 }
 0x1f3   : > { %3034 = vst [vmem:[%s4976_s17 + $0x128] sm:$0xff] %v2970_v17  ;;  %v2972_v20 = vmax.f32 %v2908_v18, 0.0  ;;  %v2734_v22 = vpop.f32.mrb[40].mxu0  ;;  %v1516_v24 = vpop.f32.mrb[41].mxu1 }
 0x1f4   : > { %3035 = vst [vmem:[%s4976_s17 + $0x130] sm:$0xff] %v2971_v19  ;;  %v3652_v23 = vadd.f32 %v2734_v22, %v1514_v21  ;;  %v2736_v25 = vpop.f32.mrb[41].mxu0  ;;  %v1518_v27 = vpop.f32.mrb[42].mxu1 }
 0x1f5   : > { %3036 = vst [vmem:[%s4976_s17 + $0x138] sm:$0xff] %v2972_v20  ;;  %v3653_v26 = vadd.f32 %v2736_v25, %v1516_v24  ;;  %v2738_v28 = vpop.f32.mrb[42].mxu0  ;;  %v1520_v31 = vpop.f32.mrb[43].mxu1 }
 0x1f6   : > { %v2909_v29 = vadd.f32 %v3652_v23, %v4966_v5  ;;  %v3654_v30 = vadd.f32 %v2738_v28, %v1518_v27  ;;  %v2740_v32 = vpop.f32.mrb[43].mxu0 }
 0x1f7   : > { %v2910_v33 = vadd.f32 %v3653_v26, %v4968_v6  ;;  %v3655_v34 = vadd.f32 %v2740_v32, %v1520_v31 }
 0x1f8   : > { %v2973_v35 = vmax.f32 %v2909_v29, 0.0  ;;  %v2911_v36 = vadd.f32 %v3654_v30, %v4966_v5 }
 0x1f9   : > { %v2974_v37 = vmax.f32 %v2910_v33, 0.0  ;;  %v2912_v38 = vadd.f32 %v3655_v34, %v4968_v6 }
 0x1fa   : > { %3037 = vst [vmem:[%s4976_s17 + $0x140] sm:$0xff] %v2973_v35  ;;  %v2975_v39 = vmax.f32 %v2911_v36, 0.0  ;;  %v1524_v41 = vpop.f32.mrb[44].mxu1 }
 0x1fb   : > { %3038 = vst [vmem:[%s4976_s17 + $0x148] sm:$0xff] %v2974_v37  ;;  %v2976_v40 = vmax.f32 %v2912_v38, 0.0  ;;  %v2744_v42 = vpop.f32.mrb[44].mxu0  ;;  %v1526_v44 = vpop.f32.mrb[45].mxu1 }
 0x1fc   : > { %3039 = vst [vmem:[%s4976_s17 + $0x150] sm:$0xff] %v2975_v39  ;;  %v3656_v43 = vadd.f32 %v2744_v42, %v1524_v41  ;;  %v2746_v45 = vpop.f32.mrb[45].mxu0  ;;  %v1528_v47 = vpop.f32.mrb[46].mxu1 }
 0x1fd   : > { %3040 = vst [vmem:[%s4976_s17 + $0x158] sm:$0xff] %v2976_v40  ;;  %v3657_v46 = vadd.f32 %v2746_v45, %v1526_v44  ;;  %v2748_v48 = vpop.f32.mrb[46].mxu0  ;;  %v1530_v51 = vpop.f32.mrb[47].mxu1 }
 0x1fe   : > { %v2913_v49 = vadd.f32 %v3656_v43, %v4966_v5  ;;  %v3658_v50 = vadd.f32 %v2748_v48, %v1528_v47  ;;  %v2750_v52 = vpop.f32.mrb[47].mxu0 }
 0x1ff   : > { %v2914_v53 = vadd.f32 %v3657_v46, %v4968_v6  ;;  %v3659_v54 = vadd.f32 %v2750_v52, %v1530_v51 }
 0x200   : > { %v2977_v55 = vmax.f32 %v2913_v49, 0.0  ;;  %v2915_v56 = vadd.f32 %v3658_v50, %v4966_v5 }
 0x201   : > { %v2978_v57 = vmax.f32 %v2914_v53, 0.0  ;;  %v2916_v58 = vadd.f32 %v3659_v54, %v4968_v6 }
 0x202   : > { %3041 = vst [vmem:[%s4976_s17 + $0x160] sm:$0xff] %v2977_v55  ;;  %v2979_v59 = vmax.f32 %v2915_v56, 0.0  ;;  %v1534_v61 = vpop.f32.mrb[48].mxu1 }
 0x203   : > { %3042 = vst [vmem:[%s4976_s17 + $0x168] sm:$0xff] %v2978_v57  ;;  %v2980_v60 = vmax.f32 %v2916_v58, 0.0  ;;  %v2754_v62 = vpop.f32.mrb[48].mxu0  ;;  %v1536_v0 = vpop.f32.mrb[49].mxu1 }
 0x204   : > { %3043 = vst [vmem:[%s4976_s17 + $0x170] sm:$0xff] %v2979_v59  ;;  %v3660_v63 = vadd.f32 %v2754_v62, %v1534_v61  ;;  %v2756_v1 = vpop.f32.mrb[49].mxu0  ;;  %v1538_v3 = vpop.f32.mrb[50].mxu1 }
 0x205   : > { %3044 = vst [vmem:[%s4976_s17 + $0x178] sm:$0xff] %v2980_v60  ;;  %v3661_v2 = vadd.f32 %v2756_v1, %v1536_v0  ;;  %v2758_v4 = vpop.f32.mrb[50].mxu0  ;;  %v1540_v9 = vpop.f32.mrb[51].mxu1 }
 0x206   : > { %v2917_v7 = vadd.f32 %v3660_v63, %v4966_v5  ;;  %v3662_v8 = vadd.f32 %v2758_v4, %v1538_v3  ;;  %v2760_v10 = vpop.f32.mrb[51].mxu0 }
 0x207   : > { %v2918_v11 = vadd.f32 %v3661_v2, %v4968_v6  ;;  %v3663_v12 = vadd.f32 %v2760_v10, %v1540_v9 }
 0x208   : > { %v2981_v13 = vmax.f32 %v2917_v7, 0.0  ;;  %v2919_v14 = vadd.f32 %v3662_v8, %v4966_v5 }
 0x209   : > { %v2982_v15 = vmax.f32 %v2918_v11, 0.0  ;;  %v2920_v16 = vadd.f32 %v3663_v12, %v4968_v6 }
 0x20a   : > { %3045 = vst [vmem:[%s4976_s17 + $0x180] sm:$0xff] %v2981_v13  ;;  %v2983_v17 = vmax.f32 %v2919_v14, 0.0  ;;  %v1544_v19 = vpop.f32.mrb[52].mxu1 }
 0x20b   : > { %3046 = vst [vmem:[%s4976_s17 + $0x188] sm:$0xff] %v2982_v15  ;;  %v2984_v18 = vmax.f32 %v2920_v16, 0.0  ;;  %v2764_v20 = vpop.f32.mrb[52].mxu0  ;;  %v1546_v22 = vpop.f32.mrb[53].mxu1 }
 0x20c   : > { %3047 = vst [vmem:[%s4976_s17 + $0x190] sm:$0xff] %v2983_v17  ;;  %v3664_v21 = vadd.f32 %v2764_v20, %v1544_v19  ;;  %v2766_v23 = vpop.f32.mrb[53].mxu0  ;;  %v1548_v25 = vpop.f32.mrb[54].mxu1 }
 0x20d   : > { %3048 = vst [vmem:[%s4976_s17 + $0x198] sm:$0xff] %v2984_v18  ;;  %v3665_v24 = vadd.f32 %v2766_v23, %v1546_v22  ;;  %v2768_v26 = vpop.f32.mrb[54].mxu0  ;;  %v1550_v29 = vpop.f32.mrb[55].mxu1 }
 0x20e   : > { %v2921_v27 = vadd.f32 %v3664_v21, %v4966_v5  ;;  %v3666_v28 = vadd.f32 %v2768_v26, %v1548_v25  ;;  %v2770_v30 = vpop.f32.mrb[55].mxu0 }
 0x20f   : > { %v2922_v31 = vadd.f32 %v3665_v24, %v4968_v6  ;;  %v3667_v32 = vadd.f32 %v2770_v30, %v1550_v29 }
 0x210   : > { %v2985_v33 = vmax.f32 %v2921_v27, 0.0  ;;  %v2923_v34 = vadd.f32 %v3666_v28, %v4966_v5 }
 0x211   : > { %v2986_v35 = vmax.f32 %v2922_v31, 0.0  ;;  %v2924_v36 = vadd.f32 %v3667_v32, %v4968_v6 }
 0x212   : > { %3049 = vst [vmem:[%s4976_s17 + $0x1a0] sm:$0xff] %v2985_v33  ;;  %v2987_v37 = vmax.f32 %v2923_v34, 0.0  ;;  %v1554_v39 = vpop.f32.mrb[56].mxu1 }
 0x213   : > { %3050 = vst [vmem:[%s4976_s17 + $0x1a8] sm:$0xff] %v2986_v35  ;;  %v2988_v38 = vmax.f32 %v2924_v36, 0.0  ;;  %v2774_v40 = vpop.f32.mrb[56].mxu0  ;;  %v1556_v42 = vpop.f32.mrb[57].mxu1 }
 0x214   : > { %3051 = vst [vmem:[%s4976_s17 + $0x1b0] sm:$0xff] %v2987_v37  ;;  %v3668_v41 = vadd.f32 %v2774_v40, %v1554_v39  ;;  %v2776_v43 = vpop.f32.mrb[57].mxu0  ;;  %v1558_v45 = vpop.f32.mrb[58].mxu1 }
 0x215   : > { %3052 = vst [vmem:[%s4976_s17 + $0x1b8] sm:$0xff] %v2988_v38  ;;  %v3669_v44 = vadd.f32 %v2776_v43, %v1556_v42  ;;  %v2778_v46 = vpop.f32.mrb[58].mxu0  ;;  %v1560_v49 = vpop.f32.mrb[59].mxu1 }
 0x216   : > { %v2925_v47 = vadd.f32 %v3668_v41, %v4966_v5  ;;  %v3670_v48 = vadd.f32 %v2778_v46, %v1558_v45  ;;  %v2780_v50 = vpop.f32.mrb[59].mxu0 }
 0x217   : > { %v2926_v51 = vadd.f32 %v3669_v44, %v4968_v6  ;;  %v3671_v52 = vadd.f32 %v2780_v50, %v1560_v49 }
 0x218   : > { %v2989_v53 = vmax.f32 %v2925_v47, 0.0  ;;  %v2927_v54 = vadd.f32 %v3670_v48, %v4966_v5 }
 0x219   : > { %v2990_v55 = vmax.f32 %v2926_v51, 0.0  ;;  %v2928_v56 = vadd.f32 %v3671_v52, %v4968_v6 }
 0x21a   : > { %3053 = vst [vmem:[%s4976_s17 + $0x1c0] sm:$0xff] %v2989_v53  ;;  %v2991_v57 = vmax.f32 %v2927_v54, 0.0  ;;  %v1564_v59 = vpop.f32.mrb[60].mxu1 }
 0x21b   : > { %3054 = vst [vmem:[%s4976_s17 + $0x1c8] sm:$0xff] %v2990_v55  ;;  %v2992_v58 = vmax.f32 %v2928_v56, 0.0  ;;  %v2784_v60 = vpop.f32.mrb[60].mxu0  ;;  %v1566_v62 = vpop.f32.mrb[61].mxu1 }
 0x21c   : > { %3055 = vst [vmem:[%s4976_s17 + $0x1d0] sm:$0xff] %v2991_v57  ;;  %v3672_v61 = vadd.f32 %v2784_v60, %v1564_v59  ;;  %v2786_v63 = vpop.f32.mrb[61].mxu0  ;;  %v1568_v1 = vpop.f32.mrb[62].mxu1 }
 0x21d   : > { %3056 = vst [vmem:[%s4976_s17 + $0x1d8] sm:$0xff] %v2992_v58  ;;  %v3673_v0 = vadd.f32 %v2786_v63, %v1566_v62  ;;  %v2788_v2 = vpop.f32.mrb[62].mxu0  ;;  %v1570_v7 = vpop.f32.mrb[63].mxu1 }
 0x21e   : > { %v2929_v3 = vadd.f32 %v3672_v61, %v4966_v5  ;;  %v3674_v4 = vadd.f32 %v2788_v2, %v1568_v1  ;;  %v2790_v8 = vpop.f32.mrb[63].mxu0 }
 0x21f   : > { %v2930_v9 = vadd.f32 %v3673_v0, %v4968_v6  ;;  %v3675_v10 = vadd.f32 %v2790_v8, %v1570_v7 }
 0x220   : > { %v2993_v11 = vmax.f32 %v2929_v3, 0.0  ;;  %v2931_v12 = vadd.f32 %v3674_v4, %v4966_v5 }
 0x221   : > { %v2994_v13 = vmax.f32 %v2930_v9, 0.0  ;;  %v2932_v14 = vadd.f32 %v3675_v10, %v4968_v6 }
 0x222   : > { %3057 = vst [vmem:[%s4976_s17 + $0x1e0] sm:$0xff] %v2993_v11  ;;  %v2995_v15 = vmax.f32 %v2931_v12, 0.0 }
 0x223   : > { %3058 = vst [vmem:[%s4976_s17 + $0x1e8] sm:$0xff] %v2994_v13  ;;  %v2996_v16 = vmax.f32 %v2932_v14, 0.0 }
 0x224   : > { %3059 = vst [vmem:[%s4976_s17 + $0x1f0] sm:$0xff] %v2995_v15 }
 0x225   : > { %3060 = vst [vmem:[%s4976_s17 + $0x1f8] sm:$0xff] %v2996_v16 }
 0x226   : > { %4258 = shalt.err (!%p4255_p5)
}
 0x227   : > { %s4259_s16 = scalar_lea.hbm %s5104_s8, 8192  ;;  %s4263_s18 = scalar_lea.hbm %s5165_s6, 16384 }
 0x228   : > { %p4260_p6 = scmp.ne.s32.totalorder %s5104_s8, %s4259_s16  ;;  %p4264_p10 = scmp.lt.u32.totalorder %s5104_s8, %s5165_s6 }
 0x229   : > { %p4265_p11 = scmp.lt.u32.totalorder %s4263_s18, %s4259_s16  ;;  %p4267_p13 = scmp.lt.u32.totalorder %s4259_s16, %s5104_s8 }
 0x22a   : > { %p4261_p7 = pnand %p4260_p6, %p4403_p4 }
 0x22b   : > { %p4266_p12 = por %p4265_p11, %p4264_p10 }
 0x22c   : > { %p4262_p9 = pneg %p4261_p7 }
 0x22d   : > { %p4268_p0 = por %p4267_p13, %p4266_p12 }
 0x22f   : > { %p4269_p1 = pnand %p4268_p0, %p4262_p9 }
 0x231   : > { %4272 = shalt.err (!%p4269_p1)
}
 0x232   : > { %s4326_s27 = smov 256   ;;  %s4327_s30 = smov 16  }
 0x233   : > { %3804 = dma.vmem_to_hbm [thread:$0]  (%p4403_p4), %s5106_s20, 8192, %s5104_s8, %s5113_s24, %s4326_s27, %s4326_s27, %s4327_s30  }
 0x234 PF: > { %p3810_p2 = scmp.ge.s32.totalorder %s4323_s26, 2  ;;  %s3093_s11 = sand.u32 1, %s4303_s21  }
 0x235   : > { %s3094_s13 = scalar_lea.sflag [#allocation3], %s3093_s11 }
 0x236   : > { %p3807_p3 = pnand %p3810_p2, %p4410_p8 }
 0x238   : > { %4298 = dma.done.wait (!%p3807_p3), %s3094_s13, 8192  }
 0x239   : > { %4300 = vsyncadd (!%p3807_p3), %s3094_s13, 4294959104  ;;  %s19_s26 = sadd.s32 1, %s4323_s26   ;;  %s5168_s21 = smov %s4307_s22 }
 0x23a   : > { %p16_p5 = scmp.ge.s32.totalorder %s19_s26, 4   ;;  %s5169_s22 = smov %s4311_s23 }
 0x23b   : > { %s5170_s23 = smov %s4416_s10  ;;  %s5171_s24 = smov %s4319_s25 }
 0x23c   : > { %s5172_s25 = smov %s5174_s29  ;;  %18 = sbr.rel (!%p16_p5) target bundleno = 4 (0x4), region = 94 }
 0x243   :  { %3099 = vsyncpa [#allocation3], 1 }
 0x244   :  { %3101 = vsyncpa [#allocation3 + $0x1], 1 }

</bundles_post_ra>
